<compile_context>
chip_gen: v5e
topology: v5e:2x2
jax: 0.10.0
libtpu: 0.0.40
codegen_flags: <defaults>
</compile_context>

<pallas_src>
import jax
import jax.numpy as jnp
from jax.experimental import pallas as pl
from jax.experimental.pallas import tpu as pltpu


# --------------------------- static architecture ---------------------------

# (C_in_total, C_out) per conv.  dec2/3/4 consume cat((up, skip), dim=1), so
# their C_in splits in half at the concat boundary.
_CONV_CH = {
    "enc1": (1, 32), "enc2": (32, 64), "enc3": (64, 128), "enc4": (128, 256),
    "dec1": (256, 128), "dec2": (256, 64), "dec3": (128, 32), "dec4": (64, 1),
    "skip1": (128, 128), "skip2": (64, 64), "skip3": (32, 32),
}
_BIAS_ORDER = ("enc1", "enc2", "enc3", "enc4", "dec1", "dec2", "dec3", "dec4",
               "skip1", "skip2", "skip3")

_WBUF_COLS = 256          # max C_out; every packed matrix uses columns [0:C_out)
_ROW_ALIGN = 16           # bf16 sublane tile -> 16-row-aligned block offsets


def _weight_entries():
    """Static (key, rows, cols) list describing every packed weight matrix."""
    ent = []
    # Narrow encoder convs (per-tap C_in < 128): one (C_in, C_out) matrix per tap.
    for name in ("enc1", "enc2", "enc3"):
        cin, cout = _CONV_CH[name]
        for k in range(3):
            ent.append((f"{name}_{k}", cin, cout))
    # 128-aligned convs: single stacked (3*C_in, C_out) matrix -> one MXU dot.
    for name in ("enc4", "dec1"):
        cin, cout = _CONV_CH[name]
        ent.append((name, 3 * cin, cout))
    # dec2: both cat halves are 128 wide -> one merged (768, 64) matrix.
    cin, cout = _CONV_CH["dec2"]
    ent.append(("dec2", 3 * cin, cout))
    # dec3/dec4: cat halves are 64/32 wide -> per-tap matrices per half.
    for name in ("dec3", "dec4"):
        cin, cout = _CONV_CH[name]
        half = cin // 2
        for tag in ("u", "s"):
            for k in range(3):
                ent.append((f"{name}_{tag}{k}", half, cout))
    # 1x1 skip convs.
    for name in ("skip1", "skip2", "skip3"):
        cin, cout = _CONV_CH[name]
        ent.append((name, cin, cout))
    return ent


def _make_weight_layout():
    layout, row = {}, 0
    for key, r, c in _weight_entries():
        layout[key] = (row, r, c)
        row += -(-r // _ROW_ALIGN) * _ROW_ALIGN
    return layout, row


_W_LAYOUT, _W_ROWS = _make_weight_layout()
_B_LAYOUT = {name: (i, _CONV_CH[name][1]) for i, name in enumerate(_BIAS_ORDER)}
_B_ROWS = -(-len(_BIAS_ORDER) // 8) * 8


# --------------------------- parameter preparation -------------------------

def init_params(key):
    """PyTorch-layout Conv1d params: w (C_out, C_in, K), b (C_out,)."""
    def conv_p(k, c_out, c_in, ksz):
        kw, kb = jax.random.split(k)
        bound = 1.0 / jnp.sqrt(jnp.float32(c_in * ksz))
        w = jax.random.uniform(kw, (c_out, c_in, ksz), jnp.float32, -bound, bound)
        b = jax.random.uniform(kb, (c_out,), jnp.float32, -bound, bound)
        return w, b

    ks = jax.random.split(key, 11)
    params = {}
    names3 = ("enc1", "enc2", "enc3", "enc4", "dec1", "dec2", "dec3", "dec4")
    for i, name in enumerate(names3):
        cin, cout = _CONV_CH[name]
        params[name] = conv_p(ks[i], cout, cin, 3)
    for j, name in enumerate(("skip1", "skip2", "skip3")):
        cin, cout = _CONV_CH[name]
        params[name] = conv_p(ks[8 + j], cout, cin, 1)
    return params


def preprocess_params(params):
    """One-time repack into two kernel inputs: a flat bf16 weight slab and a
    flat f32 bias slab.  Row offsets are the static _W_LAYOUT / _B_LAYOUT."""
    def tap_mat(w, k):              # (Cout, Cin, 3) tap k -> (Cin, Cout)
        return jnp.transpose(w[:, :, k], (1, 0))

    def stack_mat(w):               # (Cout, Cin, 3) -> (3*Cin, Cout), row = k*Cin + c
        c_out, c_in, ksz = w.shape
        return jnp.transpose(w, (2, 1, 0)).reshape(ksz * c_in, c_out)

    mats = {}
    for name in ("enc1", "enc2", "enc3"):
        w = params[name][0]
        for k in range(3):
            mats[f"{name}_{k}"] = tap_mat(w, k)
    mats["enc4"] = stack_mat(params["enc4"][0])
    mats["dec1"] = stack_mat(params["dec1"][0])

    w = params["dec2"][0]
    h = w.shape[1] // 2
    # torch.cat((up, skip), dim=1): rows [0:3h) = up-half taps, [3h:6h) = skip-half.
    mats["dec2"] = jnp.concatenate(
        [stack_mat(w[:, :h, :]), stack_mat(w[:, h:, :])], axis=0)

    for name in ("dec3", "dec4"):
        w = params[name][0]
        h = w.shape[1] // 2
        for k in range(3):
            mats[f"{name}_u{k}"] = tap_mat(w[:, :h, :], k)
            mats[f"{name}_s{k}"] = tap_mat(w[:, h:, :], k)

    for name in ("skip1", "skip2", "skip3"):
        mats[name] = jnp.transpose(params[name][0][:, :, 0], (1, 0))

    wbuf = jnp.zeros((_W_ROWS, _WBUF_COLS), jnp.float32)
    for key, (off, r, c) in _W_LAYOUT.items():
        m = mats[key]
        assert m.shape == (r, c), (key, m.shape, (r, c))
        wbuf = wbuf.at[off:off + r, :c].set(m)
    wbuf = wbuf.astype(jnp.bfloat16)

    bbuf = jnp.zeros((_B_ROWS, _WBUF_COLS), jnp.float32)
    for name, (i, c) in _B_LAYOUT.items():
        bbuf = bbuf.at[i, :c].set(params[name][1])
    return wbuf, bbuf


# ------------------------------ fused kernel -------------------------------

def _make_udcae_kernel(L):
    """L = per-sample length.  Activations are (M, C) with M = B_TILE * L_layer:
    samples stacked along rows, channels on lanes."""
    f32, bf16 = jnp.float32, jnp.bfloat16

    def kernel(x_ref, w_ref, b_ref, o_ref):
        def wmat(key):                       # static slice of the weight slab
            off, r, c = _W_LAYOUT[key]
            return w_ref[off:off + r, 0:c]   # (r, c) bf16

        def bias(name):                      # static slice of the bias slab
            i, c = _B_LAYOUT[name]
            return b_ref[i:i + 1, 0:c]       # (1, c) f32

        def shifted(x, sl, d):
            # d=-1: row i -> x[i-1]; d=+1: row i -> x[i+1]; zeros at the edges of
            # every sample (each sample occupies `sl` consecutive rows).
            m, c = x.shape
            zrow = jnp.zeros((1, c), x.dtype)
            if d < 0:
                r = jnp.concatenate([zrow, x[:-1, :]], axis=0)
            else:
                r = jnp.concatenate([x[1:, :], zrow], axis=0)
            if m > sl:                       # interior sample boundaries (B_TILE > 1)
                rows = jax.lax.broadcasted_iota(jnp.int32, (m, 1), 0)
                edge = (rows % sl) == (0 if d < 0 else sl - 1)
                r = jnp.where(edge, jnp.zeros((), x.dtype), r)
            return r

        def conv3_taps(x, prefix, sl):
            # Three accumulating dots: avoids lane-concat of sub-128-wide slabs.
            y = jnp.dot(shifted(x, sl, -1), wmat(f"{prefix}0"),
                        preferred_element_type=f32)
            y += jnp.dot(x, wmat(f"{prefix}1"), preferred_element_type=f32)
            y += jnp.dot(shifted(x, sl, +1), wmat(f"{prefix}2"),
                         preferred_element_type=f32)
            return y

        def win3(x, sl):
            # Lane-stack of the 3 shifted windows (used only where Cin is 128-aligned).
            return jnp.concatenate(
                [shifted(x, sl, -1), x, shifted(x, sl, +1)], axis=1)

        def conv3_stack(x, key, sl):
            return jnp.dot(win3(x, sl), wmat(key), preferred_element_type=f32)

        def conv1(x, name):                  # 1x1 skip conv (no ReLU)
            return jnp.dot(x, wmat(name), preferred_element_type=f32) + bias(name)

        def act(y, name):
            # f32 bias + ReLU epilogue, bf16 activation out (one cast per layer).
            return jnp.maximum(y + bias(name), 0.0).astype(bf16)

        def maxpool2(x):                     # MaxPool1d(2): pairs never cross samples
            m, c = x.shape
            return jnp.max(x.reshape(m // 2, 2, c), axis=1)

        def up2(x):                          # nearest-neighbour upsample x2
            m, c = x.shape
            return jnp.broadcast_to(x[:, None, :], (m, 2, c)).reshape(2 * m, c)

        x0 = x_ref[0].astype(bf16)                                   # (M, 1)

        # ---- encoder ----
        x1 = act(conv3_taps(x0, "enc1_", L), "enc1")                 # (M,   32)
        x2 = act(conv3_taps(maxpool2(x1), "enc2_", L // 2), "enc2")  # (M/2, 64)
        x3 = act(conv3_taps(maxpool2(x2), "enc3_", L // 4), "enc3")  # (M/4, 128)
        x4 = act(conv3_stack(maxpool2(x3), "enc4", L // 8), "enc4")  # (M/8, 256)

        # ---- decoder ----
        x5 = act(conv3_stack(x4, "dec1", L // 8), "dec1")            # (M/8, 128)

        s1 = conv1(x3, "skip1").astype(bf16)                         # (M/4, 128)
        xw = jnp.concatenate(
            [win3(up2(x5), L // 4), win3(s1, L // 4)], axis=1)       # (M/4, 768)
        x6 = act(jnp.dot(xw, wmat("dec2"),
                         preferred_element_type=f32), "dec2")        # (M/4, 64)

        s2 = conv1(x2, "skip2").astype(bf16)                         # (M/2, 64)
        x7 = act(conv3_taps(up2(x6), "dec3_u", L // 2)
                 + conv3_taps(s2, "dec3_s", L // 2), "dec3")         # (M/2, 32)

        s3 = conv1(x1, "skip3").astype(bf16)                         # (M,   32)
        x8 = (conv3_taps(up2(x7), "dec4_u", L)
              + conv3_taps(s3, "dec4_s", L) + bias("dec4"))          # (M, 1) f32, no ReLU

        o_ref[0] = x8.astype(o_ref.dtype)

    return kernel


# --------------------------------- forward ---------------------------------

def _pick_b_tile(batch, max_tile=128):
    """Largest divisor of `batch` that keeps >= 2 grid steps (both v7x TCs) and a
    bounded per-step VMEM footprint."""
    if batch <= 1:
        return 1
    target = min(max_tile, max(1, batch // 2))
    for t in range(target, 0, -1):
        if batch % t == 0:
            return t
    return 1


def udcae_forward(wbuf, bbuf, x, *, b_tile=None):
    """x: (B, 1, L) float32 (NCL, like the PyTorch module) -> (B, 1, L)."""
    B, c_in, L = x.shape
    assert c_in == 1 and L % 8 == 0 and L >= 16, (c_in, L)
    if b_tile is None:
        b_tile = _pick_b_tile(B)
    assert B % b_tile == 0, (B, b_tile)
    nt = B // b_tile
    M = b_tile * L

    # Channels-on-lanes; samples of a tile stacked along rows: (nt, M, 1).
    x_rows = jnp.transpose(x, (0, 2, 1)).reshape(nt, M, 1)

    out = pl.pallas_call(
        _make_udcae_kernel(L),
        out_shape=jax.ShapeDtypeStruct((nt, M, 1), jnp.float32),
        grid=(nt,),
        in_specs=[
            pl.BlockSpec((1, M, 1), lambda t: (t, 0, 0)),
            pl.BlockSpec((_W_ROWS, _WBUF_COLS), lambda t: (0, 0)),  # weight slab
            pl.BlockSpec((_B_ROWS, _WBUF_COLS), lambda t: (0, 0)),  # bias slab
        ],
        out_specs=pl.BlockSpec((1, M, 1), lambda t: (t, 0, 0)),
        compiler_params=pltpu.CompilerParams(
            dimension_semantics=("parallel",),          # shard batch tiles across TCs
            vmem_limit_bytes=32 * 1024 * 1024),
    )(x_rows, wbuf, bbuf)

    return jnp.transpose(out.reshape(B, L, 1), (0, 2, 1))           # back to (B, 1, L)


# ---------------------------------- main -----------------------------------

if __name__ == "__main__":
    key = jax.random.PRNGKey(0)
    k_param, k_x = jax.random.split(key)

    params = init_params(k_param)
    wbuf, bbuf = preprocess_params(params)               # one-time repack
    x = jax.random.normal(k_x, (2, 1, 16), dtype=jnp.float32)   # (B, C=1, L)

    out = jax.jit(udcae_forward)(wbuf, bbuf, x)
    out = jax.block_until_ready(out)

    assert out.shape == (2, 1, 16), out.shape
    assert out.dtype == jnp.float32
    assert bool(jnp.all(jnp.isfinite(out)))
    print("KERNEL_OK")
</pallas_src>

<mosaic_0001>
module attributes {stable_mosaic.version = 11 : i64} {
  func.func @kernel(%arg0: i32, %arg1: memref<1x16x1xf32, #tpu.memory_space<vmem>>, %arg2: memref<3056x256xbf16, #tpu.memory_space<vmem>>, %arg3: memref<16x256xf32, #tpu.memory_space<vmem>>, %arg4: memref<1x16x1xf32, #tpu.memory_space<vmem>>) attributes {dimension_semantics = [#tpu.dimension_semantics<parallel>], iteration_bounds = array<i64: 2>, scalar_prefetch = 0 : i64, scratch_operands = 0 : i64, tpu.core_type = #tpu.core_type<tc>, window_params = [{transform_indices = @transform_0, window_bounds = array<i64: 1, 16, 1>}, {pipeline_mode = #tpu.pipeline_mode<synchronous>, transform_indices = @transform_1, window_bounds = array<i64: 3056, 256>}, {pipeline_mode = #tpu.pipeline_mode<synchronous>, transform_indices = @transform_2, window_bounds = array<i64: 16, 256>}, {transform_indices = @transform_3, window_bounds = array<i64: 1, 16, 1>}]} {
    %c0 = arith.constant 0 : index
    %c0_0 = arith.constant 0 : index
    %c0_1 = arith.constant 0 : index
    %0 = vector.load %arg1[%c0, %c0_0, %c0_1] : memref<1x16x1xf32, #tpu.memory_space<vmem>>, vector<1x16x1xf32>
    %1 = vector.shape_cast %0 : vector<1x16x1xf32> to vector<16x1xf32>
    %2 = arith.truncf %1 : vector<16x1xf32> to vector<16x1xbf16>
    %cst = arith.constant 0.000000e+00 : bf16
    %3 = vector.broadcast %cst : bf16 to vector<1x1xbf16>
    %4 = vector.extract_strided_slice %2 {offsets = [0, 0], sizes = [15, 1], strides = [1, 1]} : vector<16x1xbf16> to vector<15x1xbf16>
    %5 = tpu.concatenate %3, %4 in 0 : vector<1x1xbf16>, vector<15x1xbf16> -> vector<16x1xbf16>
    %c0_2 = arith.constant 0 : index
    %c0_3 = arith.constant 0 : index
    %6 = vector.load %arg2[%c0_2, %c0_3] : memref<3056x256xbf16, #tpu.memory_space<vmem>>, vector<1x32xbf16>
    %cst_4 = arith.constant dense<0.000000e+00> : vector<16x32xf32>
    %7 = tpu.matmul %5, %6, %cst_4 {dimension_numbers = #tpu.dot_dimension_numbers<[1], [0], [0], [1], [0, 0, 1, 1], [], []>} : vector<16x1xbf16>, vector<1x32xbf16>, vector<16x32xf32> -> vector<16x32xf32>
    %c16 = arith.constant 16 : index
    %c0_5 = arith.constant 0 : index
    %8 = vector.load %arg2[%c16, %c0_5] : memref<3056x256xbf16, #tpu.memory_space<vmem>>, vector<1x32xbf16>
    %cst_6 = arith.constant dense<0.000000e+00> : vector<16x32xf32>
    %9 = tpu.matmul %2, %8, %cst_6 {dimension_numbers = #tpu.dot_dimension_numbers<[1], [0], [0], [1], [0, 0, 1, 1], [], []>} : vector<16x1xbf16>, vector<1x32xbf16>, vector<16x32xf32> -> vector<16x32xf32>
    %10 = arith.addf %7, %9 : vector<16x32xf32>
    %cst_7 = arith.constant 0.000000e+00 : bf16
    %11 = vector.broadcast %cst_7 : bf16 to vector<1x1xbf16>
    %12 = vector.extract_strided_slice %2 {offsets = [1, 0], sizes = [15, 1], strides = [1, 1]} : vector<16x1xbf16> to vector<15x1xbf16>
    %13 = tpu.concatenate %12, %11 in 0 : vector<15x1xbf16>, vector<1x1xbf16> -> vector<16x1xbf16>
    %c32 = arith.constant 32 : index
    %c0_8 = arith.constant 0 : index
    %14 = vector.load %arg2[%c32, %c0_8] : memref<3056x256xbf16, #tpu.memory_space<vmem>>, vector<1x32xbf16>
    %cst_9 = arith.constant dense<0.000000e+00> : vector<16x32xf32>
    %15 = tpu.matmul %13, %14, %cst_9 {dimension_numbers = #tpu.dot_dimension_numbers<[1], [0], [0], [1], [0, 0, 1, 1], [], []>} : vector<16x1xbf16>, vector<1x32xbf16>, vector<16x32xf32> -> vector<16x32xf32>
    %16 = arith.addf %10, %15 : vector<16x32xf32>
    %c0_10 = arith.constant 0 : index
    %c0_11 = arith.constant 0 : index
    %17 = vector.load %arg3[%c0_10, %c0_11] : memref<16x256xf32, #tpu.memory_space<vmem>>, vector<1x32xf32>
    %18 = vector.broadcast %17 : vector<1x32xf32> to vector<16x32xf32>
    %19 = arith.addf %16, %18 : vector<16x32xf32>
    %cst_12 = arith.constant 0.000000e+00 : f32
    %20 = vector.broadcast %cst_12 : f32 to vector<16x32xf32>
    %21 = arith.maximumf %19, %20 : vector<16x32xf32>
    %22 = arith.truncf %21 : vector<16x32xf32> to vector<16x32xbf16>
    %23 = vector.shape_cast %22 : vector<16x32xbf16> to vector<8x2x32xbf16>
    %cst_13 = arith.constant dense<0xFF80> : vector<8x32xbf16>
    %24 = vector.multi_reduction <maximumf>, %23, %cst_13 [1] : vector<8x2x32xbf16> to vector<8x32xbf16>
    %cst_14 = arith.constant 0.000000e+00 : bf16
    %25 = vector.broadcast %cst_14 : bf16 to vector<1x32xbf16>
    %26 = vector.extract_strided_slice %24 {offsets = [0, 0], sizes = [7, 32], strides = [1, 1]} : vector<8x32xbf16> to vector<7x32xbf16>
    %27 = tpu.concatenate %25, %26 in 0 : vector<1x32xbf16>, vector<7x32xbf16> -> vector<8x32xbf16>
    %c48 = arith.constant 48 : index
    %c0_15 = arith.constant 0 : index
    %28 = vector.load %arg2[%c48, %c0_15] : memref<3056x256xbf16, #tpu.memory_space<vmem>>, vector<32x64xbf16>
    %cst_16 = arith.constant dense<0.000000e+00> : vector<8x64xf32>
    %29 = tpu.matmul %27, %28, %cst_16 {dimension_numbers = #tpu.dot_dimension_numbers<[1], [0], [0], [1], [0, 0, 1, 1], [], []>} : vector<8x32xbf16>, vector<32x64xbf16>, vector<8x64xf32> -> vector<8x64xf32>
    %c80 = arith.constant 80 : index
    %c0_17 = arith.constant 0 : index
    %30 = vector.load %arg2[%c80, %c0_17] : memref<3056x256xbf16, #tpu.memory_space<vmem>>, vector<32x64xbf16>
    %cst_18 = arith.constant dense<0.000000e+00> : vector<8x64xf32>
    %31 = tpu.matmul %24, %30, %cst_18 {dimension_numbers = #tpu.dot_dimension_numbers<[1], [0], [0], [1], [0, 0, 1, 1], [], []>} : vector<8x32xbf16>, vector<32x64xbf16>, vector<8x64xf32> -> vector<8x64xf32>
    %32 = arith.addf %29, %31 : vector<8x64xf32>
    %cst_19 = arith.constant 0.000000e+00 : bf16
    %33 = vector.broadcast %cst_19 : bf16 to vector<1x32xbf16>
    %34 = vector.extract_strided_slice %24 {offsets = [1, 0], sizes = [7, 32], strides = [1, 1]} : vector<8x32xbf16> to vector<7x32xbf16>
    %35 = tpu.concatenate %34, %33 in 0 : vector<7x32xbf16>, vector<1x32xbf16> -> vector<8x32xbf16>
    %c112 = arith.constant 112 : index
    %c0_20 = arith.constant 0 : index
    %36 = vector.load %arg2[%c112, %c0_20] : memref<3056x256xbf16, #tpu.memory_space<vmem>>, vector<32x64xbf16>
    %cst_21 = arith.constant dense<0.000000e+00> : vector<8x64xf32>
    %37 = tpu.matmul %35, %36, %cst_21 {dimension_numbers = #tpu.dot_dimension_numbers<[1], [0], [0], [1], [0, 0, 1, 1], [], []>} : vector<8x32xbf16>, vector<32x64xbf16>, vector<8x64xf32> -> vector<8x64xf32>
    %38 = arith.addf %32, %37 : vector<8x64xf32>
    %c1 = arith.constant 1 : index
    %c0_22 = arith.constant 0 : index
    %39 = vector.load %arg3[%c1, %c0_22] : memref<16x256xf32, #tpu.memory_space<vmem>>, vector<1x64xf32>
    %40 = vector.broadcast %39 : vector<1x64xf32> to vector<8x64xf32>
    %41 = arith.addf %38, %40 : vector<8x64xf32>
    %cst_23 = arith.constant 0.000000e+00 : f32
    %42 = vector.broadcast %cst_23 : f32 to vector<8x64xf32>
    %43 = arith.maximumf %41, %42 : vector<8x64xf32>
    %44 = arith.truncf %43 : vector<8x64xf32> to vector<8x64xbf16>
    %45 = vector.shape_cast %44 : vector<8x64xbf16> to vector<4x2x64xbf16>
    %cst_24 = arith.constant dense<0xFF80> : vector<4x64xbf16>
    %46 = vector.multi_reduction <maximumf>, %45, %cst_24 [1] : vector<4x2x64xbf16> to vector<4x64xbf16>
    %cst_25 = arith.constant 0.000000e+00 : bf16
    %47 = vector.broadcast %cst_25 : bf16 to vector<1x64xbf16>
    %48 = vector.extract_strided_slice %46 {offsets = [0, 0], sizes = [3, 64], strides = [1, 1]} : vector<4x64xbf16> to vector<3x64xbf16>
    %49 = tpu.concatenate %47, %48 in 0 : vector<1x64xbf16>, vector<3x64xbf16> -> vector<4x64xbf16>
    %c144 = arith.constant 144 : index
    %c0_26 = arith.constant 0 : index
    %50 = vector.load %arg2[%c144, %c0_26] : memref<3056x256xbf16, #tpu.memory_space<vmem>>, vector<64x128xbf16>
    %cst_27 = arith.constant dense<0.000000e+00> : vector<4x128xf32>
    %51 = tpu.matmul %49, %50, %cst_27 {dimension_numbers = #tpu.dot_dimension_numbers<[1], [0], [0], [1], [0, 0, 1, 1], [], []>} : vector<4x64xbf16>, vector<64x128xbf16>, vector<4x128xf32> -> vector<4x128xf32>
    %c208 = arith.constant 208 : index
    %c0_28 = arith.constant 0 : index
    %52 = vector.load %arg2[%c208, %c0_28] : memref<3056x256xbf16, #tpu.memory_space<vmem>>, vector<64x128xbf16>
    %cst_29 = arith.constant dense<0.000000e+00> : vector<4x128xf32>
    %53 = tpu.matmul %46, %52, %cst_29 {dimension_numbers = #tpu.dot_dimension_numbers<[1], [0], [0], [1], [0, 0, 1, 1], [], []>} : vector<4x64xbf16>, vector<64x128xbf16>, vector<4x128xf32> -> vector<4x128xf32>
    %54 = arith.addf %51, %53 : vector<4x128xf32>
    %cst_30 = arith.constant 0.000000e+00 : bf16
    %55 = vector.broadcast %cst_30 : bf16 to vector<1x64xbf16>
    %56 = vector.extract_strided_slice %46 {offsets = [1, 0], sizes = [3, 64], strides = [1, 1]} : vector<4x64xbf16> to vector<3x64xbf16>
    %57 = tpu.concatenate %56, %55 in 0 : vector<3x64xbf16>, vector<1x64xbf16> -> vector<4x64xbf16>
    %c272 = arith.constant 272 : index
    %c0_31 = arith.constant 0 : index
    %58 = vector.load %arg2[%c272, %c0_31] : memref<3056x256xbf16, #tpu.memory_space<vmem>>, vector<64x128xbf16>
    %cst_32 = arith.constant dense<0.000000e+00> : vector<4x128xf32>
    %59 = tpu.matmul %57, %58, %cst_32 {dimension_numbers = #tpu.dot_dimension_numbers<[1], [0], [0], [1], [0, 0, 1, 1], [], []>} : vector<4x64xbf16>, vector<64x128xbf16>, vector<4x128xf32> -> vector<4x128xf32>
    %60 = arith.addf %54, %59 : vector<4x128xf32>
    %c2 = arith.constant 2 : index
    %c0_33 = arith.constant 0 : index
    %61 = vector.load %arg3[%c2, %c0_33] : memref<16x256xf32, #tpu.memory_space<vmem>>, vector<1x128xf32>
    %62 = vector.broadcast %61 : vector<1x128xf32> to vector<4x128xf32>
    %63 = arith.addf %60, %62 : vector<4x128xf32>
    %cst_34 = arith.constant 0.000000e+00 : f32
    %64 = vector.broadcast %cst_34 : f32 to vector<4x128xf32>
    %65 = arith.maximumf %63, %64 : vector<4x128xf32>
    %66 = arith.truncf %65 : vector<4x128xf32> to vector<4x128xbf16>
    %67 = vector.shape_cast %66 : vector<4x128xbf16> to vector<2x2x128xbf16>
    %cst_35 = arith.constant dense<0xFF80> : vector<2x128xbf16>
    %68 = vector.multi_reduction <maximumf>, %67, %cst_35 [1] : vector<2x2x128xbf16> to vector<2x128xbf16>
    %cst_36 = arith.constant 0.000000e+00 : bf16
    %69 = vector.broadcast %cst_36 : bf16 to vector<1x128xbf16>
    %70 = vector.extract_strided_slice %68 {offsets = [0, 0], sizes = [1, 128], strides = [1, 1]} : vector<2x128xbf16> to vector<1x128xbf16>
    %71 = tpu.concatenate %69, %70 in 0 : vector<1x128xbf16>, vector<1x128xbf16> -> vector<2x128xbf16>
    %cst_37 = arith.constant 0.000000e+00 : bf16
    %72 = vector.broadcast %cst_37 : bf16 to vector<1x128xbf16>
    %73 = vector.extract_strided_slice %68 {offsets = [1, 0], sizes = [1, 128], strides = [1, 1]} : vector<2x128xbf16> to vector<1x128xbf16>
    %74 = tpu.concatenate %73, %72 in 0 : vector<1x128xbf16>, vector<1x128xbf16> -> vector<2x128xbf16>
    %75 = tpu.concatenate %71, %68, %74 in 1 : vector<2x128xbf16>, vector<2x128xbf16>, vector<2x128xbf16> -> vector<2x384xbf16>
    %c336 = arith.constant 336 : index
    %c0_38 = arith.constant 0 : index
    %76 = vector.load %arg2[%c336, %c0_38] : memref<3056x256xbf16, #tpu.memory_space<vmem>>, vector<384x256xbf16>
    %cst_39 = arith.constant dense<0.000000e+00> : vector<2x256xf32>
    %77 = tpu.matmul %75, %76, %cst_39 {dimension_numbers = #tpu.dot_dimension_numbers<[1], [0], [0], [1], [0, 0, 1, 1], [], []>} : vector<2x384xbf16>, vector<384x256xbf16>, vector<2x256xf32> -> vector<2x256xf32>
    %c3 = arith.constant 3 : index
    %c0_40 = arith.constant 0 : index
    %78 = vector.load %arg3[%c3, %c0_40] : memref<16x256xf32, #tpu.memory_space<vmem>>, vector<1x256xf32>
    %79 = vector.broadcast %78 : vector<1x256xf32> to vector<2x256xf32>
    %80 = arith.addf %77, %79 : vector<2x256xf32>
    %cst_41 = arith.constant 0.000000e+00 : f32
    %81 = vector.broadcast %cst_41 : f32 to vector<2x256xf32>
    %82 = arith.maximumf %80, %81 : vector<2x256xf32>
    %83 = arith.truncf %82 : vector<2x256xf32> to vector<2x256xbf16>
    %cst_42 = arith.constant 0.000000e+00 : bf16
    %84 = vector.broadcast %cst_42 : bf16 to vector<1x256xbf16>
    %85 = vector.extract_strided_slice %83 {offsets = [0, 0], sizes = [1, 256], strides = [1, 1]} : vector<2x256xbf16> to vector<1x256xbf16>
    %86 = tpu.concatenate %84, %85 in 0 : vector<1x256xbf16>, vector<1x256xbf16> -> vector<2x256xbf16>
    %cst_43 = arith.constant 0.000000e+00 : bf16
    %87 = vector.broadcast %cst_43 : bf16 to vector<1x256xbf16>
    %88 = vector.extract_strided_slice %83 {offsets = [1, 0], sizes = [1, 256], strides = [1, 1]} : vector<2x256xbf16> to vector<1x256xbf16>
    %89 = tpu.concatenate %88, %87 in 0 : vector<1x256xbf16>, vector<1x256xbf16> -> vector<2x256xbf16>
    %90 = tpu.concatenate %86, %83, %89 in 1 : vector<2x256xbf16>, vector<2x256xbf16>, vector<2x256xbf16> -> vector<2x768xbf16>
    %c720 = arith.constant 720 : index
    %c0_44 = arith.constant 0 : index
    %91 = vector.load %arg2[%c720, %c0_44] : memref<3056x256xbf16, #tpu.memory_space<vmem>>, vector<768x128xbf16>
    %cst_45 = arith.constant dense<0.000000e+00> : vector<2x128xf32>
    %92 = tpu.matmul %90, %91, %cst_45 {dimension_numbers = #tpu.dot_dimension_numbers<[1], [0], [0], [1], [0, 0, 1, 1], [], []>} : vector<2x768xbf16>, vector<768x128xbf16>, vector<2x128xf32> -> vector<2x128xf32>
    %c4 = arith.constant 4 : index
    %c0_46 = arith.constant 0 : index
    %93 = vector.load %arg3[%c4, %c0_46] : memref<16x256xf32, #tpu.memory_space<vmem>>, vector<1x128xf32>
    %94 = vector.broadcast %93 : vector<1x128xf32> to vector<2x128xf32>
    %95 = arith.addf %92, %94 : vector<2x128xf32>
    %cst_47 = arith.constant 0.000000e+00 : f32
    %96 = vector.broadcast %cst_47 : f32 to vector<2x128xf32>
    %97 = arith.maximumf %95, %96 : vector<2x128xf32>
    %98 = arith.truncf %97 : vector<2x128xf32> to vector<2x128xbf16>
    %c2832 = arith.constant 2832 : index
    %c0_48 = arith.constant 0 : index
    %99 = vector.load %arg2[%c2832, %c0_48] : memref<3056x256xbf16, #tpu.memory_space<vmem>>, vector<128x128xbf16>
    %cst_49 = arith.constant dense<0.000000e+00> : vector<4x128xf32>
    %100 = tpu.matmul %66, %99, %cst_49 {dimension_numbers = #tpu.dot_dimension_numbers<[1], [0], [0], [1], [0, 0, 1, 1], [], []>} : vector<4x128xbf16>, vector<128x128xbf16>, vector<4x128xf32> -> vector<4x128xf32>
    %c8 = arith.constant 8 : index
    %c0_50 = arith.constant 0 : index
    %101 = vector.load %arg3[%c8, %c0_50] : memref<16x256xf32, #tpu.memory_space<vmem>>, vector<1x128xf32>
    %102 = vector.broadcast %101 : vector<1x128xf32> to vector<4x128xf32>
    %103 = arith.addf %100, %102 : vector<4x128xf32>
    %104 = arith.truncf %103 : vector<4x128xf32> to vector<4x128xbf16>
    %105 = vector.shape_cast %98 : vector<2x128xbf16> to vector<2x1x128xbf16>
    %106 = vector.shape_cast %105 : vector<2x1x128xbf16> to vector<2x1x128xbf16>
    %107 = vector.broadcast %106 : vector<2x1x128xbf16> to vector<2x2x128xbf16>
    %108 = vector.shape_cast %107 : vector<2x2x128xbf16> to vector<4x128xbf16>
    %cst_51 = arith.constant 0.000000e+00 : bf16
    %109 = vector.broadcast %cst_51 : bf16 to vector<1x128xbf16>
    %110 = vector.extract_strided_slice %108 {offsets = [0, 0], sizes = [3, 128], strides = [1, 1]} : vector<4x128xbf16> to vector<3x128xbf16>
    %111 = tpu.concatenate %109, %110 in 0 : vector<1x128xbf16>, vector<3x128xbf16> -> vector<4x128xbf16>
    %cst_52 = arith.constant 0.000000e+00 : bf16
    %112 = vector.broadcast %cst_52 : bf16 to vector<1x128xbf16>
    %113 = vector.extract_strided_slice %108 {offsets = [1, 0], sizes = [3, 128], strides = [1, 1]} : vector<4x128xbf16> to vector<3x128xbf16>
    %114 = tpu.concatenate %113, %112 in 0 : vector<3x128xbf16>, vector<1x128xbf16> -> vector<4x128xbf16>
    %115 = tpu.concatenate %111, %108, %114 in 1 : vector<4x128xbf16>, vector<4x128xbf16>, vector<4x128xbf16> -> vector<4x384xbf16>
    %cst_53 = arith.constant 0.000000e+00 : bf16
    %116 = vector.broadcast %cst_53 : bf16 to vector<1x128xbf16>
    %117 = vector.extract_strided_slice %104 {offsets = [0, 0], sizes = [3, 128], strides = [1, 1]} : vector<4x128xbf16> to vector<3x128xbf16>
    %118 = tpu.concatenate %116, %117 in 0 : vector<1x128xbf16>, vector<3x128xbf16> -> vector<4x128xbf16>
    %cst_54 = arith.constant 0.000000e+00 : bf16
    %119 = vector.broadcast %cst_54 : bf16 to vector<1x128xbf16>
    %120 = vector.extract_strided_slice %104 {offsets = [1, 0], sizes = [3, 128], strides = [1, 1]} : vector<4x128xbf16> to vector<3x128xbf16>
    %121 = tpu.concatenate %120, %119 in 0 : vector<3x128xbf16>, vector<1x128xbf16> -> vector<4x128xbf16>
    %122 = tpu.concatenate %118, %104, %121 in 1 : vector<4x128xbf16>, vector<4x128xbf16>, vector<4x128xbf16> -> vector<4x384xbf16>
    %123 = tpu.concatenate %115, %122 in 1 : vector<4x384xbf16>, vector<4x384xbf16> -> vector<4x768xbf16>
    %c1488 = arith.constant 1488 : index
    %c0_55 = arith.constant 0 : index
    %124 = vector.load %arg2[%c1488, %c0_55] : memref<3056x256xbf16, #tpu.memory_space<vmem>>, vector<768x64xbf16>
    %cst_56 = arith.constant dense<0.000000e+00> : vector<4x64xf32>
    %125 = tpu.matmul %123, %124, %cst_56 {dimension_numbers = #tpu.dot_dimension_numbers<[1], [0], [0], [1], [0, 0, 1, 1], [], []>} : vector<4x768xbf16>, vector<768x64xbf16>, vector<4x64xf32> -> vector<4x64xf32>
    %c5 = arith.constant 5 : index
    %c0_57 = arith.constant 0 : index
    %126 = vector.load %arg3[%c5, %c0_57] : memref<16x256xf32, #tpu.memory_space<vmem>>, vector<1x64xf32>
    %127 = vector.broadcast %126 : vector<1x64xf32> to vector<4x64xf32>
    %128 = arith.addf %125, %127 : vector<4x64xf32>
    %cst_58 = arith.constant 0.000000e+00 : f32
    %129 = vector.broadcast %cst_58 : f32 to vector<4x64xf32>
    %130 = arith.maximumf %128, %129 : vector<4x64xf32>
    %131 = arith.truncf %130 : vector<4x64xf32> to vector<4x64xbf16>
    %c2960 = arith.constant 2960 : index
    %c0_59 = arith.constant 0 : index
    %132 = vector.load %arg2[%c2960, %c0_59] : memref<3056x256xbf16, #tpu.memory_space<vmem>>, vector<64x64xbf16>
    %cst_60 = arith.constant dense<0.000000e+00> : vector<8x64xf32>
    %133 = tpu.matmul %44, %132, %cst_60 {dimension_numbers = #tpu.dot_dimension_numbers<[1], [0], [0], [1], [0, 0, 1, 1], [], []>} : vector<8x64xbf16>, vector<64x64xbf16>, vector<8x64xf32> -> vector<8x64xf32>
    %c9 = arith.constant 9 : index
    %c0_61 = arith.constant 0 : index
    %134 = vector.load %arg3[%c9, %c0_61] : memref<16x256xf32, #tpu.memory_space<vmem>>, vector<1x64xf32>
    %135 = vector.broadcast %134 : vector<1x64xf32> to vector<8x64xf32>
    %136 = arith.addf %133, %135 : vector<8x64xf32>
    %137 = arith.truncf %136 : vector<8x64xf32> to vector<8x64xbf16>
    %138 = vector.shape_cast %131 : vector<4x64xbf16> to vector<4x1x64xbf16>
    %139 = vector.shape_cast %138 : vector<4x1x64xbf16> to vector<4x1x64xbf16>
    %140 = vector.broadcast %139 : vector<4x1x64xbf16> to vector<4x2x64xbf16>
    %141 = vector.shape_cast %140 : vector<4x2x64xbf16> to vector<8x64xbf16>
    %cst_62 = arith.constant 0.000000e+00 : bf16
    %142 = vector.broadcast %cst_62 : bf16 to vector<1x64xbf16>
    %143 = vector.extract_strided_slice %141 {offsets = [0, 0], sizes = [7, 64], strides = [1, 1]} : vector<8x64xbf16> to vector<7x64xbf16>
    %144 = tpu.concatenate %142, %143 in 0 : vector<1x64xbf16>, vector<7x64xbf16> -> vector<8x64xbf16>
    %c2256 = arith.constant 2256 : index
    %c0_63 = arith.constant 0 : index
    %145 = vector.load %arg2[%c2256, %c0_63] : memref<3056x256xbf16, #tpu.memory_space<vmem>>, vector<64x32xbf16>
    %cst_64 = arith.constant dense<0.000000e+00> : vector<8x32xf32>
    %146 = tpu.matmul %144, %145, %cst_64 {dimension_numbers = #tpu.dot_dimension_numbers<[1], [0], [0], [1], [0, 0, 1, 1], [], []>} : vector<8x64xbf16>, vector<64x32xbf16>, vector<8x32xf32> -> vector<8x32xf32>
    %c2320 = arith.constant 2320 : index
    %c0_65 = arith.constant 0 : index
    %147 = vector.load %arg2[%c2320, %c0_65] : memref<3056x256xbf16, #tpu.memory_space<vmem>>, vector<64x32xbf16>
    %cst_66 = arith.constant dense<0.000000e+00> : vector<8x32xf32>
    %148 = tpu.matmul %141, %147, %cst_66 {dimension_numbers = #tpu.dot_dimension_numbers<[1], [0], [0], [1], [0, 0, 1, 1], [], []>} : vector<8x64xbf16>, vector<64x32xbf16>, vector<8x32xf32> -> vector<8x32xf32>
    %149 = arith.addf %146, %148 : vector<8x32xf32>
    %cst_67 = arith.constant 0.000000e+00 : bf16
    %150 = vector.broadcast %cst_67 : bf16 to vector<1x64xbf16>
    %151 = vector.extract_strided_slice %141 {offsets = [1, 0], sizes = [7, 64], strides = [1, 1]} : vector<8x64xbf16> to vector<7x64xbf16>
    %152 = tpu.concatenate %151, %150 in 0 : vector<7x64xbf16>, vector<1x64xbf16> -> vector<8x64xbf16>
    %c2384 = arith.constant 2384 : index
    %c0_68 = arith.constant 0 : index
    %153 = vector.load %arg2[%c2384, %c0_68] : memref<3056x256xbf16, #tpu.memory_space<vmem>>, vector<64x32xbf16>
    %cst_69 = arith.constant dense<0.000000e+00> : vector<8x32xf32>
    %154 = tpu.matmul %152, %153, %cst_69 {dimension_numbers = #tpu.dot_dimension_numbers<[1], [0], [0], [1], [0, 0, 1, 1], [], []>} : vector<8x64xbf16>, vector<64x32xbf16>, vector<8x32xf32> -> vector<8x32xf32>
    %155 = arith.addf %149, %154 : vector<8x32xf32>
    %cst_70 = arith.constant 0.000000e+00 : bf16
    %156 = vector.broadcast %cst_70 : bf16 to vector<1x64xbf16>
    %157 = vector.extract_strided_slice %137 {offsets = [0, 0], sizes = [7, 64], strides = [1, 1]} : vector<8x64xbf16> to vector<7x64xbf16>
    %158 = tpu.concatenate %156, %157 in 0 : vector<1x64xbf16>, vector<7x64xbf16> -> vector<8x64xbf16>
    %c2448 = arith.constant 2448 : index
    %c0_71 = arith.constant 0 : index
    %159 = vector.load %arg2[%c2448, %c0_71] : memref<3056x256xbf16, #tpu.memory_space<vmem>>, vector<64x32xbf16>
    %cst_72 = arith.constant dense<0.000000e+00> : vector<8x32xf32>
    %160 = tpu.matmul %158, %159, %cst_72 {dimension_numbers = #tpu.dot_dimension_numbers<[1], [0], [0], [1], [0, 0, 1, 1], [], []>} : vector<8x64xbf16>, vector<64x32xbf16>, vector<8x32xf32> -> vector<8x32xf32>
    %c2512 = arith.constant 2512 : index
    %c0_73 = arith.constant 0 : index
    %161 = vector.load %arg2[%c2512, %c0_73] : memref<3056x256xbf16, #tpu.memory_space<vmem>>, vector<64x32xbf16>
    %cst_74 = arith.constant dense<0.000000e+00> : vector<8x32xf32>
    %162 = tpu.matmul %137, %161, %cst_74 {dimension_numbers = #tpu.dot_dimension_numbers<[1], [0], [0], [1], [0, 0, 1, 1], [], []>} : vector<8x64xbf16>, vector<64x32xbf16>, vector<8x32xf32> -> vector<8x32xf32>
    %163 = arith.addf %160, %162 : vector<8x32xf32>
    %cst_75 = arith.constant 0.000000e+00 : bf16
    %164 = vector.broadcast %cst_75 : bf16 to vector<1x64xbf16>
    %165 = vector.extract_strided_slice %137 {offsets = [1, 0], sizes = [7, 64], strides = [1, 1]} : vector<8x64xbf16> to vector<7x64xbf16>
    %166 = tpu.concatenate %165, %164 in 0 : vector<7x64xbf16>, vector<1x64xbf16> -> vector<8x64xbf16>
    %c2576 = arith.constant 2576 : index
    %c0_76 = arith.constant 0 : index
    %167 = vector.load %arg2[%c2576, %c0_76] : memref<3056x256xbf16, #tpu.memory_space<vmem>>, vector<64x32xbf16>
    %cst_77 = arith.constant dense<0.000000e+00> : vector<8x32xf32>
    %168 = tpu.matmul %166, %167, %cst_77 {dimension_numbers = #tpu.dot_dimension_numbers<[1], [0], [0], [1], [0, 0, 1, 1], [], []>} : vector<8x64xbf16>, vector<64x32xbf16>, vector<8x32xf32> -> vector<8x32xf32>
    %169 = arith.addf %163, %168 : vector<8x32xf32>
    %170 = arith.addf %155, %169 : vector<8x32xf32>
    %c6 = arith.constant 6 : index
    %c0_78 = arith.constant 0 : index
    %171 = vector.load %arg3[%c6, %c0_78] : memref<16x256xf32, #tpu.memory_space<vmem>>, vector<1x32xf32>
    %172 = vector.broadcast %171 : vector<1x32xf32> to vector<8x32xf32>
    %173 = arith.addf %170, %172 : vector<8x32xf32>
    %cst_79 = arith.constant 0.000000e+00 : f32
    %174 = vector.broadcast %cst_79 : f32 to vector<8x32xf32>
    %175 = arith.maximumf %173, %174 : vector<8x32xf32>
    %176 = arith.truncf %175 : vector<8x32xf32> to vector<8x32xbf16>
    %c3024 = arith.constant 3024 : index
    %c0_80 = arith.constant 0 : index
    %177 = vector.load %arg2[%c3024, %c0_80] : memref<3056x256xbf16, #tpu.memory_space<vmem>>, vector<32x32xbf16>
    %cst_81 = arith.constant dense<0.000000e+00> : vector<16x32xf32>
    %178 = tpu.matmul %22, %177, %cst_81 {dimension_numbers = #tpu.dot_dimension_numbers<[1], [0], [0], [1], [0, 0, 1, 1], [], []>} : vector<16x32xbf16>, vector<32x32xbf16>, vector<16x32xf32> -> vector<16x32xf32>
    %c10 = arith.constant 10 : index
    %c0_82 = arith.constant 0 : index
    %179 = vector.load %arg3[%c10, %c0_82] : memref<16x256xf32, #tpu.memory_space<vmem>>, vector<1x32xf32>
    %180 = vector.broadcast %179 : vector<1x32xf32> to vector<16x32xf32>
    %181 = arith.addf %178, %180 : vector<16x32xf32>
    %182 = arith.truncf %181 : vector<16x32xf32> to vector<16x32xbf16>
    %183 = vector.shape_cast %176 : vector<8x32xbf16> to vector<8x1x32xbf16>
    %184 = vector.shape_cast %183 : vector<8x1x32xbf16> to vector<8x1x32xbf16>
    %185 = vector.broadcast %184 : vector<8x1x32xbf16> to vector<8x2x32xbf16>
    %186 = vector.shape_cast %185 : vector<8x2x32xbf16> to vector<16x32xbf16>
    %cst_83 = arith.constant 0.000000e+00 : bf16
    %187 = vector.broadcast %cst_83 : bf16 to vector<1x32xbf16>
    %188 = vector.extract_strided_slice %186 {offsets = [0, 0], sizes = [15, 32], strides = [1, 1]} : vector<16x32xbf16> to vector<15x32xbf16>
    %189 = tpu.concatenate %187, %188 in 0 : vector<1x32xbf16>, vector<15x32xbf16> -> vector<16x32xbf16>
    %c2640 = arith.constant 2640 : index
    %c0_84 = arith.constant 0 : index
    %190 = vector.load %arg2[%c2640, %c0_84] : memref<3056x256xbf16, #tpu.memory_space<vmem>>, vector<32x1xbf16>
    %cst_85 = arith.constant dense<0.000000e+00> : vector<16x1xf32>
    %191 = tpu.matmul %189, %190, %cst_85 {dimension_numbers = #tpu.dot_dimension_numbers<[1], [0], [0], [1], [0, 0, 1, 1], [], []>} : vector<16x32xbf16>, vector<32x1xbf16>, vector<16x1xf32> -> vector<16x1xf32>
    %c2672 = arith.constant 2672 : index
    %c0_86 = arith.constant 0 : index
    %192 = vector.load %arg2[%c2672, %c0_86] : memref<3056x256xbf16, #tpu.memory_space<vmem>>, vector<32x1xbf16>
    %cst_87 = arith.constant dense<0.000000e+00> : vector<16x1xf32>
    %193 = tpu.matmul %186, %192, %cst_87 {dimension_numbers = #tpu.dot_dimension_numbers<[1], [0], [0], [1], [0, 0, 1, 1], [], []>} : vector<16x32xbf16>, vector<32x1xbf16>, vector<16x1xf32> -> vector<16x1xf32>
    %194 = arith.addf %191, %193 : vector<16x1xf32>
    %cst_88 = arith.constant 0.000000e+00 : bf16
    %195 = vector.broadcast %cst_88 : bf16 to vector<1x32xbf16>
    %196 = vector.extract_strided_slice %186 {offsets = [1, 0], sizes = [15, 32], strides = [1, 1]} : vector<16x32xbf16> to vector<15x32xbf16>
    %197 = tpu.concatenate %196, %195 in 0 : vector<15x32xbf16>, vector<1x32xbf16> -> vector<16x32xbf16>
    %c2704 = arith.constant 2704 : index
    %c0_89 = arith.constant 0 : index
    %198 = vector.load %arg2[%c2704, %c0_89] : memref<3056x256xbf16, #tpu.memory_space<vmem>>, vector<32x1xbf16>
    %cst_90 = arith.constant dense<0.000000e+00> : vector<16x1xf32>
    %199 = tpu.matmul %197, %198, %cst_90 {dimension_numbers = #tpu.dot_dimension_numbers<[1], [0], [0], [1], [0, 0, 1, 1], [], []>} : vector<16x32xbf16>, vector<32x1xbf16>, vector<16x1xf32> -> vector<16x1xf32>
    %200 = arith.addf %194, %199 : vector<16x1xf32>
    %cst_91 = arith.constant 0.000000e+00 : bf16
    %201 = vector.broadcast %cst_91 : bf16 to vector<1x32xbf16>
    %202 = vector.extract_strided_slice %182 {offsets = [0, 0], sizes = [15, 32], strides = [1, 1]} : vector<16x32xbf16> to vector<15x32xbf16>
    %203 = tpu.concatenate %201, %202 in 0 : vector<1x32xbf16>, vector<15x32xbf16> -> vector<16x32xbf16>
    %c2736 = arith.constant 2736 : index
    %c0_92 = arith.constant 0 : index
    %204 = vector.load %arg2[%c2736, %c0_92] : memref<3056x256xbf16, #tpu.memory_space<vmem>>, vector<32x1xbf16>
    %cst_93 = arith.constant dense<0.000000e+00> : vector<16x1xf32>
    %205 = tpu.matmul %203, %204, %cst_93 {dimension_numbers = #tpu.dot_dimension_numbers<[1], [0], [0], [1], [0, 0, 1, 1], [], []>} : vector<16x32xbf16>, vector<32x1xbf16>, vector<16x1xf32> -> vector<16x1xf32>
    %c2768 = arith.constant 2768 : index
    %c0_94 = arith.constant 0 : index
    %206 = vector.load %arg2[%c2768, %c0_94] : memref<3056x256xbf16, #tpu.memory_space<vmem>>, vector<32x1xbf16>
    %cst_95 = arith.constant dense<0.000000e+00> : vector<16x1xf32>
    %207 = tpu.matmul %182, %206, %cst_95 {dimension_numbers = #tpu.dot_dimension_numbers<[1], [0], [0], [1], [0, 0, 1, 1], [], []>} : vector<16x32xbf16>, vector<32x1xbf16>, vector<16x1xf32> -> vector<16x1xf32>
    %208 = arith.addf %205, %207 : vector<16x1xf32>
    %cst_96 = arith.constant 0.000000e+00 : bf16
    %209 = vector.broadcast %cst_96 : bf16 to vector<1x32xbf16>
    %210 = vector.extract_strided_slice %182 {offsets = [1, 0], sizes = [15, 32], strides = [1, 1]} : vector<16x32xbf16> to vector<15x32xbf16>
    %211 = tpu.concatenate %210, %209 in 0 : vector<15x32xbf16>, vector<1x32xbf16> -> vector<16x32xbf16>
    %c2800 = arith.constant 2800 : index
    %c0_97 = arith.constant 0 : index
    %212 = vector.load %arg2[%c2800, %c0_97] : memref<3056x256xbf16, #tpu.memory_space<vmem>>, vector<32x1xbf16>
    %cst_98 = arith.constant dense<0.000000e+00> : vector<16x1xf32>
    %213 = tpu.matmul %211, %212, %cst_98 {dimension_numbers = #tpu.dot_dimension_numbers<[1], [0], [0], [1], [0, 0, 1, 1], [], []>} : vector<16x32xbf16>, vector<32x1xbf16>, vector<16x1xf32> -> vector<16x1xf32>
    %214 = arith.addf %208, %213 : vector<16x1xf32>
    %215 = arith.addf %200, %214 : vector<16x1xf32>
    %c7 = arith.constant 7 : index
    %c0_99 = arith.constant 0 : index
    %216 = vector.load %arg3[%c7, %c0_99] : memref<16x256xf32, #tpu.memory_space<vmem>>, vector<1x1xf32>
    %217 = vector.broadcast %216 : vector<1x1xf32> to vector<16x1xf32>
    %218 = arith.addf %215, %217 : vector<16x1xf32>
    %c0_100 = arith.constant 0 : index
    %c0_101 = arith.constant 0 : index
    %c0_102 = arith.constant 0 : index
    %219 = vector.load %arg4[%c0_100, %c0_101, %c0_102] : memref<1x16x1xf32, #tpu.memory_space<vmem>>, vector<1x16x1xf32>
    %220 = vector.shape_cast %219 : vector<1x16x1xf32> to vector<16x1xf32>
    %221 = vector.shape_cast %218 : vector<16x1xf32> to vector<1x16x1xf32>
    tpu.vector_store %arg4[%c0_100, %c0_101, %c0_102], %221 {strides = array<i32>} : memref<1x16x1xf32, #tpu.memory_space<vmem>>, vector<1x16x1xf32>,
    return
  }
  func.func @transform_0(%arg0: i32) -> (i32, i32, i32) {
    %c0_i32 = arith.constant 0 : i32
    %c0_i32_0 = arith.constant 0 : i32
    %c0_i32_1 = arith.constant 0 : i32
    return %arg0, %c0_i32, %c0_i32_0 : i32, i32, i32
  }
  func.func @transform_1(%arg0: i32) -> (i32, i32) {
    %c0_i32 = arith.constant 0 : i32
    %c0_i32_0 = arith.constant 0 : i32
    %c0_i32_1 = arith.constant 0 : i32
    return %c0_i32, %c0_i32_0 : i32, i32
  }
  func.func @transform_2(%arg0: i32) -> (i32, i32) {
    %c0_i32 = arith.constant 0 : i32
    %c0_i32_0 = arith.constant 0 : i32
    %c0_i32_1 = arith.constant 0 : i32
    return %c0_i32, %c0_i32_0 : i32, i32
  }
  func.func @transform_3(%arg0: i32) -> (i32, i32, i32) {
    %c0_i32 = arith.constant 0 : i32
    %c0_i32_0 = arith.constant 0 : i32
    %c0_i32_1 = arith.constant 0 : i32
    return %arg0, %c0_i32, %c0_i32_0 : i32, i32, i32
  }
}

</mosaic_0001>

<bundles_post_ra>
// kernel: udcae_forward.1
= control target key start
LH: loop header
LB: loop body
LE: loop exit
PB: predicated region body
PF: predicated region fallthrough
CT: control target
= control target key end

     0   :  { %8 = vsyncpa [#allocation3], 0  ;;  %s4801_s0 = inlined_call_operand.vmem [shape: f32[2,16,1], index: 0, kind: input, shape index: {}]   ;;  %s4802_s1 = inlined_call_operand.hbm [shape: bf16[3056,256], index: 1, kind: input, shape index: {}]   ;;  %s4803_s2 = inlined_call_operand.hbm [shape: f32[16,256], index: 2, kind: input, shape index: {}]   ;;  %s4804_s3 = inlined_call_operand.vmem [shape: f32[2,16,1], index: 3, kind: output, shape index: {}]  }
   0x1   :  { %9 = vsyncpa [#allocation5], 0  ;;  %s4499_s12 = smov 0  }
   0x2 LB: > { %s125_s15 = sshll.u32 %s4802_s1, 4  ;;  %s3255_s16 = sadd.s32 4294967295, %s4470_s12   ;;  %s4470_s12 = sphi %s4499_s12, %s15_s12   ;;  %s126_s15 = int_to_ptr.hbm [resolvable:$true] %s125_s15 }
   0x3   : > { %p3257_p0 = scmp.ge.s32.totalorder %s4470_s12, 1  ;;  %p114_p1 = scmp.lt.s32.totalorder %s4470_s12, 3 }
   0x4   : > { %p4377_p2 = scmp.eq.s32.totalorder %s3255_s16, 0  ;;  %s4472_s18 = smov [#allocation2]  }
   0x5   : > { %p4510_p3 = pnand %p3257_p0, %p114_p1  ;;  %s127_s19 = sshll.u32 %s4472_s18, 4  ;;  %s128_s19 = int_to_ptr.vmem [resolvable:$true] %s127_s19 }
   0x6   : > { %s139_s22 = sshll.u32 %s4803_s2, 4  ;;  %s4473_s23 = smov [#allocation4]   ;;  %s140_s22 = int_to_ptr.hbm [resolvable:$true] %s139_s22 }
   0x7   : > { %p4370_p4 = pneg %p4510_p3  ;;  %s141_s24 = sshll.u32 %s4473_s23, 4  ;;  %s142_s24 = int_to_ptr.vmem [resolvable:$true] %s141_s24 }
   0x8   : > { %s4474_s25 = smov 128   ;;  %s4475_s26 = smov 8  }
   0x9   : > { %p4371_p5 = pnand %p4377_p2, %p4370_p4  ;;  %s4476_s27 = smov 256  }
   0xa   : > { %s4477_s28 = smov 16   ;;  %165 = sbr.rel (%p4510_p3) target bundleno = 1473 (0x5c1), region = 32 }
   0xb   : > { %4373 = dma.hbm_to_vmem [thread:$0]  (!%p4371_p5), %s126_s15, 48896, %s128_s19, [#allocation3], %s4474_s25, %s4474_s25, %s4475_s26  }
   0xc   : > { %4376 = dma.hbm_to_vmem [thread:$0]  (!%p4371_p5), %s140_s22, 512, %s142_s24, [#allocation5], %s4476_s27, %s4476_s27, %s4477_s28  }
   0xf   : > { %4461 = dma.done.wait (%p4377_p2), [#allocation3], 48896  }
  0x10   : > { %4463 = vsyncadd (%p4377_p2), [#allocation3], 4294918400 }
  0x11   : > { %4465 = dma.done.wait (%p4377_p2), [#allocation5], 512  }
  0x12   : > { %4467 = vsyncadd (%p4377_p2), [#allocation5], 4294966784  ;;  %p195_p6 = scmp.lt.s32.totalorder %s3255_s16, 1  ;;  %vm223_vm0 = vcmask 1040384   ;;  %v4478_v0 = vmov 0   ;;  %vm229_vm1 = vcmask 7168  }
  0x13   : > { %v234_v1 = vsel %vm223_vm0, 65535, %v4478_v0  ;;  %v228_v2 = vld [vmem:[#allocation2 + $0x10] sm:$0x1]  ;;  %v227_v8 = vld [vmem:[#allocation2] sm:$0x1]  ;;  %vm275_vm3 = vcmask 1047552  }
  0x14   : > { %s4815_s16 = smov (!%p195_p6, %s3255_s16), 1  ;;  %v236_v5 = vand.u32 %v234_v1, %v228_v2  ;;  %v279_v9 = vld [vmem:[#allocation2 + $0x20] sm:$0x1]  ;;  %v256_v10 = vand.u32 %v234_v1, %v227_v8  ;;  %vm224_vm2 = vsmask.f32 256  ;;  %vm316_vm7 = vcmask 1041409  }
  0x15   : > { %s4148_s29 = sshll.u32 %s4815_s16, 4  ;;  %v284_v11 = vand.u32 %v279_v9, %v234_v1  ;;  %vm276_vm4 = vsmask.f32 7424  ;;  %vm4537_vm5 = vmand %vm223_vm0, %vm224_vm2  ;;  %v3286_v25 = vld [vmem:[#allocation2 + $0x40] sm:$0xf]  ;;  %vm320_vm8 = vcmask 1042434  }
  0x16   : > { %s199_s5 = scalar_lea.vmem %s4801_s0, %s4148_s29  ;;  %245 = vmatpush.bf16.msra.mxu0 %v236_v5  ;;  %265 = vmatpush.bf16.msra.mxu1 %v256_v10  ;;  %vm4541_vm6 = vmand %vm275_vm3, %vm276_vm4  ;;  %v4151_v26 = vld [vmem:[#allocation2 + $0x44] sm:$0xf0]  ;;  %v3295_v27 = vld [vmem:[#allocation2 + $0x80] sm:$0xf]  ;;  %vm324_vm9 = vcmask 1043459   ;;  %vm356_vm10 = vcmask 254976   ;;  %s204_s8 = scalar_lea.vmem %s4804_s3, %s4148_s29 }
  0x17   : > { %v206_v3 = vld [vmem:[%s199_s5] sm:$0xff]  ;;  %v207_v4 = vld [vmem:[%s199_s5 + $0x8] sm:$0xff]  ;;  %293 = vmatpush.bf16.msra.mxu2 %v284_v11  ;;  %v3287_v28 = vor.u32 %v4151_v26, %v3286_v25  ;;  %v4155_v29 = vld [vmem:[#allocation2 + $0x84] sm:$0xf0]  ;;  %vm444_vm11 = vcmask 1044484   ;;  %vm446_vm12 = vcmask 1045509  }
  0x18   : > { %v208_v6 = vpack.c.bf16 %v206_v3, %v206_v3  ;;  %v209_v7 = vpack.c.bf16 %v207_v4, %v207_v4  ;;  %v3277_v30 = vld [vmem:[#allocation2 + $0x60] sm:$0xf]  ;;  %v4153_v31 = vld [vmem:[#allocation2 + $0x64] sm:$0xf0]  ;;  %v3296_v32 = vor.u32 %v4155_v29, %v3295_v27  ;;  %v3273_v34 = vld [vmem:[#allocation2 + $0x50] sm:$0xf] }
  0x19   : > { %v3278_v33 = vor.u32 %v4153_v31, %v3277_v30  ;;  %v4152_v35 = vld [vmem:[#allocation2 + $0x54] sm:$0xf0]  ;;  %v3282_v36 = vld [vmem:[#allocation2 + $0x30] sm:$0xf]  ;;  %vm448_vm13 = vcmask 1046534   ;;  %vm450_vm14 = vcmask 1047559  }
  0x1a   : > { %v212_v12 = vunpack.c.l.b16 %v208_v6  ;;  %v213_v13 = vunpack.c.l.b16 %v209_v7  ;;  %524 = vmatpush.bf16.msrb.mxu0 %v3287_v28  ;;  %v4150_v37 = vld [vmem:[#allocation2 + $0x34] sm:$0xf0]  ;;  %v3291_v38 = vld [vmem:[#allocation2 + $0x70] sm:$0xf]  ;;  %568 = vmatpush.bf16.msrb.mxu1 %v3296_v32  ;;  %v3274_v41 = vor.u32 %v4152_v35, %v3273_v34  ;;  %vm539_vm15 = vcmask 1043456  }
  0x1b   : > { %v4154_v39 = vld [vmem:[#allocation2 + $0x74] sm:$0xf0]  ;;  %496 = vmatpush.bf16.msra.mxu3 %v3278_v33  ;;  %v3283_v42 = vor.u32 %v4150_v37, %v3282_v36  ;;  %v302_v47 = vld [vmem:[#allocation4] ss:$0 sm:$0xff]  ;;  %vm540_vm2 = vsmask.f32 3328 }
  0x1c   : > { %v214_v14 = vpack.c.b16 %v213_v13, %v212_v12  ;;  %v3292_v43 = vor.u32 %v4154_v39, %v3291_v38  ;;  %vm486_vm3 = vcmask 261120   ;;  %vm4606_vm4 = vmand %vm539_vm15, %vm540_vm2 }
  0x1e   : > { %3268 = vmatmul.msk.bf16.vlgmr.msra.gmra.mxu0 %vm229_vm1, %v214_v14  ;;  %v216_v15 = vshrl.u32 %v214_v14, 16  ;;  %v219_v16 = vshll.u32 %v214_v14, 16  ;;  %569 = vmatpush.bf16.msrb.mxu1 %v3292_v43 }
  0x1f   : > { %525 = vmatpush.bf16.msrb.mxu0 %v3283_v42  ;;  %497 = vmatpush.bf16.msra.mxu3 %v3274_v41 }
  0x20   : > { %v218_v18 = vrot.slane %v216_v15, 7  ;;  %v272_v19 = vrot.slane %v219_v16, 1 }
  0x22   : > { %v221_v21 = vor.u32 %v219_v16, %v218_v18  ;;  %v273_v22 = vor.u32 %v272_v19, %v216_v15 }
  0x24   : > { %v226_v23 = vsel %vm4537_vm5, 0, %v221_v21  ;;  %v278_v24 = vsel %vm4541_vm6, %v273_v22, 0 }
  0x25   : > { %3269 = vmatmul.msk.bf16.vlgmr.msra.gmra.mxu1 %vm229_vm1, %v226_v23  ;;  %3270 = vmatmul.msk.bf16.vlgmr.msra.gmra.mxu2 %vm229_vm1, %v278_v24 }
  0x9b   : > { %v247_v44 = vpop.f32.mrf.mxu0 }
  0xa2   : > { %v267_v40 = vpop.f32.mrf.mxu1 }
  0xa3   : > { %v268_v45 = vadd.f32 %v267_v40, %v247_v44  ;;  %v249_v52 = vpop.f32.mrf.mxu0 }
  0xa8   : > { %v295_v46 = vpop.f32.mrf.mxu2 }
  0xa9   : > { %v300_v48 = vadd.f32 %v295_v46, %v268_v45 }
  0xaa   : > { %v269_v50 = vpop.f32.mrf.mxu1 }
  0xab   : > { %v303_v49 = vadd.f32 %v302_v47, %v300_v48  ;;  %v270_v54 = vadd.f32 %v269_v50, %v249_v52 }
  0xad   : > { %v305_v51 = vmax.f32 %v303_v49, 0.0 }
  0xaf   : > { %v4551_v53 = vpack.c.bf16 %v305_v51, %v305_v51 }
  0xb0   : > { %v297_v55 = vpop.f32.mrf.mxu2 }
  0xb1   : > { %v311_v56 = vrot.slane %v4551_v53, 3  ;;  %v301_v57 = vadd.f32 %v297_v55, %v270_v54  ;;  %v2776_v24 = vunpack.c.l.b16 %v4551_v53 }
  0xb3   : > { %v315_v58 = vsel %vm223_vm0, %v4551_v53, %v311_v56  ;;  %v317_v59 = vsel %vm316_vm7, %v4551_v53, %v311_v56  ;;  %v321_v60 = vsel %vm320_vm8, %v4551_v53, %v311_v56  ;;  %v325_v61 = vsel %vm324_vm9, %v4551_v53, %v311_v56 }
  0xb4   : > { %v319_v62 = vrot.slane %v317_v59, 1  ;;  %v323_v63 = vrot.slane %v321_v60, 2  ;;  %v327_v0 = vrot.slane %v325_v61, 3  ;;  %v348_v1 = vunpack.c.l.bf16 %v315_v58 }
  0xb5   : > { %v304_v2 = vadd.f32 %v302_v47, %v301_v57 }
  0xb6   : > { %v349_v3 = vunpack.c.l.bf16 %v319_v62  ;;  %v350_v4 = vunpack.c.l.bf16 %v323_v63  ;;  %v351_v5 = vunpack.c.l.bf16 %v327_v0  ;;  %v357_v6 = vsel %vm356_vm10, %v348_v1, -inf }
  0xb7   : > { %v358_v7 = vrot.slane %v357_v6, 4  ;;  %v306_v8 = vmax.f32 %v304_v2, 0.0 }
  0xb8   : > { %v364_v9 = vsel %vm356_vm10, %v349_v3, -inf  ;;  %v371_v10 = vsel %vm356_vm10, %v350_v4, -inf  ;;  %v378_v11 = vsel %vm356_vm10, %v351_v5, -inf }
  0xb9   : > { %v359_v12 = vmax.f32 %v357_v6, %v358_v7  ;;  %v365_v13 = vrot.slane %v364_v9, 4  ;;  %v372_v14 = vrot.slane %v371_v10, 4  ;;  %v4566_v15 = vpack.c.bf16 %v306_v8, %v306_v8 }
  0xba   : > { %v379_v16 = vrot.slane %v378_v11, 4 }
  0xbb   : > { %v360_v18 = vrot.slane %v359_v12, 2  ;;  %v366_v19 = vmax.f32 %v364_v9, %v365_v13  ;;  %v373_v21 = vmax.f32 %v371_v10, %v372_v14  ;;  %v312_v22 = vrot.slane %v4566_v15, 3 }
  0xbc   : > { %v380_v23 = vmax.f32 %v378_v11, %v379_v16  ;;  %v2777_v25 = vunpack.c.l.b16 %v4566_v15 }
  0xbd   : > { %v367_v26 = vrot.slane %v366_v19, 2  ;;  %v330_v27 = vsel %vm223_vm0, %v4566_v15, %v312_v22  ;;  %v331_v28 = vsel %vm316_vm7, %v4566_v15, %v312_v22  ;;  %v334_v29 = vsel %vm320_vm8, %v4566_v15, %v312_v22 }
  0xbe   : > { %v333_v30 = vrot.slane %v331_v28, 1  ;;  %v352_v31 = vunpack.c.l.bf16 %v330_v27  ;;  %v336_v32 = vrot.slane %v334_v29, 2  ;;  %v337_v33 = vsel %vm324_vm9, %v4566_v15, %v312_v22 }
  0xbf   : > { %v339_v34 = vrot.slane %v337_v33, 3  ;;  %v361_v35 = vmax.f32 %v359_v12, %v360_v18  ;;  %v368_v36 = vmax.f32 %v366_v19, %v367_v26  ;;  %v374_v37 = vrot.slane %v373_v21, 2 }
  0xc0   : > { %v353_v38 = vunpack.c.l.bf16 %v333_v30  ;;  %v354_v39 = vunpack.c.l.bf16 %v336_v32  ;;  %v381_v40 = vrot.slane %v380_v23, 2  ;;  %v385_v41 = vsel %vm356_vm10, %v352_v31, -inf }
  0xc1   : > { %v355_v42 = vunpack.c.l.bf16 %v339_v34  ;;  %v362_v43 = vrot.slane %v361_v35, 1  ;;  %v369_v44 = vrot.slane %v368_v36, 1  ;;  %v375_v45 = vmax.f32 %v373_v21, %v374_v37 }
  0xc2   : > { %v382_v46 = vmax.f32 %v380_v23, %v381_v40  ;;  %v386_v47 = vrot.slane %v385_v41, 4  ;;  %v392_v48 = vsel %vm356_vm10, %v353_v38, -inf  ;;  %v399_v49 = vsel %vm356_vm10, %v354_v39, -inf }
  0xc3   : > { %v363_v50 = vmax.f32 %v361_v35, %v362_v43  ;;  %v370_v51 = vmax.f32 %v368_v36, %v369_v44  ;;  %v376_v52 = vrot.slane %v375_v45, 1  ;;  %v393_v53 = vrot.slane %v392_v48, 4 }
  0xc4   : > { %v383_v54 = vrot.slane %v382_v46, 1  ;;  %v387_v55 = vmax.f32 %v385_v41, %v386_v47  ;;  %v400_v56 = vrot.slane %v399_v49, 4  ;;  %v406_v57 = vsel %vm356_vm10, %v355_v42, -inf }
  0xc5   : > { %v377_v58 = vmax.f32 %v375_v45, %v376_v52  ;;  %v394_v59 = vmax.f32 %v392_v48, %v393_v53  ;;  %v407_v60 = vrot.slane %v406_v57, 4  ;;  %v413_v61 = vpack.c.bf16 %v363_v50, %v363_v50 }
  0xc6   : > { %v384_v62 = vmax.f32 %v382_v46, %v383_v54  ;;  %v388_v63 = vrot.slane %v387_v55, 2  ;;  %v401_v0 = vmax.f32 %v399_v49, %v400_v56  ;;  %v414_v1 = vpack.c.bf16 %v370_v51, %v370_v51 }
  0xc7   : > { %v395_v2 = vrot.slane %v394_v59, 2  ;;  %v408_v3 = vmax.f32 %v406_v57, %v407_v60  ;;  %v415_v4 = vpack.c.bf16 %v377_v58, %v377_v58  ;;  %v428_v5 = vperm.slane %v413_v61, 0 }
  0xc8   : > { %v389_v6 = vmax.f32 %v387_v55, %v388_v63  ;;  %v402_v7 = vrot.slane %v401_v0, 2  ;;  %v416_v8 = vpack.c.bf16 %v384_v62, %v384_v62  ;;  %v429_v9 = vperm.slane %v414_v1, 0 }
  0xc9   : > { %v396_v10 = vmax.f32 %v394_v59, %v395_v2  ;;  %v409_v11 = vrot.slane %v408_v3, 2  ;;  %v430_v12 = vperm.slane %v415_v4, 0  ;;  %v435_v13 = vunpack.c.l.b16 %v428_v5  ;;  %v3312_v4 = vld [vmem:[#allocation2 + $0x100] sm:$0xf]  ;;  %v4163_v5 = vld [vmem:[#allocation2 + $0x104] sm:$0xf0] }
  0xca   : > { %v390_v14 = vrot.slane %v389_v6, 1  ;;  %v403_v15 = vmax.f32 %v401_v0, %v402_v7  ;;  %v431_v16 = vperm.slane %v416_v8, 0  ;;  %v436_v18 = vunpack.c.l.b16 %v429_v9  ;;  %v4159_v8 = vld [vmem:[#allocation2 + $0xc4] sm:$0xf0]  ;;  %v3346_v9 = vld [vmem:[#allocation2 + $0x140] sm:$0xf] }
  0xcb   : > { %v397_v19 = vrot.slane %v396_v10, 1  ;;  %v410_v21 = vmax.f32 %v408_v3, %v409_v11  ;;  %v437_v22 = vunpack.c.l.b16 %v430_v12  ;;  %v4583_v23 = vpack.c.b16 %v2777_v25, %v2776_v24 }
  0xcc   : > { %v391_v26 = vmax.f32 %v389_v6, %v390_v14  ;;  %v404_v27 = vrot.slane %v403_v15, 1  ;;  %v466_v28 = vsel %vm316_vm7, %v436_v18, %v435_v13  ;;  %v442_v31 = vsel %vm320_vm8, %v436_v18, %v435_v13  ;;  %v3329_v6 = vld [vmem:[#allocation2 + $0xc0] sm:$0xf]  ;;  %v3308_v13 = vld [vmem:[#allocation2 + $0xf0] sm:$0xf] }
  0xcd   : > { %v398_v29 = vmax.f32 %v396_v10, %v397_v19  ;;  %v411_v30 = vrot.slane %v410_v21, 1  ;;  %v438_v36 = vunpack.c.l.b16 %v431_v16  ;;  %v467_v37 = vsel %vm320_vm8, %v437_v22, %v466_v28  ;;  %v4167_v10 = vld [vmem:[#allocation2 + $0x144] sm:$0xf0]  ;;  %v4162_v14 = vld [vmem:[#allocation2 + $0xf4] sm:$0xf0] }
  0xce   : > { %v405_v32 = vmax.f32 %v403_v15, %v404_v27  ;;  %v417_v33 = vpack.c.bf16 %v391_v26, %v391_v26  ;;  %v443_v38 = vsel %vm324_vm9, %v437_v22, %v442_v31  ;;  %v531_v39 = vsel %vm316_vm7, %v437_v22, %v436_v18  ;;  %v3325_v15 = vld [vmem:[#allocation2 + $0xb0] sm:$0xf]  ;;  %v4158_v18 = vld [vmem:[#allocation2 + $0xb4] sm:$0xf0]  ;;  %v3304_v27 = vld [vmem:[#allocation2 + $0xe0] sm:$0xf] }
  0xcf   : > { %v412_v34 = vmax.f32 %v410_v21, %v411_v30  ;;  %v418_v35 = vpack.c.bf16 %v398_v29, %v398_v29  ;;  %v468_v44 = vsel %vm324_vm9, %v438_v36, %v467_v37  ;;  %v445_v47 = vsel %vm444_vm11, %v438_v36, %v443_v38  ;;  %v3342_v19 = vld [vmem:[#allocation2 + $0x130] sm:$0xf]  ;;  %v4166_v21 = vld [vmem:[#allocation2 + $0x134] sm:$0xf0]  ;;  %v4161_v28 = vld [vmem:[#allocation2 + $0xe4] sm:$0xf0] }
  0xd0   : > { %v419_v24 = vpack.c.bf16 %v405_v32, %v405_v32  ;;  %v432_v25 = vperm.slane %v417_v33, 0  ;;  %v532_v48 = vsel %vm320_vm8, %v438_v36, %v531_v39  ;;  %v3313_v7 = vor.u32 %v4163_v5, %v3312_v4  ;;  %v3321_v29 = vld [vmem:[#allocation2 + $0xa0] sm:$0xf]  ;;  %v4157_v30 = vld [vmem:[#allocation2 + $0xa4] sm:$0xf0] }
  0xd1   : > { %v420_v40 = vpack.c.bf16 %v412_v34, %v412_v34  ;;  %v433_v41 = vperm.slane %v418_v35, 0  ;;  %v3330_v11 = vor.u32 %v4159_v8, %v3329_v6  ;;  %v3347_v12 = vor.u32 %v4167_v10, %v3346_v9  ;;  %v3338_v31 = vld [vmem:[#allocation2 + $0x120] sm:$0xf]  ;;  %v4165_v32 = vld [vmem:[#allocation2 + $0x124] sm:$0xf0] }
  0xd2   : > { %v434_v42 = vperm.slane %v419_v24, 0  ;;  %v439_v43 = vunpack.c.l.b16 %v432_v25  ;;  %704 = vmatpush.bf16.msrb.mxu2 %v3313_v7  ;;  %v3309_v16 = vor.u32 %v4162_v14, %v3308_v13  ;;  %v3326_v22 = vor.u32 %v4158_v18, %v3325_v15  ;;  %v3300_v36 = vld [vmem:[#allocation2 + $0xd0] sm:$0xf]  ;;  %v4160_v37 = vld [vmem:[#allocation2 + $0xd4] sm:$0xf0] }
  0xd3   : > { %v440_v45 = vunpack.c.l.b16 %v433_v41  ;;  %v464_v46 = vperm.slane %v420_v40, 0  ;;  %744 = vmatpush.bf16.msrb.mxu3 %v3330_v11  ;;  %800 = vmatpush.bf16.msra.mxu0 %v3347_v12  ;;  %v3343_v26 = vor.u32 %v4166_v21, %v3342_v19  ;;  %v3305_v33 = vor.u32 %v4161_v28, %v3304_v27  ;;  %v3317_v24 = vld [vmem:[#allocation2 + $0x90] sm:$0xf]  ;;  %v4156_v25 = vld [vmem:[#allocation2 + $0x94] sm:$0xf0] }
  0xd4   : > { %v441_v49 = vunpack.c.l.b16 %v434_v42  ;;  %v469_v50 = vsel %vm444_vm11, %v439_v43, %v468_v44  ;;  %v447_v51 = vsel %vm446_vm12, %v439_v43, %v445_v47  ;;  %v533_v52 = vsel %vm324_vm9, %v439_v43, %v532_v48  ;;  %v3334_v38 = vld [vmem:[#allocation2 + $0x110] sm:$0xf]  ;;  %v4164_v39 = vld [vmem:[#allocation2 + $0x114] sm:$0xf0] }
  0xd5   : > { %v465_v53 = vunpack.c.l.b16 %v464_v46  ;;  %v470_v54 = vsel %vm446_vm12, %v440_v45, %v469_v50  ;;  %v449_v55 = vsel %vm448_vm13, %v440_v45, %v447_v51  ;;  %v534_v56 = vsel %vm444_vm11, %v440_v45, %v533_v52  ;;  %v576_v47 = vld [vmem:[#allocation4 + $0x1] ss:$0 sm:$0xff] }
  0xd6   : > { %v471_v57 = vsel %vm448_vm13, %v441_v49, %v470_v54  ;;  %v451_v58 = vsel %vm450_vm14, %v441_v49, %v449_v55  ;;  %v535_v59 = vsel %vm446_vm12, %v441_v49, %v534_v56  ;;  %705 = vmatpush.bf16.msrb.mxu2 %v3309_v16  ;;  %v3322_v34 = vor.u32 %v4157_v30, %v3321_v29  ;;  %v3407_v56 = vld [vmem:[#allocation2 + $0x1c0] sm:$0xf] }
  0xd7   : > { %v472_v60 = vsel %vm450_vm14, %v465_v53, %v471_v57  ;;  %v452_v61 = vpack.c.b16 %v451_v58, %v451_v58  ;;  %v536_v62 = vsel %vm448_vm13, %v465_v53, %v535_v59  ;;  %745 = vmatpush.bf16.msrb.mxu3 %v3326_v22  ;;  %801 = vmatpush.bf16.msra.mxu0 %v3343_v26  ;;  %v4183_v57 = vld [vmem:[#allocation2 + $0x1c4] sm:$0xf0]  ;;  %vm602_vm10 = vcmask 517120   ;;  %v3399_v59 = vld [vmem:[#allocation2 + $0x1b0] sm:$0xf] }
  0xd8   : > { %v473_v0 = vpack.c.b16 %v472_v60, %v472_v60  ;;  %v537_v1 = vpack.c.b16 %v536_v62, %v536_v62  ;;  %v3339_v35 = vor.u32 %v4165_v32, %v3338_v31  ;;  %v3301_v42 = vor.u32 %v4160_v37, %v3300_v36  ;;  %v4181_v60 = vld [vmem:[#allocation2 + $0x1b4] sm:$0xf0] }
  0xd9   : > { %v454_v2 = vsel %vm4537_vm5, 0, %v452_v61  ;;  %v3318_v43 = vor.u32 %v4156_v25, %v3317_v24  ;;  %v3335_v44 = vor.u32 %v4164_v39, %v3334_v38  ;;  %v3408_v58 = vor.u32 %v4183_v57, %v3407_v56 }
  0xda   : > { %3279 = vmatmul.msk.bf16.vlgmr.msra.gmra.mxu3 %vm486_vm3, %v473_v0  ;;  %3288 = vmatmul.msk.bf16.vlgmr.msrb.gmra.mxu0 %vm486_vm3, %v454_v2  ;;  %v542_v3 = vsel %vm4606_vm4, %v537_v1, 0  ;;  %v3400_v6 = vor.u32 %v4181_v60, %v3399_v59  ;;  %vm757_vm11 = vcmask 1041408   ;;  %vm758_vm12 = vsmask.f32 1280 }
  0xdb   : > { %3297 = vmatmul.msk.bf16.vlgmr.msrb.gmra.mxu1 %vm486_vm3, %v542_v3  ;;  %706 = vmatpush.bf16.msrb.mxu2 %v3305_v33  ;;  %vm4639_vm13 = vmand %vm757_vm11, %vm758_vm12  ;;  %vm696_vm14 = vcmask 523264  }
  0xdc   : > { %746 = vmatpush.bf16.msrb.mxu3 %v3322_v34  ;;  %802 = vmatpush.bf16.msra.mxu0 %v3339_v35 }
  0xdd   : > { %1149 = vmatpush.bf16.msra.mxu1 %v3408_v58 }
  0xdf   : > { %707 = vmatpush.bf16.msrb.mxu2 %v3301_v42 }
  0xe0   : > { %747 = vmatpush.bf16.msrb.mxu3 %v3318_v43  ;;  %803 = vmatpush.bf16.msra.mxu0 %v3335_v44 }
  0xe1   : > { %1150 = vmatpush.bf16.msra.mxu1 %v3400_v6  ;;  %v3471_v6 = vld [vmem:[#allocation2 + $0x240] sm:$0xf] }
 0x157   : > { %v527_v40 = vpop.f32.mrf.mxu0 }
 0x158   : > { %v571_v41 = vpop.f32.mrf.mxu1 }
 0x15d   : > { %v499_v45 = vpop.f32.mrf.mxu3 }
 0x15e   : > { %v528_v46 = vadd.f32 %v527_v40, %v499_v45 }
 0x15f   : > { %v529_v48 = vpop.f32.mrf.mxu0 }
 0x160   : > { %v575_v49 = vadd.f32 %v571_v41, %v528_v46  ;;  %v573_v50 = vpop.f32.mrf.mxu1 }
 0x162   : > { %v577_v51 = vadd.f32 %v576_v47, %v575_v49 }
 0x164   : > { %v578_v52 = vmax.f32 %v577_v51, 0.0 }
 0x165   : > { %v501_v53 = vpop.f32.mrf.mxu3 }
 0x166   : > { %v4617_v54 = vpack.c.bf16 %v578_v52, %v578_v52 }
 0x168   : > { %v581_v55 = vrot.slane %v4617_v54, 3 }
 0x16a   : > { %v584_v61 = vsel %vm223_vm0, %v4617_v54, %v581_v55  ;;  %v585_v62 = vsel %vm316_vm7, %v4617_v54, %v581_v55  ;;  %v588_v0 = vsel %vm320_vm8, %v4617_v54, %v581_v55  ;;  %v591_v1 = vsel %vm324_vm9, %v4617_v54, %v581_v55 }
 0x16b   : > { %v587_v2 = vrot.slane %v585_v62, 1  ;;  %v598_v3 = vunpack.c.l.bf16 %v584_v61  ;;  %v590_v4 = vrot.slane %v588_v0, 2  ;;  %v593_v5 = vrot.slane %v591_v1, 3 }
 0x16d   : > { %v599_v7 = vunpack.c.l.bf16 %v587_v2  ;;  %v600_v8 = vunpack.c.l.bf16 %v590_v4  ;;  %v601_v9 = vunpack.c.l.bf16 %v593_v5  ;;  %v603_v10 = vsel %vm602_vm10, %v598_v3, -inf  ;;  %v3391_v4 = vld [vmem:[#allocation2 + $0x1a0] sm:$0xf]  ;;  %v4179_v5 = vld [vmem:[#allocation2 + $0x1a4] sm:$0xf0] }
 0x16e   : > { %v604_v11 = vrot.slane %v603_v10, 4 }
 0x16f   : > { %v610_v12 = vsel %vm602_vm10, %v599_v7, -inf  ;;  %v617_v13 = vsel %vm602_vm10, %v600_v8, -inf  ;;  %v624_v14 = vsel %vm602_vm10, %v601_v9, -inf  ;;  %v3392_v7 = vor.u32 %v4179_v5, %v3391_v4  ;;  %v4199_v8 = vld [vmem:[#allocation2 + $0x244] sm:$0xf0] }
 0x170   : > { %v605_v15 = vmax.f32 %v603_v10, %v604_v11  ;;  %v611_v16 = vrot.slane %v610_v12, 4  ;;  %v618_v18 = vrot.slane %v617_v13, 4  ;;  %v625_v19 = vrot.slane %v624_v14, 4  ;;  %v3383_v10 = vld [vmem:[#allocation2 + $0x190] sm:$0xf] }
 0x171   : > { %v3472_v9 = vor.u32 %v4199_v8, %v3471_v6  ;;  %1151 = vmatpush.bf16.msra.mxu1 %v3392_v7  ;;  %v4177_v11 = vld [vmem:[#allocation2 + $0x194] sm:$0xf0]  ;;  %v4174_v6 = vld [vmem:[#allocation2 + $0x184] sm:$0xf]  ;;  %v3377_v7 = vld [vmem:[#allocation2 + $0x188] sm:$0xf0] }
 0x172   : > { %v606_v21 = vrot.slane %v605_v15, 2  ;;  %v612_v22 = vmax.f32 %v610_v12, %v611_v16  ;;  %v619_v26 = vmax.f32 %v617_v13, %v618_v18  ;;  %v626_v27 = vmax.f32 %v624_v14, %v625_v19  ;;  %v3463_v12 = vld [vmem:[#allocation2 + $0x230] sm:$0xf]  ;;  %v4197_v14 = vld [vmem:[#allocation2 + $0x234] sm:$0xf0] }
 0x173   : > { %1162 = vmatpush.bf16.msra.mxu2 %v3472_v9  ;;  %v3384_v13 = vor.u32 %v4177_v11, %v3383_v10  ;;  %v3409_v16 = vld [vmem:[#allocation2 + $0x1c8] sm:$0xf0]  ;;  %v3464_v18 = vor.u32 %v4197_v14, %v3463_v12  ;;  %v4198_v8 = vld [vmem:[#allocation2 + $0x244] sm:$0xf]  ;;  %v3380_v9 = vor.u32 %v4174_v6, %v3377_v7  ;;  %v3503_v11 = vld [vmem:[#allocation2 + $0x280] sm:$0xf] }
 0x174   : > { %v607_v28 = vmax.f32 %v605_v15, %v606_v21  ;;  %v613_v29 = vrot.slane %v612_v22, 2  ;;  %v620_v30 = vrot.slane %v619_v26, 2  ;;  %v627_v31 = vrot.slane %v626_v27, 2  ;;  %v4182_v15 = vld [vmem:[#allocation2 + $0x1c4] sm:$0xf] }
 0x175   : > { %v3412_v19 = vor.u32 %v4182_v15, %v3409_v16  ;;  %1152 = vmatpush.bf16.msra.mxu1 %v3384_v13  ;;  %v3535_v21 = vld [vmem:[#allocation2 + $0x2c0] sm:$0xf]  ;;  %v3473_v10 = vld [vmem:[#allocation2 + $0x248] sm:$0xf0]  ;;  %v4207_v12 = vld [vmem:[#allocation2 + $0x284] sm:$0xf0] }
 0x176   : > { %v608_v32 = vrot.slane %v607_v28, 1  ;;  %v614_v33 = vmax.f32 %v612_v22, %v613_v29  ;;  %v621_v34 = vmax.f32 %v619_v26, %v620_v30  ;;  %v628_v35 = vmax.f32 %v626_v27, %v627_v31  ;;  %v4215_v22 = vld [vmem:[#allocation2 + $0x2c4] sm:$0xf0]  ;;  %v3375_v27 = vld [vmem:[#allocation2 + $0x180] sm:$0xf] }
 0x177   : > { %1163 = vmatpush.bf16.msra.mxu2 %v3464_v18  ;;  %1188 = vmatpush.bf16.msrb.mxu0 %v3412_v19  ;;  %v3536_v26 = vor.u32 %v4215_v22, %v3535_v21  ;;  %v3455_v30 = vld [vmem:[#allocation2 + $0x220] sm:$0xf]  ;;  %v4195_v31 = vld [vmem:[#allocation2 + $0x224] sm:$0xf0]  ;;  %v3476_v13 = vor.u32 %v4198_v8, %v3473_v10  ;;  %v3504_v14 = vor.u32 %v4207_v12, %v3503_v11  ;;  %v4172_v18 = vld [vmem:[#allocation2 + $0x174] sm:$0xf] }
 0x178   : > { %v609_v36 = vmax.f32 %v607_v28, %v608_v32  ;;  %v615_v37 = vrot.slane %v614_v33, 1  ;;  %v622_v24 = vrot.slane %v621_v34, 1  ;;  %v629_v25 = vrot.slane %v628_v35, 1  ;;  %v4175_v28 = vld [vmem:[#allocation2 + $0x184] sm:$0xf0] }
 0x179   : > { %v3376_v29 = vor.u32 %v4175_v28, %v3375_v27  ;;  %v4180_v32 = vld [vmem:[#allocation2 + $0x1b4] sm:$0xf]  ;;  %1175 = vmatpush.bf16.msra.mxu3 %v3536_v26  ;;  %v3423_v15 = vld [vmem:[#allocation2 + $0x1e0] sm:$0xf]  ;;  %v4187_v16 = vld [vmem:[#allocation2 + $0x1e4] sm:$0xf0] }
 0x17a   : > { %v616_v38 = vmax.f32 %v614_v33, %v615_v37  ;;  %v623_v39 = vmax.f32 %v621_v34, %v622_v24  ;;  %v630_v40 = vmax.f32 %v628_v35, %v629_v25  ;;  %v631_v41 = vpack.c.bf16 %v609_v36, %v609_v36  ;;  %v3401_v34 = vld [vmem:[#allocation2 + $0x1b8] sm:$0xf0]  ;;  %v3527_v36 = vld [vmem:[#allocation2 + $0x2b0] sm:$0xf]  ;;  %v4213_v37 = vld [vmem:[#allocation2 + $0x2b4] sm:$0xf0] }
 0x17b   : > { %v3456_v33 = vor.u32 %v4195_v31, %v3455_v30  ;;  %1153 = vmatpush.bf16.msra.mxu1 %v3376_v29  ;;  %v3404_v35 = vor.u32 %v4180_v32, %v3401_v34  ;;  %v3528_v24 = vor.u32 %v4213_v37, %v3527_v36  ;;  %v3367_v25 = vld [vmem:[#allocation2 + $0x170] sm:$0xf]  ;;  %v3369_v19 = vld [vmem:[#allocation2 + $0x178] sm:$0xf0]  ;;  %v4196_v21 = vld [vmem:[#allocation2 + $0x234] sm:$0xf]  ;;  %v3424_v26 = vor.u32 %v4187_v16, %v3423_v15 }
 0x17c   : > { %v632_v42 = vpack.c.bf16 %v616_v38, %v616_v38  ;;  %v633_v43 = vpack.c.bf16 %v623_v39, %v623_v39  ;;  %v634_v44 = vpack.c.bf16 %v630_v40, %v630_v40  ;;  %v638_v45 = vperm.slane %v631_v41, 0  ;;  %v4173_v38 = vld [vmem:[#allocation2 + $0x174] sm:$0xf0]  ;;  %v3447_v39 = vld [vmem:[#allocation2 + $0x210] sm:$0xf] }
 0x17d   : > { %1164 = vmatpush.bf16.msra.mxu2 %v3456_v33  ;;  %1189 = vmatpush.bf16.msrb.mxu0 %v3404_v35  ;;  %v3368_v40 = vor.u32 %v4173_v38, %v3367_v25  ;;  %v4193_v41 = vld [vmem:[#allocation2 + $0x214] sm:$0xf0]  ;;  %v3465_v22 = vld [vmem:[#allocation2 + $0x238] sm:$0xf0]  ;;  %v3495_v28 = vld [vmem:[#allocation2 + $0x270] sm:$0xf]  ;;  %v3372_v31 = vor.u32 %v4172_v18, %v3369_v19 }
 0x17e   : > { %v639_v46 = vperm.slane %v632_v42, 0  ;;  %v640_v47 = vperm.slane %v633_v43, 0  ;;  %v666_v48 = vperm.slane %v634_v44, 0  ;;  %v641_v49 = vunpack.c.l.b16 %v638_v45  ;;  %v4178_v42 = vld [vmem:[#allocation2 + $0x1a4] sm:$0xf]  ;;  %1176 = vmatpush.bf16.msra.mxu3 %v3528_v24 }
 0x17f   : > { %v3393_v43 = vld [vmem:[#allocation2 + $0x1a8] sm:$0xf0]  ;;  %v3448_v44 = vor.u32 %v4193_v41, %v3447_v39  ;;  %1154 = vmatpush.bf16.msra.mxu1 %v3368_v40  ;;  %v3468_v27 = vor.u32 %v4196_v21, %v3465_v22  ;;  %v4205_v29 = vld [vmem:[#allocation2 + $0x274] sm:$0xf0]  ;;  %v3415_v30 = vld [vmem:[#allocation2 + $0x1d0] sm:$0xf] }
 0x180   : > { %v642_v50 = vunpack.c.l.b16 %v639_v46  ;;  %v643_v51 = vunpack.c.l.b16 %v640_v47  ;;  %v667_v52 = vunpack.c.l.b16 %v666_v48  ;;  %v3396_v45 = vor.u32 %v4178_v42, %v3393_v43  ;;  %v3519_v46 = vld [vmem:[#allocation2 + $0x2a0] sm:$0xf]  ;;  %v4211_v47 = vld [vmem:[#allocation2 + $0x2a4] sm:$0xf0]  ;;  %v4185_v32 = vld [vmem:[#allocation2 + $0x1d4] sm:$0xf0] }
 0x181   : > { %1165 = vmatpush.bf16.msra.mxu2 %v3448_v44  ;;  %v3520_v48 = vor.u32 %v4211_v47, %v3519_v46  ;;  %v4170_v33 = vld [vmem:[#allocation2 + $0x164] sm:$0xf]  ;;  %v3361_v34 = vld [vmem:[#allocation2 + $0x168] sm:$0xf0]  ;;  %v3496_v35 = vor.u32 %v4205_v29, %v3495_v28  ;;  %v3487_v38 = vld [vmem:[#allocation2 + $0x260] sm:$0xf]  ;;  %v3416_v40 = vor.u32 %v4185_v32, %v3415_v30 }
 0x182   : > { %v668_v53 = vsel %vm316_vm7, %v642_v50, %v641_v49  ;;  %v644_v55 = vsel %vm320_vm8, %v642_v50, %v641_v49  ;;  %v753_v56 = vsel %vm316_vm7, %v643_v51, %v642_v50  ;;  %v3359_v49 = vld [vmem:[#allocation2 + $0x160] sm:$0xf]  ;;  %v4171_v50 = vld [vmem:[#allocation2 + $0x164] sm:$0xf0]  ;;  %1190 = vmatpush.bf16.msrb.mxu0 %v3396_v45  ;;  %v4194_v36 = vld [vmem:[#allocation2 + $0x224] sm:$0xf]  ;;  %v3364_v42 = vor.u32 %v4170_v33, %v3361_v34 }
 0x183   : > { %v669_v57 = vsel %vm320_vm8, %v643_v51, %v668_v53  ;;  %v645_v58 = vsel %vm324_vm9, %v643_v51, %v644_v55  ;;  %v754_v59 = vsel %vm320_vm8, %v667_v52, %v753_v56  ;;  %v3439_v51 = vld [vmem:[#allocation2 + $0x200] sm:$0xf]  ;;  %v4191_v53 = vld [vmem:[#allocation2 + $0x204] sm:$0xf0]  ;;  %v4176_v55 = vld [vmem:[#allocation2 + $0x194] sm:$0xf]  ;;  %1177 = vmatpush.bf16.msra.mxu3 %v3520_v48 }
 0x184   : > { %v670_v61 = vsel %vm324_vm9, %v667_v52, %v669_v57  ;;  %v646_v62 = vpack.c.b16 %v645_v58, %v645_v58  ;;  %v755_v0 = vpack.c.b16 %v754_v59, %v754_v59  ;;  %v3360_v52 = vor.u32 %v4171_v50, %v3359_v49  ;;  %v3385_v56 = vld [vmem:[#allocation2 + $0x198] sm:$0xf0]  ;;  %v3511_v59 = vld [vmem:[#allocation2 + $0x290] sm:$0xf]  ;;  %v3457_v37 = vld [vmem:[#allocation2 + $0x228] sm:$0xf0] }
 0x185   : > { %v671_v1 = vpack.c.b16 %v670_v61, %v670_v61  ;;  %v3440_v57 = vor.u32 %v4191_v53, %v3439_v51  ;;  %v3388_v58 = vor.u32 %v4176_v55, %v3385_v56  ;;  %v4209_v61 = vld [vmem:[#allocation2 + $0x294] sm:$0xf0]  ;;  %v4214_v24 = vld [vmem:[#allocation2 + $0x2c4] sm:$0xf]  ;;  %v3537_v25 = vld [vmem:[#allocation2 + $0x2c8] sm:$0xf0]  ;;  %v3460_v41 = vor.u32 %v4194_v36, %v3457_v37 }
 0x186   : > { %v648_v2 = vsel %vm4537_vm5, 0, %v646_v62  ;;  %v760_v3 = vsel %vm4639_vm13, %v755_v0, 0  ;;  %v3351_v62 = vld [vmem:[#allocation2 + $0x150] sm:$0xf]  ;;  %1155 = vmatpush.bf16.msra.mxu1 %v3360_v52  ;;  %v3512_v0 = vor.u32 %v4209_v61, %v3511_v59  ;;  %v4203_v39 = vld [vmem:[#allocation2 + $0x264] sm:$0xf0]  ;;  %v3540_v43 = vor.u32 %v4214_v24, %v3537_v25 }
 0x187   : > { %3314 = vmatmul.msk.bf16.vlgmr.msrb.gmra.mxu2 %vm696_vm14, %v671_v1  ;;  %3331 = vmatmul.msk.bf16.vlgmr.msrb.gmra.mxu3 %vm696_vm14, %v648_v2  ;;  %v4169_v1 = vld [vmem:[#allocation2 + $0x154] sm:$0xf0]  ;;  %v3431_v2 = vld [vmem:[#allocation2 + $0x1f0] sm:$0xf]  ;;  %v4168_v44 = vld [vmem:[#allocation2 + $0x154] sm:$0xf]  ;;  %v3488_v47 = vor.u32 %v4203_v39, %v3487_v38 }
 0x188   : > { %3348 = vmatmul.msk.bf16.vlgmr.msra.gmra.mxu0 %vm696_vm14, %v760_v3  ;;  %v4189_v3 = vld [vmem:[#allocation2 + $0x1f4] sm:$0xf0]  ;;  %1166 = vmatpush.bf16.msra.mxu2 %v3440_v57  ;;  %v3352_v4 = vor.u32 %v4169_v1, %v3351_v62  ;;  %v4192_v45 = vld [vmem:[#allocation2 + $0x214] sm:$0xf]  ;;  %v3449_v46 = vld [vmem:[#allocation2 + $0x218] sm:$0xf0] }
 0x189   : > { %v3432_v5 = vor.u32 %v4189_v3, %v3431_v2  ;;  %1191 = vmatpush.bf16.msrb.mxu0 %v3388_v58  ;;  %1178 = vmatpush.bf16.msra.mxu3 %v3512_v0  ;;  %v3353_v48 = vld [vmem:[#allocation2 + $0x158] sm:$0xf0]  ;;  %v4212_v49 = vld [vmem:[#allocation2 + $0x2b4] sm:$0xf]  ;;  %v3479_v51 = vld [vmem:[#allocation2 + $0x250] sm:$0xf]  ;;  %v3452_v55 = vor.u32 %v4192_v45, %v3449_v46 }
 0x18a   : > { %1156 = vmatpush.bf16.msra.mxu1 %v3352_v4  ;;  %v3529_v50 = vld [vmem:[#allocation2 + $0x2b8] sm:$0xf0]  ;;  %v4201_v52 = vld [vmem:[#allocation2 + $0x254] sm:$0xf0]  ;;  %v3356_v56 = vor.u32 %v4168_v44, %v3353_v48  ;;  %v4190_v62 = vld [vmem:[#allocation2 + $0x204] sm:$0xf] }
 0x18b   : > { %v3532_v57 = vor.u32 %v4212_v49, %v3529_v50  ;;  %v3480_v58 = vor.u32 %v4201_v52, %v3479_v51  ;;  %v3441_v0 = vld [vmem:[#allocation2 + $0x208] sm:$0xf0]  ;;  %v4210_v1 = vld [vmem:[#allocation2 + $0x2a4] sm:$0xf]  ;;  %v3433_v10 = vld [vmem:[#allocation2 + $0x1f8] sm:$0xf0] }
 0x18c   : > { %1167 = vmatpush.bf16.msra.mxu2 %v3432_v5  ;;  %v3444_v3 = vor.u32 %v4190_v62, %v3441_v0  ;;  %v3521_v4 = vld [vmem:[#allocation2 + $0x2a8] sm:$0xf0]  ;;  %v810_v5 = vld [vmem:[#allocation4 + $0x2] ss:$0 sm:$0xff]  ;;  %v4208_v11 = vld [vmem:[#allocation2 + $0x294] sm:$0xf] }
 0x18d   : > { %1192 = vmatpush.bf16.msrb.mxu0 %v3380_v9  ;;  %1179 = vmatpush.bf16.msra.mxu3 %v3504_v14  ;;  %v3524_v6 = vor.u32 %v4210_v1, %v3521_v4  ;;  %v4188_v9 = vld [vmem:[#allocation2 + $0x1f4] sm:$0xf]  ;;  %v4186_v21 = vld [vmem:[#allocation2 + $0x1e4] sm:$0xf]  ;;  %v3425_v22 = vld [vmem:[#allocation2 + $0x1e8] sm:$0xf0] }
 0x18e   : > { %1201 = vmatpush.bf16.msrb.mxu1 %v3476_v13  ;;  %v3436_v12 = vor.u32 %v4188_v9, %v3433_v10  ;;  %v3513_v13 = vld [vmem:[#allocation2 + $0x298] sm:$0xf0]  ;;  %v3428_v28 = vor.u32 %v4186_v21, %v3425_v22  ;;  %v3505_v29 = vld [vmem:[#allocation2 + $0x288] sm:$0xf0]  ;;  %v4184_v30 = vld [vmem:[#allocation2 + $0x1d4] sm:$0xf] }
 0x18f   : > { %v3516_v15 = vor.u32 %v4208_v11, %v3513_v13  ;;  %v4204_v33 = vld [vmem:[#allocation2 + $0x274] sm:$0xf]  ;;  %v3497_v34 = vld [vmem:[#allocation2 + $0x278] sm:$0xf0]  ;;  %v3571_v13 = vld [vmem:[#allocation2 + $0x340] sm:$0xf] }
 0x190   : > { %1168 = vmatpush.bf16.msra.mxu2 %v3424_v26  ;;  %v4206_v26 = vld [vmem:[#allocation2 + $0x284] sm:$0xf]  ;;  %v3500_v37 = vor.u32 %v4204_v33, %v3497_v34  ;;  %v4200_v46 = vld [vmem:[#allocation2 + $0x254] sm:$0xf]  ;;  %v4238_v21 = vld [vmem:[#allocation2 + $0x434] sm:$0xf0] }
 0x191   : > { %1193 = vmatpush.bf16.msrb.mxu0 %v3372_v31  ;;  %1180 = vmatpush.bf16.msra.mxu3 %v3496_v35  ;;  %v3417_v31 = vld [vmem:[#allocation2 + $0x1d8] sm:$0xf0]  ;;  %v3508_v32 = vor.u32 %v4206_v26, %v3505_v29  ;;  %v4222_v29 = vld [vmem:[#allocation2 + $0x334] sm:$0xf0]  ;;  %v3627_v33 = vld [vmem:[#allocation2 + $0x420] sm:$0xf] }
 0x192   : > { %1202 = vmatpush.bf16.msrb.mxu1 %v3468_v27  ;;  %v3420_v36 = vor.u32 %v4184_v30, %v3417_v31  ;;  %v3599_v31 = vld [vmem:[#allocation2 + $0x3b0] sm:$0xf] }
 0x194   : > { %1169 = vmatpush.bf16.msra.mxu2 %v3416_v40 }
 0x195   : > { %1194 = vmatpush.bf16.msrb.mxu0 %v3364_v42  ;;  %1181 = vmatpush.bf16.msra.mxu3 %v3488_v47  ;;  %v4202_v42 = vld [vmem:[#allocation2 + $0x264] sm:$0xf]  ;;  %v3481_v47 = vld [vmem:[#allocation2 + $0x258] sm:$0xf0] }
 0x196   : > { %1203 = vmatpush.bf16.msrb.mxu1 %v3460_v41  ;;  %v3484_v51 = vor.u32 %v4200_v46, %v3481_v47  ;;  %v3559_v46 = vld [vmem:[#allocation2 + $0x310] sm:$0xf] }
 0x198   : > { %1214 = vmatpush.bf16.msrb.mxu2 %v3540_v43  ;;  %v3489_v43 = vld [vmem:[#allocation2 + $0x268] sm:$0xf0] }
 0x199   : > { %1195 = vmatpush.bf16.msrb.mxu0 %v3356_v56  ;;  %1182 = vmatpush.bf16.msra.mxu3 %v3480_v58  ;;  %v3492_v45 = vor.u32 %v4202_v42, %v3489_v43 }
 0x19a   : > { %1204 = vmatpush.bf16.msrb.mxu1 %v3452_v55 }
 0x19c   : > { %1215 = vmatpush.bf16.msrb.mxu2 %v3532_v57 }
 0x19e   : > { %1205 = vmatpush.bf16.msrb.mxu1 %v3444_v3 }
 0x1a0   : > { %1216 = vmatpush.bf16.msrb.mxu2 %v3524_v6 }
 0x1a2   : > { %1206 = vmatpush.bf16.msrb.mxu1 %v3436_v12 }
 0x1a4   : > { %1217 = vmatpush.bf16.msrb.mxu2 %v3516_v15  ;;  %v3603_v15 = vld [vmem:[#allocation2 + $0x3c0] sm:$0xf] }
 0x1a6   : > { %1207 = vmatpush.bf16.msrb.mxu1 %v3428_v28  ;;  %v3567_v28 = vld [vmem:[#allocation2 + $0x330] sm:$0xf] }
 0x1a7   : > { %v3568_v30 = vor.u32 %v4222_v29, %v3567_v28  ;;  %v3547_v28 = vld [vmem:[#allocation2 + $0x2e0] sm:$0xf]  ;;  %v4217_v29 = vld [vmem:[#allocation2 + $0x2e4] sm:$0xf0] }
 0x1a8   : > { %1218 = vmatpush.bf16.msrb.mxu2 %v3508_v32  ;;  %v4230_v32 = vld [vmem:[#allocation2 + $0x3b4] sm:$0xf0] }
 0x1a9   : > { %v3600_v34 = vor.u32 %v4230_v32, %v3599_v31  ;;  %v3548_v31 = vor.u32 %v4217_v29, %v3547_v28  ;;  %v4225_v32 = vld [vmem:[#allocation2 + $0x364] sm:$0xf0]  ;;  %v4268_v28 = vld [vmem:[#allocation2 + $0xb54] sm:$0xf0] }
 0x1aa   : > { %1208 = vmatpush.bf16.msrb.mxu1 %v3420_v36 }
 0x1ac   : > { %1219 = vmatpush.bf16.msrb.mxu2 %v3500_v37  ;;  %v3563_v37 = vld [vmem:[#allocation2 + $0x320] sm:$0xf] }
 0x1b0   : > { %1220 = vmatpush.bf16.msrb.mxu2 %v3492_v45  ;;  %v4247_v45 = vld [vmem:[#allocation2 + $0x4c4] sm:$0xf0] }
 0x1b4   : > { %1221 = vmatpush.bf16.msrb.mxu2 %v3484_v51 }
 0x205   : > { %v805_v53 = vpop.f32.mrf.mxu0 }
 0x20a   : > { %v709_v59 = vpop.f32.mrf.mxu2  ;;  %v749_v61 = vpop.f32.mrf.mxu3 }
 0x20b   : > { %v750_v2 = vadd.f32 %v749_v61, %v709_v59  ;;  %v3635_v59 = vld [vmem:[#allocation2 + $0x440] sm:$0xf]  ;;  %v4239_v61 = vld [vmem:[#allocation2 + $0x444] sm:$0xf0] }
 0x20c   : > { %v3636_v3 = vor.u32 %v4239_v61, %v3635_v59  ;;  %v3555_v61 = vld [vmem:[#allocation2 + $0x300] sm:$0xf] }
 0x20d   : > { %v809_v7 = vadd.f32 %v805_v53, %v750_v2  ;;  %v807_v8 = vpop.f32.mrf.mxu0 }
 0x20f   : > { %v811_v14 = vadd.f32 %v810_v5, %v809_v7 }
 0x211   : > { %v812_v16 = vmax.f32 %v811_v14, 0.0  ;;  %v4223_v14 = vld [vmem:[#allocation2 + $0x344] sm:$0xf0] }
 0x212   : > { %v711_v18 = vpop.f32.mrf.mxu2  ;;  %v751_v19 = vpop.f32.mrf.mxu3 }
 0x213   : > { %v4651_v27 = vpack.c.bf16 %v812_v16, %v812_v16  ;;  %v3572_v16 = vor.u32 %v4223_v14, %v3571_v13  ;;  %v4231_v18 = vld [vmem:[#allocation2 + $0x3c4] sm:$0xf0]  ;;  %v3631_v19 = vld [vmem:[#allocation2 + $0x430] sm:$0xf]  ;;  %v4226_v14 = vld [vmem:[#allocation2 + $0x374] sm:$0xf0] }
 0x214   : > { %v3604_v22 = vor.u32 %v4231_v18, %v3603_v15  ;;  %v3632_v26 = vor.u32 %v4238_v21, %v3631_v19  ;;  %v3611_v15 = vld [vmem:[#allocation2 + $0x3e0] sm:$0xf]  ;;  %v3655_v21 = vld [vmem:[#allocation2 + $0x490] sm:$0xf] }
 0x215   : > { %v815_v35 = vrot.slane %v4651_v27, 3  ;;  %1640 = vmatpush.bf16.msrb.mxu3 %v3572_v16  ;;  %v4233_v16 = vld [vmem:[#allocation2 + $0x3e4] sm:$0xf0] }
 0x216   : > { %1653 = vmatpush.bf16.msra.mxu0 %v3604_v22  ;;  %v3612_v19 = vor.u32 %v4233_v16, %v3611_v15  ;;  %v4244_v22 = vld [vmem:[#allocation2 + $0x494] sm:$0xf0]  ;;  %v4261_v16 = vld [vmem:[#allocation2 + $0x5a4] sm:$0xf0] }
 0x217   : > { %v819_v24 = vsel %vm316_vm7, %v4651_v27, %v815_v35  ;;  %v818_v25 = vsel %vm223_vm0, %v4651_v27, %v815_v35  ;;  %v4237_v35 = vld [vmem:[#allocation2 + $0x424] sm:$0xf0] }
 0x218   : > { %v824_v38 = vunpack.c.l.bf16 %v818_v25  ;;  %v821_v39 = vrot.slane %v819_v24, 1  ;;  %v3628_v36 = vor.u32 %v4237_v35, %v3627_v33  ;;  %v4221_v24 = vld [vmem:[#allocation2 + $0x324] sm:$0xf0]  ;;  %v3595_v25 = vld [vmem:[#allocation2 + $0x3a0] sm:$0xf] }
 0x219   : > { %1641 = vmatpush.bf16.msrb.mxu3 %v3568_v30  ;;  %v3579_v30 = vld [vmem:[#allocation2 + $0x360] sm:$0xf]  ;;  %v3607_v33 = vld [vmem:[#allocation2 + $0x3d0] sm:$0xf] }
 0x21a   : > { %v827_v40 = vsel %vm757_vm11, %v824_v38, -inf  ;;  %v825_v41 = vunpack.c.l.bf16 %v821_v39  ;;  %1654 = vmatpush.bf16.msra.mxu0 %v3600_v34  ;;  %v3564_v38 = vor.u32 %v4221_v24, %v3563_v37  ;;  %v4229_v39 = vld [vmem:[#allocation2 + $0x3a4] sm:$0xf0]  ;;  %v4232_v34 = vld [vmem:[#allocation2 + $0x3d4] sm:$0xf0]  ;;  %v3580_v35 = vor.u32 %v4225_v32, %v3579_v30 }
 0x21b   : > { %v828_v44 = vrot.slane %v827_v40, 4  ;;  %v3596_v42 = vor.u32 %v4229_v39, %v3595_v25  ;;  %v3651_v37 = vld [vmem:[#allocation2 + $0x480] sm:$0xf]  ;;  %v4243_v24 = vld [vmem:[#allocation2 + $0x484] sm:$0xf0] }
 0x21c   : > { %v834_v48 = vsel %vm757_vm11, %v825_v41, -inf  ;;  %v4236_v41 = vld [vmem:[#allocation2 + $0x414] sm:$0xf0]  ;;  %v3763_v25 = vld [vmem:[#allocation2 + $0xb80] sm:$0xf] }
 0x21d   : > { %v829_v49 = vmax.f32 %v827_v40, %v828_v44  ;;  %v835_v50 = vrot.slane %v834_v48, 4  ;;  %v3623_v40 = vld [vmem:[#allocation2 + $0x410] sm:$0xf]  ;;  %v3667_v44 = vld [vmem:[#allocation2 + $0x4c0] sm:$0xf]  ;;  %1642 = vmatpush.bf16.msrb.mxu3 %v3564_v38  ;;  %v3652_v38 = vor.u32 %v4243_v24, %v3651_v37 }
 0x21e   : > { %v3624_v43 = vor.u32 %v4236_v41, %v3623_v40  ;;  %v3668_v47 = vor.u32 %v4247_v45, %v3667_v44  ;;  %1655 = vmatpush.bf16.msra.mxu0 %v3596_v42  ;;  %v4271_v39 = vld [vmem:[#allocation2 + $0xb84] sm:$0xf0]  ;;  %v3543_v40 = vld [vmem:[#allocation2 + $0x2d0] sm:$0xf]  ;;  %v4216_v41 = vld [vmem:[#allocation2 + $0x2d4] sm:$0xf0] }
 0x21f   : > { %v830_v52 = vrot.slane %v829_v49, 2  ;;  %v836_v53 = vmax.f32 %v834_v48, %v835_v50  ;;  %v4220_v48 = vld [vmem:[#allocation2 + $0x314] sm:$0xf0]  ;;  %v3764_v42 = vor.u32 %v4271_v39, %v3763_v25  ;;  %v3575_v44 = vld [vmem:[#allocation2 + $0x350] sm:$0xf] }
 0x220   : > { %v4228_v50 = vld [vmem:[#allocation2 + $0x394] sm:$0xf0]  ;;  %v3560_v51 = vor.u32 %v4220_v48, %v3559_v46  ;;  %v3699_v46 = vld [vmem:[#allocation2 + $0x540] sm:$0xf]  ;;  %v4255_v48 = vld [vmem:[#allocation2 + $0x544] sm:$0xf0] }
 0x221   : > { %v831_v55 = vmax.f32 %v829_v49, %v830_v52  ;;  %v837_v56 = vrot.slane %v836_v53, 2  ;;  %v3591_v49 = vld [vmem:[#allocation2 + $0x390] sm:$0xf]  ;;  %v4224_v45 = vld [vmem:[#allocation2 + $0x354] sm:$0xf0] }
 0x222   : > { %v3592_v52 = vor.u32 %v4228_v50, %v3591_v49  ;;  %1643 = vmatpush.bf16.msrb.mxu3 %v3560_v51  ;;  %v3731_v49 = vld [vmem:[#allocation2 + $0x5c0] sm:$0xf]  ;;  %v4263_v50 = vld [vmem:[#allocation2 + $0x5c4] sm:$0xf0]  ;;  %v3700_v51 = vor.u32 %v4255_v48, %v3699_v46  ;;  %v3687_v32 = vld [vmem:[#allocation2 + $0x510] sm:$0xf] }
 0x223   : > { %v832_v57 = vrot.slane %v831_v55, 1  ;;  %v838_v58 = vmax.f32 %v836_v53, %v837_v56  ;;  %v3619_v53 = vld [vmem:[#allocation2 + $0x400] sm:$0xf]  ;;  %v4260_v37 = vld [vmem:[#allocation2 + $0x594] sm:$0xf0] }
 0x224   : > { %1656 = vmatpush.bf16.msra.mxu0 %v3592_v52  ;;  %v3732_v52 = vor.u32 %v4263_v50, %v3731_v49  ;;  %v3747_v24 = vld [vmem:[#allocation2 + $0xb40] sm:$0xf]  ;;  %v4267_v25 = vld [vmem:[#allocation2 + $0xb44] sm:$0xf0]  ;;  %v4266_v46 = vld [vmem:[#allocation2 + $0xb34] sm:$0xf0] }
 0x225   : > { %v833_v62 = vmax.f32 %v831_v55, %v832_v57  ;;  %v839_v0 = vrot.slane %v838_v58, 1  ;;  %v4235_v55 = vld [vmem:[#allocation2 + $0x404] sm:$0xf0]  ;;  %v3663_v57 = vld [vmem:[#allocation2 + $0x4b0] sm:$0xf]  ;;  %v3748_v39 = vor.u32 %v4267_v25, %v3747_v24 }
 0x226   : > { %v3620_v56 = vor.u32 %v4235_v55, %v3619_v53  ;;  %v3647_v53 = vld [vmem:[#allocation2 + $0x470] sm:$0xf]  ;;  %v4242_v55 = vld [vmem:[#allocation2 + $0x474] sm:$0xf0] }
 0x227   : > { %v841_v1 = vpack.c.bf16 %v833_v62, %v833_v62  ;;  %v840_v2 = vmax.f32 %v838_v58, %v839_v0  ;;  %v4246_v58 = vld [vmem:[#allocation2 + $0x4b4] sm:$0xf0]  ;;  %v4219_v62 = vld [vmem:[#allocation2 + $0x304] sm:$0xf0]  ;;  %v3587_v0 = vld [vmem:[#allocation2 + $0x380] sm:$0xf] }
 0x228   : > { %v3664_v59 = vor.u32 %v4246_v58, %v3663_v57  ;;  %v3648_v57 = vor.u32 %v4242_v55, %v3647_v53  ;;  %v4270_v58 = vld [vmem:[#allocation2 + $0xb74] sm:$0xf0]  ;;  %v3711_v53 = vld [vmem:[#allocation2 + $0x570] sm:$0xf] }
 0x229   : > { %v843_v4 = vsel %vm4537_vm5, 0, %v841_v1  ;;  %v847_v5 = vperm.slane %v841_v1, 0  ;;  %v842_v6 = vpack.c.bf16 %v840_v2, %v840_v2  ;;  %v3556_v1 = vor.u32 %v4219_v62, %v3555_v61  ;;  %v4227_v2 = vld [vmem:[#allocation2 + $0x384] sm:$0xf0] }
 0x22a   : > { %1157 = vmatmul.bf16.vlgmr.msra.gmra.mxu1 %v843_v4  ;;  %1196 = vmatmul.bf16.vlgmr.msrb.gmra.mxu0 %v843_v4  ;;  %v4234_v4 = vld [vmem:[#allocation2 + $0x3f4] sm:$0xf0] }
 0x22b   : > { %v844_v7 = vsel %vm4537_vm5, %v842_v6, 0  ;;  %v848_v8 = vperm.slane %v842_v6, 0  ;;  %1666 = vmatpush.bf16.msra.mxu1 %v3636_v3  ;;  %v849_v9 = vunpack.c.l.b16 %v847_v5  ;;  %v3615_v3 = vld [vmem:[#allocation2 + $0x3f0] sm:$0xf]  ;;  %v3588_v5 = vor.u32 %v4227_v2, %v3587_v0  ;;  %1644 = vmatpush.bf16.msrb.mxu3 %v3556_v1  ;;  %v4254_v1 = vld [vmem:[#allocation2 + $0x534] sm:$0xf0] }
 0x22c   : > { %1183 = vmatmul.bf16.vlgmr.msra.gmra.mxu3 %v844_v7  ;;  %v3616_v6 = vor.u32 %v4234_v4, %v3615_v3  ;;  %v3695_v0 = vld [vmem:[#allocation2 + $0x530] sm:$0xf]  ;;  %v4262_v4 = vld [vmem:[#allocation2 + $0x5b4] sm:$0xf0] }
 0x22d   : > { %v850_v10 = vunpack.c.l.b16 %v848_v8  ;;  %v4245_v8 = vld [vmem:[#allocation2 + $0x4a4] sm:$0xf0]  ;;  %1657 = vmatpush.bf16.msra.mxu0 %v3588_v5  ;;  %v3727_v2 = vld [vmem:[#allocation2 + $0x5b0] sm:$0xf]  ;;  %v3696_v3 = vor.u32 %v4254_v1, %v3695_v0  ;;  %v3643_v5 = vld [vmem:[#allocation2 + $0x460] sm:$0xf] }
 0x22f   : > { %v851_v11 = vsel %vm316_vm7, %v850_v10, %v849_v9  ;;  %1667 = vmatpush.bf16.msra.mxu1 %v3632_v26  ;;  %v3551_v10 = vld [vmem:[#allocation2 + $0x2f0] sm:$0xf]  ;;  %v3656_v26 = vor.u32 %v4244_v22, %v3655_v21 }
 0x230   : > { %v852_v12 = vpack.c.b16 %v851_v11, %v851_v11  ;;  %v4218_v11 = vld [vmem:[#allocation2 + $0x2f4] sm:$0xf0] }
 0x231   : > { %v3552_v13 = vor.u32 %v4218_v11, %v3551_v10  ;;  %v4269_v10 = vld [vmem:[#allocation2 + $0xb64] sm:$0xf0] }
 0x232   : > { %1170 = vmatmul.bf16.vlgmr.msra.gmra.mxu2 %v852_v12 }
 0x233   : > { %1668 = vmatpush.bf16.msra.mxu1 %v3628_v36  ;;  %1679 = vmatpush.bf16.msra.mxu2 %v3668_v47  ;;  %v3608_v36 = vor.u32 %v4232_v34, %v3607_v33  ;;  %v3576_v47 = vor.u32 %v4224_v45, %v3575_v44  ;;  %v4252_v33 = vld [vmem:[#allocation2 + $0x514] sm:$0xf0]  ;;  %v3719_v34 = vld [vmem:[#allocation2 + $0x590] sm:$0xf]  ;;  %v4259_v44 = vld [vmem:[#allocation2 + $0x584] sm:$0xf0] }
 0x234   : > { %1645 = vmatpush.bf16.msrb.mxu3 %v3552_v13  ;;  %v4253_v13 = vld [vmem:[#allocation2 + $0x524] sm:$0xf0]  ;;  %v3743_v45 = vld [vmem:[#allocation2 + $0xb30] sm:$0xf] }
 0x235   : > { %v3744_v50 = vor.u32 %v4266_v46, %v3743_v45 }
 0x237   : > { %1669 = vmatpush.bf16.msra.mxu1 %v3624_v43  ;;  %1680 = vmatpush.bf16.msra.mxu2 %v3664_v59  ;;  %v3544_v43 = vor.u32 %v4216_v41, %v3543_v40  ;;  %v3683_v40 = vld [vmem:[#allocation2 + $0x500] sm:$0xf]  ;;  %v4251_v41 = vld [vmem:[#allocation2 + $0x504] sm:$0xf0] }
 0x238   : > { %1646 = vmatpush.bf16.msrb.mxu3 %v3548_v31 }
 0x23a   : > { %1209 = vmatmul.bf16.vlgmr.msrb.gmra.mxu1 %v852_v12  ;;  %v3583_v12 = vld [vmem:[#allocation2 + $0x370] sm:$0xf] }
 0x23b   : > { %1670 = vmatpush.bf16.msra.mxu1 %v3620_v56  ;;  %v3584_v18 = vor.u32 %v4226_v14, %v3583_v12  ;;  %v3759_v56 = vld [vmem:[#allocation2 + $0xb70] sm:$0xf]  ;;  %v3691_v12 = vld [vmem:[#allocation2 + $0x520] sm:$0xf] }
 0x23c   : > { %1647 = vmatpush.bf16.msrb.mxu3 %v3544_v43  ;;  %v3760_v59 = vor.u32 %v4270_v58, %v3759_v56  ;;  %v3723_v14 = vld [vmem:[#allocation2 + $0x5a0] sm:$0xf]  ;;  %v3692_v15 = vor.u32 %v4253_v13, %v3691_v12  ;;  %v3684_v43 = vor.u32 %v4251_v41, %v3683_v40  ;;  %v4258_v56 = vld [vmem:[#allocation2 + $0x574] sm:$0xf0]  ;;  %v4265_v58 = vld [vmem:[#allocation2 + $0xb24] sm:$0xf0] }
 0x23d   : > { %1658 = vmatpush.bf16.msra.mxu0 %v3584_v18  ;;  %v3639_v18 = vld [vmem:[#allocation2 + $0x450] sm:$0xf]  ;;  %v3724_v21 = vor.u32 %v4261_v16, %v3723_v14  ;;  %v3712_v1 = vor.u32 %v4258_v56, %v3711_v53  ;;  %v4248_v13 = vld [vmem:[#allocation2 + $0x4d4] sm:$0xf0]  ;;  %v3884_v53 = vld [vmem:[#allocation2 + $0x7a0] sm:$0xf] }
 0x23e   : > { %v3671_v12 = vld [vmem:[#allocation2 + $0x4d0] sm:$0xf]  ;;  %v4256_v16 = vld [vmem:[#allocation2 + $0x554] sm:$0xf0] }
 0x23f   : > { %1671 = vmatpush.bf16.msra.mxu1 %v3616_v6  ;;  %v4241_v6 = vld [vmem:[#allocation2 + $0x464] sm:$0xf0] }
 0x240   : > { %1692 = vmatpush.bf16.msra.mxu3 %v3700_v51  ;;  %v3679_v51 = vld [vmem:[#allocation2 + $0x4f0] sm:$0xf] }
 0x241   : > { %1659 = vmatpush.bf16.msra.mxu0 %v3580_v35 }
 0x242   : > { %1222 = vmatmul.bf16.vlgmr.msrb.gmra.mxu2 %v844_v7  ;;  %v3659_v7 = vld [vmem:[#allocation2 + $0x4a0] sm:$0xf] }
 0x243   : > { %v3660_v9 = vor.u32 %v4245_v8, %v3659_v7  ;;  %1672 = vmatpush.bf16.msra.mxu1 %v3612_v19  ;;  %v3728_v7 = vor.u32 %v4262_v4, %v3727_v2  ;;  %v3644_v8 = vor.u32 %v4241_v6, %v3643_v5  ;;  %v4240_v19 = vld [vmem:[#allocation2 + $0x454] sm:$0xf0]  ;;  %v3675_v2 = vld [vmem:[#allocation2 + $0x4e0] sm:$0xf]  ;;  %v4257_v6 = vld [vmem:[#allocation2 + $0x564] sm:$0xf0] }
 0x244   : > { %1693 = vmatpush.bf16.msra.mxu3 %v3696_v3  ;;  %v3640_v22 = vor.u32 %v4240_v19, %v3639_v18  ;;  %v4249_v3 = vld [vmem:[#allocation2 + $0x4e4] sm:$0xf0]  ;;  %v3707_v5 = vld [vmem:[#allocation2 + $0x560] sm:$0xf] }
 0x245   : > { %1681 = vmatpush.bf16.msra.mxu2 %v3660_v9  ;;  %1660 = vmatpush.bf16.msra.mxu0 %v3576_v47  ;;  %v3755_v9 = vld [vmem:[#allocation2 + $0xb60] sm:$0xf]  ;;  %v903_v47 = vld [vmem:[#allocation4 + $0x3] ss:$8 sm:$0x3] }
 0x246   : > { %v3756_v11 = vor.u32 %v4269_v10, %v3755_v9  ;;  %v905_v9 = vperm.slane %v903_v47, 0  ;;  %v3676_v10 = vor.u32 %v4249_v3, %v3675_v2  ;;  %v3796_v2 = vld [vmem:[#allocation2 + $0x640] sm:$0xf]  ;;  %v4279_v3 = vld [vmem:[#allocation2 + $0x644] sm:$0xf0] }
 0x247   : > { %1673 = vmatpush.bf16.msra.mxu1 %v3608_v36  ;;  %v3688_v36 = vor.u32 %v4252_v33, %v3687_v32 }
 0x248   : > { %1694 = vmatpush.bf16.msra.mxu3 %v3692_v15  ;;  %v3703_v15 = vld [vmem:[#allocation2 + $0x550] sm:$0xf] }
 0x249   : > { %1682 = vmatpush.bf16.msra.mxu2 %v3656_v26  ;;  %1705 = vmatpush.bf16.msrb.mxu0 %v3732_v52  ;;  %v3751_v26 = vld [vmem:[#allocation2 + $0xb50] sm:$0xf]  ;;  %v4250_v52 = vld [vmem:[#allocation2 + $0x4f4] sm:$0xf0] }
 0x24a   : > { %v3752_v29 = vor.u32 %v4268_v28, %v3751_v26  ;;  %v3680_v55 = vor.u32 %v4250_v52, %v3679_v51  ;;  %v3704_v28 = vor.u32 %v4256_v16, %v3703_v15  ;;  %v4302_v51 = vld [vmem:[#allocation2 + $0x7b4] sm:$0xf0]  ;;  %v4277_v15 = vld [vmem:[#allocation2 + $0x624] sm:$0xf0] }
 0x24b   : > { %1785 = vmatpush.bf16.msrb.mxu1 %v3764_v42  ;;  %v3715_v42 = vld [vmem:[#allocation2 + $0x580] sm:$0xf] }
 0x24c   : > { %1695 = vmatpush.bf16.msra.mxu3 %v3688_v36  ;;  %v3716_v49 = vor.u32 %v4259_v44, %v3715_v42 }
 0x24d   : > { %1683 = vmatpush.bf16.msra.mxu2 %v3652_v38  ;;  %1706 = vmatpush.bf16.msrb.mxu0 %v3728_v7  ;;  %v3720_v38 = vor.u32 %v4260_v37, %v3719_v34  ;;  %v3735_v7 = vld [vmem:[#allocation2 + $0xb10] sm:$0xf] }
 0x24f   : > { %1786 = vmatpush.bf16.msrb.mxu1 %v3760_v59 }
 0x250   : > { %1696 = vmatpush.bf16.msra.mxu3 %v3684_v43 }
 0x251   : > { %1684 = vmatpush.bf16.msra.mxu2 %v3648_v57  ;;  %1707 = vmatpush.bf16.msrb.mxu0 %v3724_v21  ;;  %v3739_v57 = vld [vmem:[#allocation2 + $0xb20] sm:$0xf]  ;;  %v906_v21 = vperm.slane %v903_v47, 1 }
 0x252   : > { %v3740_v4 = vor.u32 %v4265_v58, %v3739_v57  ;;  %v3892_v47 = vld [vmem:[#allocation2 + $0x7c0] sm:$0xf]  ;;  %v4300_v57 = vld [vmem:[#allocation2 + $0x794] sm:$0xf0] }
 0x253   : > { %1787 = vmatpush.bf16.msrb.mxu1 %v3756_v11  ;;  %v3708_v11 = vor.u32 %v4257_v6, %v3707_v5  ;;  %v3872_v5 = vld [vmem:[#allocation2 + $0x770] sm:$0xf]  ;;  %v4298_v6 = vld [vmem:[#allocation2 + $0x774] sm:$0xf0] }
 0x254   : > { %1697 = vmatpush.bf16.msra.mxu3 %v3680_v55  ;;  %v4301_v55 = vld [vmem:[#allocation2 + $0x7a4] sm:$0xf0] }
 0x255   : > { %1685 = vmatpush.bf16.msra.mxu2 %v3644_v8  ;;  %1708 = vmatpush.bf16.msrb.mxu0 %v3720_v38  ;;  %v4264_v8 = vld [vmem:[#allocation2 + $0xb14] sm:$0xf0]  ;;  %v3885_v56 = vor.u32 %v4301_v55, %v3884_v53  ;;  %v4273_v53 = vld [vmem:[#allocation2 + $0x5e4] sm:$0xf0] }
 0x256   : > { %v3736_v14 = vor.u32 %v4264_v8, %v3735_v7  ;;  %v3873_v7 = vor.u32 %v4298_v6, %v3872_v5  ;;  %v3792_v8 = vld [vmem:[#allocation2 + $0x630] sm:$0xf]  ;;  %v4272_v5 = vld [vmem:[#allocation2 + $0x5d4] sm:$0xf0] }
 0x257   : > { %1788 = vmatpush.bf16.msrb.mxu1 %v3752_v29 }
 0x258   : > { %1698 = vmatpush.bf16.msra.mxu3 %v3676_v10 }
 0x259   : > { %1686 = vmatpush.bf16.msra.mxu2 %v3640_v22  ;;  %1709 = vmatpush.bf16.msrb.mxu0 %v3716_v49  ;;  %v3672_v22 = vor.u32 %v4248_v13, %v3671_v12  ;;  %v4297_v12 = vld [vmem:[#allocation2 + $0x764] sm:$0xf0] }
 0x25b   : > { %1789 = vmatpush.bf16.msrb.mxu1 %v3748_v39 }
 0x25c   : > { %1699 = vmatpush.bf16.msra.mxu3 %v3672_v22  ;;  %v3864_v22 = vld [vmem:[#allocation2 + $0x750] sm:$0xf] }
 0x25d   : > { %1710 = vmatpush.bf16.msrb.mxu0 %v3712_v1 }
 0x25f   : > { %1790 = vmatpush.bf16.msrb.mxu1 %v3744_v50  ;;  %v3888_v50 = vld [vmem:[#allocation2 + $0x7b0] sm:$0xf] }
 0x260   : > { %v3889_v52 = vor.u32 %v4302_v51, %v3888_v50  ;;  %v1351_v50 = vld [vmem:[#allocation4 + $0x4] ss:$0 sm:$0xff] }
 0x261   : > { %1711 = vmatpush.bf16.msrb.mxu0 %v3708_v11  ;;  %v3868_v11 = vld [vmem:[#allocation2 + $0x760] sm:$0xf] }
 0x262   : > { %v3869_v13 = vor.u32 %v4297_v12, %v3868_v11  ;;  %v4293_v12 = vld [vmem:[#allocation2 + $0x724] sm:$0xf0] }
 0x263   : > { %1791 = vmatpush.bf16.msrb.mxu1 %v3740_v4  ;;  %v3797_v4 = vor.u32 %v4279_v3, %v3796_v2  ;;  %v1736_v3 = vld [vmem:[#allocation4 + $0x10] ss:$0 sm:$0xff] }
 0x265   : > { %1712 = vmatpush.bf16.msrb.mxu0 %v3704_v28  ;;  %2251 = vmatpush.bf16.msrb.mxu2 %v3797_v4  ;;  %v3768_v4 = vld [vmem:[#allocation2 + $0x5d0] sm:$0xf] }
 0x267   : > { %1792 = vmatpush.bf16.msrb.mxu1 %v3736_v14  ;;  %v3788_v14 = vld [vmem:[#allocation2 + $0x620] sm:$0xf] }
 0x268   : > { %v3789_v16 = vor.u32 %v4277_v15, %v3788_v14  ;;  %v4311_v14 = vld [vmem:[#allocation2 + $0x844] sm:$0xf0] }
 0x2a7   : > { %v4665_v61 = vpop.f32.mrf.mxu1  ;;  %v4667_v62 = vpop.f32.mrf.mxu0 }
 0x2a8   : > { %v1159_v19 = vadd.f32 %v4665_v61, %v905_v9  ;;  %v4278_v9 = vld [vmem:[#allocation2 + $0x634] sm:$0xf0] }
 0x2a9   : > { %v3793_v10 = vor.u32 %v4278_v9, %v3792_v8  ;;  %v3808_v8 = vld [vmem:[#allocation2 + $0x670] sm:$0xf]  ;;  %v4282_v9 = vld [vmem:[#allocation2 + $0x674] sm:$0xf0] }
 0x2aa   : > { %v3809_v11 = vor.u32 %v4282_v9, %v3808_v8  ;;  %v3836_v9 = vld [vmem:[#allocation2 + $0x6e0] sm:$0xf] }
 0x2ab   : > { %2252 = vmatpush.bf16.msrb.mxu2 %v3793_v10  ;;  %v3852_v10 = vld [vmem:[#allocation2 + $0x720] sm:$0xf] }
 0x2af   : > { %v1160_v30 = vpop.f32.mrf.mxu1  ;;  %v4669_v31 = vpop.f32.mrf.mxu3  ;;  %2253 = vmatpush.bf16.msrb.mxu2 %v3789_v16 }
 0x2b0   : > { %v1199_v35 = vpop.f32.mrf.mxu0  ;;  %v1198_v30 = vadd.f32 %v4667_v62, %v906_v21 }
 0x2b5   : > { %v1171_v48 = vpop.f32.mrf.mxu2 }
 0x2b6   : > { %v1172_v29 = vadd.f32 %v1171_v48, %v1159_v19  ;;  %v4303_v48 = vld [vmem:[#allocation2 + $0x7c4] sm:$0xf0] }
 0x2b7   : > { %v1186_v59 = vpop.f32.mrf.mxu3  ;;  %v1210_v0 = vpop.f32.mrf.mxu1  ;;  %v3893_v49 = vor.u32 %v4303_v48, %v3892_v47  ;;  %v4287_v19 = vld [vmem:[#allocation2 + $0x6c4] sm:$0xf0] }
 0x2b8   : > { %v1185_v32 = vadd.f32 %v4669_v31, %v1172_v29  ;;  %v1211_v33 = vadd.f32 %v1210_v0, %v1198_v30  ;;  %v3876_v59 = vld [vmem:[#allocation2 + $0x780] sm:$0xf]  ;;  %v4299_v0 = vld [vmem:[#allocation2 + $0x784] sm:$0xf0]  ;;  %v3784_v29 = vld [vmem:[#allocation2 + $0x610] sm:$0xf] }
 0x2b9   : > { %v3877_v1 = vor.u32 %v4299_v0, %v3876_v59  ;;  %v4276_v30 = vld [vmem:[#allocation2 + $0x614] sm:$0xf0]  ;;  %v4295_v47 = vld [vmem:[#allocation2 + $0x744] sm:$0xf0] }
 0x2ba   : > { %v1227_v36 = vmax.f32 %v1185_v32, 0.0  ;;  %v3785_v32 = vor.u32 %v4276_v30, %v3784_v29  ;;  %v4294_v0 = vld [vmem:[#allocation2 + $0x734] sm:$0xf0]  ;;  %v3848_v29 = vld [vmem:[#allocation2 + $0x710] sm:$0xf] }
 0x2bc   : > { %2254 = vmatpush.bf16.msrb.mxu2 %v3785_v32 }
 0x2bd   : > { %v1173_v18 = vpop.f32.mrf.mxu2 }
 0x2be   : > { %v3828_v18 = vld [vmem:[#allocation2 + $0x6c0] sm:$0xf] }
 0x2bf   : > { %v1212_v26 = vpop.f32.mrf.mxu1  ;;  %v3829_v21 = vor.u32 %v4287_v19, %v3828_v18  ;;  %v3853_v18 = vor.u32 %v4293_v12, %v3852_v10  ;;  %v4289_v10 = vld [vmem:[#allocation2 + $0x6e4] sm:$0xf0] }
 0x2c0   : > { %v4296_v26 = vld [vmem:[#allocation2 + $0x754] sm:$0xf0]  ;;  %v3837_v12 = vor.u32 %v4289_v10, %v3836_v9  ;;  %v4313_v9 = vld [vmem:[#allocation2 + $0x864] sm:$0xf0]  ;;  %v3960_v10 = vld [vmem:[#allocation2 + $0xb90] sm:$0xf] }
 0x2c1   : > { %v3865_v28 = vor.u32 %v4296_v26, %v3864_v22  ;;  %v3804_v26 = vld [vmem:[#allocation2 + $0x660] sm:$0xf] }
 0x2c5   : > { %v1223_v34 = vpop.f32.mrf.mxu2 }
 0x2c6   : > { %v1224_v35 = vadd.f32 %v1223_v34, %v1211_v33  ;;  %v3824_v33 = vld [vmem:[#allocation2 + $0x6b0] sm:$0xf]  ;;  %v4286_v34 = vld [vmem:[#allocation2 + $0x6b4] sm:$0xf0] }
 0x2c8   : > { %v1228_v37 = vmax.f32 %v1224_v35, 0.0  ;;  %v3825_v35 = vor.u32 %v4286_v34, %v3824_v33  ;;  %v4292_v34 = vld [vmem:[#allocation2 + $0x714] sm:$0xf0] }
 0x2ca   : > { %v1229_v61 = vpack.c.bf16 %v1228_v37, %v1227_v36  ;;  %v3780_v37 = vld [vmem:[#allocation2 + $0x600] sm:$0xf] }
 0x2cc   : > { %v1231_v24 = vunpack.c.l.b16 %v1229_v61  ;;  %v1232_v25 = vunpack.c.h.b16 %v1229_v61  ;;  %v4275_v61 = vld [vmem:[#allocation2 + $0x604] sm:$0xf0] }
 0x2cd   : > { %v1225_v38 = vpop.f32.mrf.mxu2 }
 0x2ce   : > { %v1233_v39 = vpack.c.b16 %v1231_v24, %v1231_v24  ;;  %v1234_v40 = vpack.c.b16 %v1232_v25, %v1232_v25  ;;  %v3781_v24 = vor.u32 %v4275_v61, %v3780_v37  ;;  %v3820_v25 = vld [vmem:[#allocation2 + $0x6a0] sm:$0xf]  ;;  %v4285_v38 = vld [vmem:[#allocation2 + $0x6a4] sm:$0xf0]  ;;  %v4310_v37 = vld [vmem:[#allocation2 + $0x834] sm:$0xf0] }
 0x2d0   : > { %1674 = vmatmul.bf16.vlgmr.msra.gmra.mxu1 %v1233_v39  ;;  %1687 = vmatmul.bf16.vlgmr.msra.gmra.mxu2 %v1234_v40  ;;  %v1236_v41 = vshll.u32 %v1233_v39, 16  ;;  %v1239_v42 = vshll.u32 %v1234_v40, 16  ;;  %v1245_v43 = vshrl.u32 %v1233_v39, 16  ;;  %v1247_v44 = vshrl.u32 %v1234_v40, 16 }
 0x2d1   : > { %2290 = vmatpush.bf16.msra.mxu1 %v3893_v49  ;;  %v3821_v40 = vor.u32 %v4285_v38, %v3820_v25  ;;  %2255 = vmatpush.bf16.msrb.mxu2 %v3781_v24  ;;  %v3849_v24 = vor.u32 %v4292_v34, %v3848_v29  ;;  %v4288_v29 = vld [vmem:[#allocation2 + $0x6d4] sm:$0xf0] }
 0x2d2   : > { %v1243_v62 = vsel %vm4537_vm5, 0, %v1236_v41  ;;  %v1244_v31 = vsel %vm4537_vm5, 0, %v1239_v42  ;;  %v1251_v45 = vsel %vm4537_vm5, %v1245_v43, 0  ;;  %v1252_v46 = vsel %vm4537_vm5, %v1247_v44, 0  ;;  %v3776_v41 = vld [vmem:[#allocation2 + $0x5f0] sm:$0xf] }
 0x2d3   : > { %1648 = vmatmul.bf16.vlgmr.msrb.gmra.mxu3 %v1243_v62  ;;  %1661 = vmatmul.bf16.vlgmr.msra.gmra.mxu0 %v1244_v31  ;;  %v4274_v42 = vld [vmem:[#allocation2 + $0x5f4] sm:$0xf0]  ;;  %v3816_v43 = vld [vmem:[#allocation2 + $0x690] sm:$0xf] }
 0x2d4   : > { %2264 = vmatpush.bf16.msrb.mxu3 %v3829_v21  ;;  %v3777_v31 = vor.u32 %v4274_v42, %v3776_v41  ;;  %v4284_v44 = vld [vmem:[#allocation2 + $0x694] sm:$0xf0]  ;;  %v3844_v41 = vld [vmem:[#allocation2 + $0x700] sm:$0xf] }
 0x2d5   : > { %2291 = vmatpush.bf16.msra.mxu1 %v3889_v52  ;;  %v3772_v52 = vld [vmem:[#allocation2 + $0x5e0] sm:$0xf]  ;;  %v4306_v34 = vld [vmem:[#allocation2 + $0x7f4] sm:$0xf0] }
 0x2d6   : > { %2256 = vmatpush.bf16.msrb.mxu2 %v3777_v31  ;;  %v3773_v55 = vor.u32 %v4273_v53, %v3772_v52 }
 0x2d8   : > { %2265 = vmatpush.bf16.msrb.mxu3 %v3825_v35  ;;  %v3920_v35 = vld [vmem:[#allocation2 + $0x830] sm:$0xf] }
 0x2d9   : > { %2292 = vmatpush.bf16.msra.mxu1 %v3885_v56  ;;  %v3812_v56 = vld [vmem:[#allocation2 + $0x680] sm:$0xf]  ;;  %v3921_v25 = vor.u32 %v4310_v37, %v3920_v35  ;;  %v3944_v35 = vld [vmem:[#allocation2 + $0x890] sm:$0xf] }
 0x2da   : > { %2257 = vmatpush.bf16.msrb.mxu2 %v3773_v55 }
 0x2dc   : > { %2266 = vmatpush.bf16.msrb.mxu3 %v3821_v40  ;;  %v4280_v40 = vld [vmem:[#allocation2 + $0x654] sm:$0xf0] }
 0x2e0   : > { %1793 = vmatmul.bf16.vlgmr.msrb.gmra.mxu1 %v4651_v27  ;;  %v3880_v27 = vld [vmem:[#allocation2 + $0x790] sm:$0xf] }
 0x2e1   : > { %v3881_v58 = vor.u32 %v4300_v57, %v3880_v27  ;;  %v4283_v27 = vld [vmem:[#allocation2 + $0x684] sm:$0xf0]  ;;  %v3856_v57 = vld [vmem:[#allocation2 + $0x730] sm:$0xf] }
 0x2e2   : > { %v3813_v59 = vor.u32 %v4283_v27, %v3812_v56  ;;  %v3857_v2 = vor.u32 %v4294_v0, %v3856_v57  ;;  %v3840_v56 = vld [vmem:[#allocation2 + $0x6f0] sm:$0xf]  ;;  %v4290_v27 = vld [vmem:[#allocation2 + $0x6f4] sm:$0xf0] }
 0x2e3   : > { %1700 = vmatmul.bf16.vlgmr.msra.gmra.mxu3 %v1251_v45  ;;  %1713 = vmatmul.bf16.vlgmr.msrb.gmra.mxu0 %v1252_v46  ;;  %v3860_v45 = vld [vmem:[#allocation2 + $0x740] sm:$0xf]  ;;  %v3817_v46 = vor.u32 %v4284_v44, %v3816_v43  ;;  %v4291_v43 = vld [vmem:[#allocation2 + $0x704] sm:$0xf0]  ;;  %v3912_v57 = vld [vmem:[#allocation2 + $0x810] sm:$0xf]  ;;  %v3841_v0 = vor.u32 %v4290_v27, %v3840_v56 }
 0x2e4   : > { %2293 = vmatpush.bf16.msra.mxu1 %v3881_v58  ;;  %v3861_v49 = vor.u32 %v4295_v47, %v3860_v45  ;;  %v3916_v44 = vld [vmem:[#allocation2 + $0x820] sm:$0xf]  ;;  %v4309_v45 = vld [vmem:[#allocation2 + $0x824] sm:$0xf0]  ;;  %v3968_v27 = vld [vmem:[#allocation2 + $0xbb0] sm:$0xf] }
 0x2e5   : > { %2267 = vmatpush.bf16.msrb.mxu3 %v3817_v46 }
 0x2e6   : > { %2277 = vmatpush.bf16.msra.mxu0 %v3861_v49  ;;  %v3956_v49 = vld [vmem:[#allocation2 + $0x8c0] sm:$0xf] }
 0x2e8   : > { %2294 = vmatpush.bf16.msra.mxu1 %v3877_v1 }
 0x2e9   : > { %2268 = vmatpush.bf16.msrb.mxu3 %v3813_v59 }
 0x2ea   : > { %2278 = vmatpush.bf16.msra.mxu0 %v3857_v2  ;;  %v3952_v2 = vld [vmem:[#allocation2 + $0x8b0] sm:$0xf] }
 0x2ec   : > { %2295 = vmatpush.bf16.msra.mxu1 %v3873_v7  ;;  %v3769_v7 = vor.u32 %v4272_v5, %v3768_v4  ;;  %v4318_v5 = vld [vmem:[#allocation2 + $0x8b4] sm:$0xf0] }
 0x2ed   : > { %2269 = vmatpush.bf16.msrb.mxu3 %v3809_v11 }
 0x2ee   : > { %2258 = vmatpush.bf16.msrb.mxu2 %v3769_v7  ;;  %2279 = vmatpush.bf16.msra.mxu0 %v3853_v18  ;;  %v3953_v7 = vor.u32 %v4318_v5, %v3952_v2  ;;  %v3948_v18 = vld [vmem:[#allocation2 + $0x8a0] sm:$0xf]  ;;  %v4314_v2 = vld [vmem:[#allocation2 + $0x874] sm:$0xf0] }
 0x2ef   : > { %v3964_v5 = vld [vmem:[#allocation2 + $0xba0] sm:$0xf] }
 0x2f0   : > { %2296 = vmatpush.bf16.msra.mxu1 %v3869_v13  ;;  %v3924_v13 = vld [vmem:[#allocation2 + $0x840] sm:$0xf] }
 0x2f1   : > { %v3925_v19 = vor.u32 %v4311_v14, %v3924_v13  ;;  %v3908_v13 = vld [vmem:[#allocation2 + $0x800] sm:$0xf]  ;;  %v4307_v14 = vld [vmem:[#allocation2 + $0x804] sm:$0xf0] }
 0x2f2   : > { %2280 = vmatpush.bf16.msra.mxu0 %v3849_v24  ;;  %v4316_v24 = vld [vmem:[#allocation2 + $0x894] sm:$0xf0] }
 0x2f3   : > { %2303 = vmatpush.bf16.msra.mxu2 %v3925_v19  ;;  %v4317_v19 = vld [vmem:[#allocation2 + $0x8a4] sm:$0xf0] }
 0x2f4   : > { %2297 = vmatpush.bf16.msra.mxu1 %v3865_v28  ;;  %v4281_v28 = vld [vmem:[#allocation2 + $0x664] sm:$0xf0] }
 0x2f5   : > { %v3805_v33 = vor.u32 %v4281_v28, %v3804_v26  ;;  %v3832_v28 = vld [vmem:[#allocation2 + $0x6d0] sm:$0xf] }
 0x2f7   : > { %2270 = vmatpush.bf16.msrb.mxu3 %v3805_v33  ;;  %2304 = vmatpush.bf16.msra.mxu2 %v3921_v25  ;;  %v3904_v33 = vld [vmem:[#allocation2 + $0x7f0] sm:$0xf] }
 0x34d   : > { %v4683_v36 = vpop.f32.mrf.mxu1 }
 0x350   : > { %v1662_v39 = vpop.f32.mrf.mxu0 }
 0x353   : > { %v4685_v62 = vpop.f32.mrf.mxu2 }
 0x355   : > { %v1677_v48 = vpop.f32.mrf.mxu1 }
 0x356   : > { %v1649_v51 = vpop.f32.mrf.mxu3  ;;  %v3917_v48 = vor.u32 %v4309_v45, %v3916_v44 }
 0x357   : > { %v1650_v1 = vadd.f32 %v1649_v51, %v1351_v50  ;;  %v4319_v50 = vld [vmem:[#allocation2 + $0x8c4] sm:$0xf0] }
 0x358   : > { %v1664_v58 = vpop.f32.mrf.mxu0  ;;  %v3957_v53 = vor.u32 %v4319_v50, %v3956_v49  ;;  %2305 = vmatpush.bf16.msra.mxu2 %v3917_v48  ;;  %v4315_v48 = vld [vmem:[#allocation2 + $0x884] sm:$0xf0] }
 0x359   : > { %v1663_v15 = vadd.f32 %v1662_v39, %v1650_v1  ;;  %v3800_v39 = vld [vmem:[#allocation2 + $0x650] sm:$0xf]  ;;  %v4308_v1 = vld [vmem:[#allocation2 + $0x814] sm:$0xf0] }
 0x35a   : > { %v3801_v31 = vor.u32 %v4280_v40, %v3800_v39  ;;  %v3913_v4 = vor.u32 %v4308_v1, %v3912_v57  ;;  %v3945_v39 = vor.u32 %v4316_v24, %v3944_v35  ;;  %v3900_v40 = vld [vmem:[#allocation2 + $0x7e0] sm:$0xf]  ;;  %v4322_v57 = vld [vmem:[#allocation2 + $0xbb4] sm:$0xf0] }
 0x35b   : > { %v1690_v6 = vpop.f32.mrf.mxu2  ;;  %v1676_v61 = vadd.f32 %v4683_v36, %v1663_v15  ;;  %v3845_v36 = vor.u32 %v4291_v43, %v3844_v41  ;;  %v4305_v41 = vld [vmem:[#allocation2 + $0x7e4] sm:$0xf0]  ;;  %v3969_v1 = vor.u32 %v4322_v57, %v3968_v27  ;;  %v2339_v27 = vld [vmem:[#allocation4 + $0x11] ss:$0 sm:$0xff] }
 0x35c   : > { %2271 = vmatpush.bf16.msrb.mxu3 %v3801_v31  ;;  %2306 = vmatpush.bf16.msra.mxu2 %v3913_v4  ;;  %v3972_v31 = vld [vmem:[#allocation2 + $0xbc0] sm:$0xf]  ;;  %v3901_v45 = vor.u32 %v4305_v41, %v3900_v40 }
 0x35d   : > { %v1794_v16 = vpop.f32.mrf.mxu1  ;;  %v1689_v47 = vadd.f32 %v4685_v62, %v1676_v61  ;;  %2281 = vmatpush.bf16.msra.mxu0 %v3845_v36  ;;  %v3905_v61 = vor.u32 %v4306_v34, %v3904_v33  ;;  %v4042_v41 = vld [vmem:[#allocation2 + $0xa00] sm:$0xf] }
 0x35e   : > { %v1795_v21 = vadd.f32 %v1794_v16, %v1736_v3  ;;  %v1651_v22 = vpop.f32.mrf.mxu3  ;;  %v3909_v16 = vor.u32 %v4307_v14, %v3908_v13  ;;  %v3928_v13 = vld [vmem:[#allocation2 + $0x850] sm:$0xf]  ;;  %v4312_v14 = vld [vmem:[#allocation2 + $0x854] sm:$0xf0] }
 0x35f   : > { %v3949_v22 = vor.u32 %v4317_v19, %v3948_v18 }
 0x360   : > { %v4687_v30 = vpack.c.bf16 %v1795_v21, %v1795_v21  ;;  %v1714_v32 = vpop.f32.mrf.mxu0  ;;  %2316 = vmatpush.bf16.msra.mxu3 %v3957_v53  ;;  %2307 = vmatpush.bf16.msra.mxu2 %v3909_v16  ;;  %v3896_v53 = vld [vmem:[#allocation2 + $0x7d0] sm:$0xf]  ;;  %v3929_v16 = vor.u32 %v4312_v14, %v3928_v13  ;;  %v4330_v14 = vld [vmem:[#allocation2 + $0x934] sm:$0xf0] }
 0x361   : > { %2282 = vmatpush.bf16.msra.mxu0 %v3841_v0  ;;  %v3987_v13 = vld [vmem:[#allocation2 + $0x930] sm:$0xf] }
 0x362   : > { %v1851_v38 = vunpack.c.l.b16 %v4687_v30 }
 0x364   : > { %v4691_v42 = vpack.c.b16 %v1851_v38, %v1851_v38  ;;  %2317 = vmatpush.bf16.msra.mxu3 %v3953_v7  ;;  %2308 = vmatpush.bf16.msra.mxu2 %v3905_v61  ;;  %v3932_v7 = vld [vmem:[#allocation2 + $0x860] sm:$0xf] }
 0x365   : > { %v1796_v46 = vpop.f32.mrf.mxu1  ;;  %2283 = vmatpush.bf16.msra.mxu0 %v3837_v12  ;;  %v4320_v12 = vld [vmem:[#allocation2 + $0xb94] sm:$0xf0] }
 0x366   : > { %v1854_v51 = vshrl.u32 %v4691_v42, 16  ;;  %v1701_v52 = vpop.f32.mrf.mxu3  ;;  %v1857_v58 = vshll.u32 %v4691_v42, 16  ;;  %v4323_v46 = vld [vmem:[#allocation2 + $0xbc4] sm:$0xf0] }
 0x367   : > { %v1702_v55 = vadd.f32 %v1701_v52, %v1689_v47  ;;  %v3940_v47 = vld [vmem:[#allocation2 + $0x880] sm:$0xf]  ;;  %v3973_v36 = vor.u32 %v4323_v46, %v3972_v31  ;;  %v4343_v31 = vld [vmem:[#allocation2 + $0xa04] sm:$0xf0]  ;;  %v4030_v46 = vld [vmem:[#allocation2 + $0x9d0] sm:$0xf] }
 0x368   : > { %v1716_v59 = vpop.f32.mrf.mxu0  ;;  %v1856_v62 = vrot.slane %v1854_v51, 7  ;;  %2318 = vmatpush.bf16.msra.mxu3 %v3949_v22  ;;  %v3941_v52 = vor.u32 %v4315_v48, %v3940_v47  ;;  %2309 = vmatpush.bf16.msra.mxu2 %v3901_v45  ;;  %v1862_v24 = vrot.slane %v1857_v58, 1  ;;  %v4341_v42 = vld [vmem:[#allocation2 + $0x9e4] sm:$0xf0] }
 0x369   : > { %v1715_v3 = vadd.f32 %v1714_v32, %v1702_v55  ;;  %v3833_v32 = vor.u32 %v4288_v29, %v3832_v28  ;;  %v4304_v55 = vld [vmem:[#allocation2 + $0x7d4] sm:$0xf0]  ;;  %v3936_v59 = vld [vmem:[#allocation2 + $0x870] sm:$0xf] }
 0x36a   : > { %v1859_v6 = vor.u32 %v1857_v58, %v1856_v62  ;;  %v3897_v56 = vor.u32 %v4304_v55, %v3896_v53  ;;  %v4034_v58 = vld [vmem:[#allocation2 + $0x9e0] sm:$0xf] }
 0x36b   : > { %v1718_v8 = vmax.f32 %v1715_v3, 0.0  ;;  %2284 = vmatpush.bf16.msra.mxu0 %v3833_v32  ;;  %v3937_v3 = vor.u32 %v4314_v2, %v3936_v59  ;;  %v4327_v2 = vld [vmem:[#allocation2 + $0x904] sm:$0xf0] }
 0x36c   : > { %v1861_v11 = vsel %vm4537_vm5, 0, %v1859_v6  ;;  %2319 = vmatpush.bf16.msra.mxu3 %v3945_v39  ;;  %2310 = vmatpush.bf16.msra.mxu2 %v3897_v56  ;;  %v4321_v6 = vld [vmem:[#allocation2 + $0xba4] sm:$0xf0] }
 0x36d   : > { %v1719_v15 = vpack.c.bf16 %v1718_v8, %v1718_v8  ;;  %2298 = vmatmul.bf16.vlgmr.msra.gmra.mxu1 %v1861_v11  ;;  %v3965_v8 = vor.u32 %v4321_v6, %v3964_v5  ;;  %v3933_v11 = vor.u32 %v4313_v9, %v3932_v7  ;;  %v4331_v5 = vld [vmem:[#allocation2 + $0x944] sm:$0xf0] }
 0x36e   : > { %v1703_v21 = vpop.f32.mrf.mxu3 }
 0x36f   : > { %v1800_v26 = vrot.slane %v1719_v15, 3  ;;  %2370 = vmatpush.bf16.msrb.mxu0 %v3973_v36 }
 0x370   : > { %2320 = vmatpush.bf16.msra.mxu3 %v3941_v52 }
 0x371   : > { %v1803_v37 = vsel %vm223_vm0, %v1719_v15, %v1800_v26  ;;  %v3961_v15 = vor.u32 %v4320_v12, %v3960_v10  ;;  %v4004_v10 = vld [vmem:[#allocation2 + $0x8f0] sm:$0xf] }
 0x372   : > { %v1806_v25 = vunpack.i.h.s16 %v1803_v37  ;;  %v3765_v38 = vpack.i.b16 %v1803_v37, %v1803_v37 }
 0x373   : > { %2371 = vmatpush.bf16.msrb.mxu0 %v3969_v1  ;;  %v4008_v1 = vld [vmem:[#allocation2 + $0x900] sm:$0xf] }
 0x374   : > { %v1808_v43 = vpack.i.b16 %v1806_v25, %v1806_v25  ;;  %v1809_v44 = vperm.slane %v3765_v38, 0  ;;  %2321 = vmatpush.bf16.msra.mxu3 %v3937_v3  ;;  %v1863_v25 = vor.u32 %v1862_v24, %v1854_v51  ;;  %v4035_v51 = vor.u32 %v4341_v42, %v4034_v58 }
 0x375   : > { %v4009_v3 = vor.u32 %v4327_v2, %v4008_v1  ;;  %v4346_v1 = vld [vmem:[#allocation2 + $0xa34] sm:$0xf0]  ;;  %v4055_v2 = vld [vmem:[#allocation2 + $0x9b0] sm:$0xf] }
 0x376   : > { %v1810_v49 = vperm.slane %v1808_v43, 0  ;;  %v1812_v50 = vpack.i.b16 %v1809_v44, %v1809_v44  ;;  %v1865_v38 = vsel %vm4639_vm13, %v1863_v25, 0  ;;  %v4043_v43 = vor.u32 %v4343_v31, %v4042_v41  ;;  %v4342_v44 = vld [vmem:[#allocation2 + $0x9f4] sm:$0xf0]  ;;  %v3979_v25 = vld [vmem:[#allocation2 + $0x910] sm:$0xf] }
 0x377   : > { %2372 = vmatpush.bf16.msrb.mxu0 %v3965_v8  ;;  %2531 = vmatpush.bf16.msrb.mxu1 %v4009_v3 }
 0x378   : > { %v1814_v62 = vperm.slane %v1812_v50, 0  ;;  %v1816_v0 = vpack.i.b16 %v1810_v49, %v1810_v49  ;;  %2322 = vmatpush.bf16.msra.mxu3 %v3933_v11  ;;  %v1962_v49 = vld [vmem:[#allocation4 + $0x5] ss:$0 sm:$0xff]  ;;  %v4326_v11 = vld [vmem:[#allocation2 + $0x8f4] sm:$0xf0] }
 0x379   : > { %v4005_v12 = vor.u32 %v4326_v11, %v4004_v10 }
 0x37a   : > { %v1818_v4 = vperm.slane %v1816_v0, 0  ;;  %1820 = vst [vmem:[#allocation1] ss:$9 sm:$0xff] %v1814_v62 }
 0x37b   : > { %2373 = vmatpush.bf16.msrb.mxu0 %v3961_v15  ;;  %2532 = vmatpush.bf16.msrb.mxu1 %v4005_v12  ;;  %v4017_v12 = vld [vmem:[#allocation2 + $0x960] sm:$0xf] }
 0x37c   : > { %1823 = vst [vmem:[#allocation1 + $0x1] ss:$9 sm:$0xff] %v1818_v4  ;;  %2323 = vmatpush.bf16.msra.mxu3 %v3929_v16  ;;  %v3988_v16 = vor.u32 %v4330_v14, %v3987_v13  ;;  %v4333_v13 = vld [vmem:[#allocation2 + $0x964] sm:$0xf0]  ;;  %v4068_v14 = vld [vmem:[#allocation2 + $0xa20] sm:$0xf] }
 0x383   : > { %v1824_v18 = vld [vmem:[#allocation1] sm:$0xff] }
 0x384   : > { %1833 = vst [vmem:[#allocation1] ss:$9 sm:$0xff] %v1814_v62  ;;  %v1825_v19 = vshrl.u32 %v1824_v18, 16  ;;  %v1828_v22 = vshll.u32 %v1824_v18, 16 }
 0x385   : > { %1835 = vst [vmem:[#allocation1 + $0x1] ss:$9 sm:$0xff] %v1818_v4 }
 0x386   : > { %v1827_v21 = vrot.slane %v1825_v19, 7 }
 0x388   : > { %v1830_v26 = vor.u32 %v1828_v22, %v1827_v21  ;;  %v4000_v22 = vld [vmem:[#allocation2 + $0x8e0] sm:$0xf] }
 0x38a   : > { %v1832_v28 = vsel %vm4537_vm5, 0, %v1830_v26  ;;  %v4325_v26 = vld [vmem:[#allocation2 + $0x8e4] sm:$0xf0] }
 0x38b   : > { %2259 = vmatmul.bf16.vlgmr.msrb.gmra.mxu2 %v1832_v28  ;;  %v4001_v28 = vor.u32 %v4325_v26, %v4000_v22  ;;  %v4051_v26 = vld [vmem:[#allocation2 + $0x9a0] sm:$0xf] }
 0x38c   : > { %v1836_v29 = vld [vmem:[#allocation1] sm:$0xff] }
 0x38d   : > { %1845 = vst [vmem:[#allocation1] ss:$9 sm:$0xff] %v1814_v62  ;;  %v1839_v32 = vshll.u32 %v1836_v29, 16  ;;  %v1837_v33 = vshrl.u32 %v1836_v29, 16  ;;  %v3983_v29 = vld [vmem:[#allocation2 + $0x920] sm:$0xf]  ;;  %2533 = vmatpush.bf16.msrb.mxu1 %v4001_v28 }
 0x38e   : > { %1847 = vst [vmem:[#allocation1 + $0x1] ss:$9 sm:$0xff] %v1818_v4  ;;  %v3991_v4 = vld [vmem:[#allocation2 + $0x940] sm:$0xf]  ;;  %v4337_v28 = vld [vmem:[#allocation2 + $0x9a4] sm:$0xf0] }
 0x38f   : > { %v1841_v34 = vrot.slane %v1839_v32, 1  ;;  %v3992_v8 = vor.u32 %v4331_v5, %v3991_v4  ;;  %v4329_v32 = vld [vmem:[#allocation2 + $0x924] sm:$0xf0]  ;;  %v4338_v5 = vld [vmem:[#allocation2 + $0x9b4] sm:$0xf0] }
 0x390   : > { %v4056_v11 = vor.u32 %v4338_v5, %v4055_v2 }
 0x391   : > { %v1842_v35 = vor.u32 %v1841_v34, %v1837_v33  ;;  %v3984_v34 = vor.u32 %v4329_v32, %v3983_v29  ;;  %v4013_v29 = vld [vmem:[#allocation2 + $0x950] sm:$0xf] }
 0x393   : > { %v1844_v37 = vsel %vm4639_vm13, %v1842_v35, 0 }
 0x394   : > { %2285 = vmatmul.bf16.vlgmr.msra.gmra.mxu0 %v1844_v37  ;;  %v3996_v37 = vld [vmem:[#allocation2 + $0x8d0] sm:$0xf] }
 0x395   : > { %v1848_v61 = vld [vmem:[#allocation1] sm:$0xff]  ;;  %2491 = vmatpush.bf16.msra.mxu0 %v3992_v8 }
 0x396   : > { %2272 = vmatmul.bf16.vlgmr.msrb.gmra.mxu3 %v1848_v61  ;;  %v4324_v61 = vld [vmem:[#allocation2 + $0x8d4] sm:$0xf0] }
 0x397   : > { %2664 = vmatpush.bf16.msrb.mxu3 %v4043_v43  ;;  %v3997_v24 = vor.u32 %v4324_v61, %v3996_v37  ;;  %v4064_v37 = vld [vmem:[#allocation2 + $0xa10] sm:$0xf]  ;;  %v4344_v61 = vld [vmem:[#allocation2 + $0xa14] sm:$0xf0] }
 0x399   : > { %2492 = vmatpush.bf16.msra.mxu0 %v3988_v16  ;;  %2534 = vmatpush.bf16.msrb.mxu1 %v3997_v24  ;;  %v4065_v24 = vor.u32 %v4344_v61, %v4064_v37  ;;  %v4107_v37 = vld [vmem:[#allocation2 + $0xa60] sm:$0xf]  ;;  %v4351_v61 = vld [vmem:[#allocation2 + $0xa64] sm:$0xf0] }
 0x39b   : > { %2311 = vmatmul.bf16.vlgmr.msra.gmra.mxu2 %v4687_v30  ;;  %v4038_v30 = vld [vmem:[#allocation2 + $0x9f0] sm:$0xf] }
 0x39c   : > { %v4039_v45 = vor.u32 %v4342_v44, %v4038_v30  ;;  %v4025_v30 = vld [vmem:[#allocation2 + $0x980] sm:$0xf]  ;;  %v4335_v44 = vld [vmem:[#allocation2 + $0x984] sm:$0xf0] }
 0x39d   : > { %2493 = vmatpush.bf16.msra.mxu0 %v3984_v34  ;;  %v4332_v34 = vld [vmem:[#allocation2 + $0x954] sm:$0xf0] }
 0x39e   : > { %2665 = vmatpush.bf16.msrb.mxu3 %v4039_v45  ;;  %v4076_v45 = vld [vmem:[#allocation2 + $0xa40] sm:$0xf] }
 0x3a2   : > { %2666 = vmatpush.bf16.msrb.mxu3 %v4035_v51 }
 0x3a4   : > { %3974 = vmatmul.msk.bf16.vlgmr.msrb.gmra.mxu0 %vm696_vm14, %v4617_v54  ;;  %v4340_v54 = vld [vmem:[#allocation2 + $0x9d4] sm:$0xf0] }
 0x3a5   : > { %v4031_v47 = vor.u32 %v4340_v54, %v4030_v46  ;;  %v4026_v46 = vor.u32 %v4335_v44, %v4025_v30  ;;  %v4347_v54 = vld [vmem:[#allocation2 + $0xa44] sm:$0xf0]  ;;  %v4348_v30 = vld [vmem:[#allocation2 + $0xbd4] sm:$0xf0] }
 0x3a6   : > { %2324 = vmatmul.bf16.vlgmr.msra.gmra.mxu3 %v1865_v38  ;;  %v4328_v38 = vld [vmem:[#allocation2 + $0x914] sm:$0xf0] }
 0x3a7   : > { %2667 = vmatpush.bf16.msrb.mxu3 %v4031_v47  ;;  %v4059_v47 = vld [vmem:[#allocation2 + $0x9c0] sm:$0xf]  ;;  %2595 = vmatpush.bf16.msrb.mxu2 %v4026_v46 }
 0x3ea   : > { %v2299_v39 = vpop.f32.mrf.mxu1 }
 0x3f2   : > { %v2301_v40 = vpop.f32.mrf.mxu1 }
 0x3f3   : > { %v3980_v40 = vor.u32 %v4328_v38, %v3979_v25  ;;  %v4047_v25 = vld [vmem:[#allocation2 + $0x990] sm:$0xf]  ;;  %v4336_v38 = vld [vmem:[#allocation2 + $0x994] sm:$0xf0] }
 0x3f5   : > { %2494 = vmatpush.bf16.msra.mxu0 %v3980_v40  ;;  %v4085_v40 = vld [vmem:[#allocation2 + $0xbe0] sm:$0xf] }
 0x40e   : > { %v2260_v60 = vpop.f32.mrf.mxu2 }
 0x40f   : > { %v2261_v53 = vadd.f32 %v2260_v60, %v1962_v49  ;;  %v4077_v60 = vor.u32 %v4347_v54, %v4076_v45 }
 0x411   : > { %v2286_v36 = vpop.f32.mrf.mxu0  ;;  %2756 = vmatpush.bf16.msra.mxu1 %v4077_v60 }
 0x416   : > { %v2262_v48 = vpop.f32.mrf.mxu2 }
 0x419   : > { %v2273_v50 = vpop.f32.mrf.mxu3  ;;  %v2288_v52 = vpop.f32.mrf.mxu0 }
 0x41a   : > { %v2274_v55 = vadd.f32 %v2273_v50, %v2261_v53 }
 0x41c   : > { %v2287_v57 = vadd.f32 %v2286_v36, %v2274_v55  ;;  %v4339_v36 = vld [vmem:[#allocation2 + $0x9c4] sm:$0xf0]  ;;  %v4021_v55 = vld [vmem:[#allocation2 + $0x970] sm:$0xf] }
 0x41d   : > { %v4060_v53 = vor.u32 %v4339_v36, %v4059_v47 }
 0x41e   : > { %v2312_v56 = vpop.f32.mrf.mxu2  ;;  %v2300_v6 = vadd.f32 %v2299_v39, %v2287_v57 }
 0x41f   : > { %2704 = vmatpush.bf16.msrb.mxu0 %v4060_v53 }
 0x420   : > { %v2313_v15 = vadd.f32 %v2312_v56, %v2300_v6  ;;  %v4334_v56 = vld [vmem:[#allocation2 + $0x974] sm:$0xf0] }
 0x421   : > { %v2275_v59 = vpop.f32.mrf.mxu3  ;;  %v2375_v62 = vpop.f32.mrf.mxu0  ;;  %v4022_v3 = vor.u32 %v4334_v56, %v4021_v55 }
 0x422   : > { %v2376_v0 = vadd.f32 %v2375_v62, %v2339_v27  ;;  %v4072_v27 = vld [vmem:[#allocation2 + $0xa30] sm:$0xf] }
 0x423   : > { %v4073_v4 = vor.u32 %v4346_v1, %v4072_v27  ;;  %2596 = vmatpush.bf16.msrb.mxu2 %v4022_v3  ;;  %2705 = vmatpush.bf16.msrb.mxu0 %v4056_v11 }
 0x424   : > { %v4716_v7 = vpack.c.bf16 %v2376_v0, %v2376_v0 }
 0x425   : > { %2757 = vmatpush.bf16.msra.mxu1 %v4073_v4 }
 0x426   : > { %4044 = vmatmul.msk.bf16.vlgmr.msrb.gmra.mxu3 %vm696_vm14, %v4716_v7  ;;  %v2314_v9 = vpop.f32.mrf.mxu2 }
 0x429   : > { %v2325_v18 = vpop.f32.mrf.mxu3  ;;  %v2377_v19 = vpop.f32.mrf.mxu0 }
 0x42a   : > { %v2326_v21 = vadd.f32 %v2325_v18, %v2313_v15  ;;  %v4018_v19 = vor.u32 %v4333_v13, %v4017_v12 }
 0x42c   : > { %v2329_v33 = vmax.f32 %v2326_v21, 0.0  ;;  %v4345_v21 = vld [vmem:[#allocation2 + $0xa24] sm:$0xf0]  ;;  %2597 = vmatpush.bf16.msrb.mxu2 %v4018_v19  ;;  %v4125_v19 = vld [vmem:[#allocation2 + $0xae0] sm:$0xf] }
 0x42d   : > { %v4069_v22 = vor.u32 %v4345_v21, %v4068_v14  ;;  %v4359_v21 = vld [vmem:[#allocation2 + $0xae4] sm:$0xf0] }
 0x42e   : > { %v2330_v35 = vpack.c.bf16 %v2329_v33, %v2329_v33  ;;  %v4052_v33 = vor.u32 %v4337_v28, %v4051_v26  ;;  %v4121_v28 = vld [vmem:[#allocation2 + $0xad0] sm:$0xf] }
 0x42f   : > { %2758 = vmatpush.bf16.msra.mxu1 %v4069_v22 }
 0x430   : > { %v2381_v39 = vrot.slane %v2330_v35, 3  ;;  %2706 = vmatpush.bf16.msrb.mxu0 %v4052_v33 }
 0x431   : > { %v2327_v41 = vpop.f32.mrf.mxu3 }
 0x432   : > { %v2384_v31 = vsel %vm223_vm0, %v2330_v35, %v2381_v39  ;;  %v2386_v43 = vsel %vm316_vm7, %v2330_v35, %v2381_v39  ;;  %v4014_v35 = vor.u32 %v4332_v34, %v4013_v29  ;;  %v4048_v39 = vor.u32 %v4336_v38, %v4047_v25  ;;  %v4349_v41 = vld [vmem:[#allocation2 + $0xbe4] sm:$0xf0]  ;;  %v4358_v29 = vld [vmem:[#allocation2 + $0xad4] sm:$0xf0]  ;;  %v4098_v25 = vld [vmem:[#allocation2 + $0xa80] sm:$0xf] }
 0x433   : > { %v2388_v58 = vrot.slane %v2386_v43, 1  ;;  %v2390_v42 = vunpack.i.h.s16 %v2384_v31  ;;  %v3975_v51 = vpack.i.b16 %v2384_v31, %v2384_v31  ;;  %2759 = vmatpush.bf16.msra.mxu1 %v4065_v24  ;;  %v4081_v31 = vld [vmem:[#allocation2 + $0xbd0] sm:$0xf]  ;;  %v4086_v43 = vor.u32 %v4349_v41, %v4085_v40  ;;  %v4353_v38 = vld [vmem:[#allocation2 + $0xa84] sm:$0xf0] }
 0x434   : > { %2598 = vmatpush.bf16.msrb.mxu2 %v4014_v35  ;;  %2707 = vmatpush.bf16.msrb.mxu0 %v4048_v39  ;;  %v4122_v33 = vor.u32 %v4358_v29, %v4121_v28  ;;  %v4108_v39 = vor.u32 %v4351_v61, %v4107_v37  ;;  %v4099_v40 = vor.u32 %v4353_v38, %v4098_v25  ;;  %v4134_v61 = vld [vmem:[#allocation2 + $0xac0] sm:$0xf] }
 0x435   : > { %v2392_v48 = vunpack.i.h.s16 %v2388_v58  ;;  %v2394_v49 = vpack.i.b16 %v2390_v42, %v2390_v42  ;;  %v3976_v50 = vpack.i.b16 %v2388_v58, %v2388_v58  ;;  %v2397_v52 = vperm.slane %v3975_v51, 0 }
 0x436   : > { %v4082_v58 = vor.u32 %v4348_v30, %v4081_v31  ;;  %v2606_v42 = vunpack.c.l.b16 %v4716_v7  ;;  %2957 = vmatpush.bf16.msra.mxu3 %v4099_v40  ;;  %v4116_v40 = vld [vmem:[#allocation2 + $0xaa0] sm:$0xf] }
 0x437   : > { %v2396_v57 = vpack.i.b16 %v2392_v48, %v2392_v48  ;;  %v2398_v59 = vperm.slane %v2394_v49, 0  ;;  %v2399_v62 = vperm.slane %v3976_v50, 0  ;;  %v2402_v0 = vpack.i.b16 %v2397_v52, %v2397_v52 }
 0x438   : > { %2800 = vmatpush.bf16.msra.mxu2 %v4086_v43  ;;  %v2607_v47 = vpack.c.b16 %v2606_v42, %v2606_v42 }
 0x439   : > { %v2400_v6 = vperm.slane %v2396_v57, 0  ;;  %v2404_v8 = vperm.slane %v2402_v0, 0  ;;  %v2406_v9 = vpack.i.b16 %v2398_v59, %v2398_v59  ;;  %v2410_v10 = vpack.i.b16 %v2399_v62, %v2399_v62 }
 0x43a   : > { %v2612_v36 = vshll.u32 %v2607_v47, 16  ;;  %v2609_v7 = vshrl.u32 %v2607_v47, 16  ;;  %v4350_v47 = vld [vmem:[#allocation2 + $0xa54] sm:$0xf0] }
 0x43b   : > { %v2408_v15 = vperm.slane %v2406_v9, 0  ;;  %v2412_v16 = vperm.slane %v2410_v10, 0  ;;  %v2414_v18 = vpack.i.b16 %v2400_v6, %v2400_v6  ;;  %2418 = vst [vmem:[#allocation1] ss:$9 sm:$0xff] %v2404_v8 }
 0x43c   : > { %2801 = vmatpush.bf16.msra.mxu2 %v4082_v58  ;;  %v2713_v49 = vrot.slane %v2612_v36, 1  ;;  %v2611_v50 = vrot.slane %v2609_v7, 7  ;;  %v4103_v58 = vld [vmem:[#allocation2 + $0xa50] sm:$0xf] }
 0x43d   : > { %v2416_v32 = vperm.slane %v2414_v18, 0  ;;  %2421 = vst [vmem:[#allocation1 + $0x1] ss:$9 sm:$0xff] %v2408_v15  ;;  %v2767_v18 = vld [vmem:[#allocation4 + $0x6] ss:$0 sm:$0xff] }
 0x43e   : > { %2424 = vst [vmem:[#allocation1 + $0x2] ss:$9 sm:$0xff] %v2412_v16  ;;  %v2714_v52 = vor.u32 %v2713_v49, %v2609_v7  ;;  %v2614_v55 = vor.u32 %v2612_v36, %v2611_v50 }
 0x43f   : > { %2427 = vst [vmem:[#allocation1 + $0x3] ss:$9 sm:$0xff] %v2416_v32 }
 0x440   : > { %v2716_v27 = vsel %vm4606_vm4, %v2714_v52, 0  ;;  %v2616_v0 = vsel %vm4537_vm5, 0, %v2614_v55 }
 0x446   : > { %v2428_v44 = vld [vmem:[#allocation1] sm:$0xff] }
 0x447   : > { %2453 = vst [vmem:[#allocation1] ss:$9 sm:$0xff] %v2404_v8  ;;  %v2429_v45 = vshrl.u32 %v2428_v44, 16  ;;  %v2432_v46 = vshll.u32 %v2428_v44, 16  ;;  %v4094_v44 = vld [vmem:[#allocation2 + $0xa70] sm:$0xf] }
 0x448   : > { %2455 = vst [vmem:[#allocation1 + $0x1] ss:$9 sm:$0xff] %v2408_v15 }
 0x449   : > { %2457 = vst [vmem:[#allocation1 + $0x2] ss:$9 sm:$0xff] %v2412_v16  ;;  %v2431_v51 = vrot.slane %v2429_v45, 7  ;;  %v4352_v45 = vld [vmem:[#allocation2 + $0xa74] sm:$0xf0] }
 0x44a   : > { %2459 = vst [vmem:[#allocation1 + $0x3] ss:$9 sm:$0xff] %v2416_v32  ;;  %v4095_v36 = vor.u32 %v4352_v45, %v4094_v44 }
 0x44b   : > { %v2434_v54 = vor.u32 %v2432_v46, %v2431_v51 }
 0x44c   : > { %2958 = vmatpush.bf16.msra.mxu3 %v4095_v36 }
 0x44d   : > { %v2436_v60 = vsel %vm4537_vm5, 0, %v2434_v54 }
 0x44e   : > { %4010 = vmatmul.msk.bf16.vlgmr.msrb.gmra.mxu1 %vm696_vm14, %v2436_v60 }
 0x451   : > { %v2460_v48 = vld [vmem:[#allocation1] sm:$0xff] }
 0x452   : > { %2540 = vst [vmem:[#allocation1] ss:$9 sm:$0xff] %v2404_v8  ;;  %3993 = vmatmul.msk.bf16.vlgmr.msra.gmra.mxu0 %vm696_vm14, %v2460_v48  ;;  %v4104_v48 = vor.u32 %v4350_v47, %v4103_v58  ;;  %v4143_v58 = vld [vmem:[#allocation2 + $0xb00] sm:$0xf]  ;;  %v4139_v47 = vld [vmem:[#allocation2 + $0xaf0] sm:$0xf] }
 0x453   : > { %2542 = vst [vmem:[#allocation1 + $0x1] ss:$9 sm:$0xff] %v2408_v15  ;;  %2986 = vmatpush.bf16.msra.mxu0 %v4108_v39 }
 0x454   : > { %2544 = vst [vmem:[#allocation1 + $0x2] ss:$9 sm:$0xff] %v2412_v16 }
 0x455   : > { %2546 = vst [vmem:[#allocation1 + $0x3] ss:$9 sm:$0xff] %v2416_v32 }
 0x457   : > { %2987 = vmatpush.bf16.msra.mxu0 %v4104_v48 }
 0x45c   : > { %v2547_v53 = vld [vmem:[#allocation1] sm:$0xff] }
 0x45d   : > { %v2550_v56 = vshll.u32 %v2547_v53, 16  ;;  %v2548_v57 = vshrl.u32 %v2547_v53, 16 }
 0x45e   : > { %4078 = vmatmul.msk.bf16.vlgmr.msra.gmra.mxu1 %vm696_vm14, %v2716_v27 }
 0x45f   : > { %v2552_v59 = vrot.slane %v2550_v56, 1 }
 0x461   : > { %v2553_v62 = vor.u32 %v2552_v59, %v2548_v57 }
 0x462   : > { %4061 = vmatmul.msk.bf16.vlgmr.msrb.gmra.mxu0 %vm696_vm14, %v2616_v0 }
 0x463   : > { %v2555_v1 = vsel %vm4606_vm4, %v2553_v62, 0 }
 0x464   : > { %4027 = vmatmul.msk.bf16.vlgmr.msrb.gmra.mxu2 %vm696_vm14, %v2555_v1 }
 0x474   : > { %4087 = vmatmul.msk.bf16.vlgmr.msra.gmra.mxu2 %vm486_vm3, %v4583_v23  ;;  %v4126_v23 = vor.u32 %v4359_v21, %v4125_v19 }
 0x476   : > { %3095 = vmatpush.bf16.msrb.mxu2 %v4126_v23 }
 0x47a   : > { %3096 = vmatpush.bf16.msrb.mxu2 %v4122_v33 }
 0x4a9   : > { %v2669_v2 = vpop.f32.mrf.mxu3 }
 0x4b1   : > { %v2671_v3 = vpop.f32.mrf.mxu3 }
 0x4cb   : > { %v2536_v4 = vpop.f32.mrf.mxu1 }
 0x4cf   : > { %v2496_v5 = vpop.f32.mrf.mxu0 }
 0x4d0   : > { %v2537_v13 = vadd.f32 %v2536_v4, %v2496_v5 }
 0x4d3   : > { %v2538_v6 = vpop.f32.mrf.mxu1 }
 0x4d7   : > { %v2498_v8 = vpop.f32.mrf.mxu0 }
 0x4db   : > { %v2761_v9 = vpop.f32.mrf.mxu1 }
 0x4df   : > { %v2709_v10 = vpop.f32.mrf.mxu0 }
 0x4e0   : > { %v2710_v12 = vadd.f32 %v2709_v10, %v2669_v2 }
 0x4e2   : > { %v2765_v63 = vadd.f32 %v2761_v9, %v2710_v12 }
 0x4e3   : > { %v2763_v11 = vpop.f32.mrf.mxu1 }
 0x4e4   : > { %v2775_v11 = vld [vmem:[#allocation4 + $0x12] ss:$0 sm:$0xff] }
 0x4e7   : > { %v2600_v14 = vpop.f32.mrf.mxu2  ;;  %v2711_v15 = vpop.f32.mrf.mxu0 }
 0x4e8   : > { %v2604_v16 = vadd.f32 %v2600_v14, %v2537_v13 }
 0x4ea   : > { %v2766_v22 = vadd.f32 %v2765_v63, %v2604_v16 }
 0x4ec   : > { %v2768_v26 = vadd.f32 %v2767_v18, %v2766_v22 }
 0x4ee   : > { %v2769_v32 = vmax.f32 %v2768_v26, 0.0 }
 0x4ef   : > { %v2602_v34 = vpop.f32.mrf.mxu2 }
 0x4f0   : > { %v2770_v35 = vpack.c.bf16 %v2769_v32, %v2769_v32 }
 0x4f2   : > { %v2811_v24 = vrot.slane %v2770_v35, 3 }
 0x4f4   : > { %v2814_v41 = vsel %vm223_vm0, %v2770_v35, %v2811_v24  ;;  %v2816_v31 = vsel %vm316_vm7, %v2770_v35, %v2811_v24  ;;  %v2819_v43 = vsel %vm320_vm8, %v2770_v35, %v2811_v24  ;;  %v2822_v30 = vsel %vm324_vm9, %v2770_v35, %v2811_v24  ;;  %v4357_v24 = vld [vmem:[#allocation2 + $0xac4] sm:$0xf0] }
 0x4f5   : > { %v2818_v42 = vrot.slane %v2816_v31, 1  ;;  %v2821_v51 = vrot.slane %v2819_v43, 2  ;;  %v2824_v46 = vrot.slane %v2822_v30, 3  ;;  %v2826_v54 = vunpack.i.h.s16 %v2814_v41  ;;  %v4130_v43 = vld [vmem:[#allocation2 + $0xab0] sm:$0xf] }
 0x4f6   : > { %v4088_v60 = vpack.i.b16 %v2814_v41, %v2814_v41  ;;  %v4135_v39 = vor.u32 %v4357_v24, %v4134_v61  ;;  %v4355_v41 = vld [vmem:[#allocation2 + $0xaa4] sm:$0xf0]  ;;  %v4356_v30 = vld [vmem:[#allocation2 + $0xab4] sm:$0xf0] }
 0x4f7   : > { %v2828_v7 = vunpack.i.h.s16 %v2818_v42  ;;  %v2830_v49 = vunpack.i.h.s16 %v2821_v51  ;;  %v2832_v50 = vunpack.i.h.s16 %v2824_v46  ;;  %v2834_v52 = vpack.i.b16 %v2826_v54, %v2826_v54  ;;  %v2803_v53 = vpop.f32.mrf.mxu2  ;;  %v4354_v54 = vld [vmem:[#allocation2 + $0xa94] sm:$0xf0] }
 0x4f8   : > { %v4089_v55 = vpack.i.b16 %v2818_v42, %v2818_v42  ;;  %v4090_v56 = vpack.i.b16 %v2821_v51, %v2821_v51  ;;  %v4091_v27 = vpack.i.b16 %v2824_v46, %v2824_v46  ;;  %v2841_v57 = vperm.slane %v4088_v60, 0  ;;  %3124 = vmatpush.bf16.msrb.mxu3 %v4135_v39  ;;  %v4361_v42 = vld [vmem:[#allocation2 + $0xb04] sm:$0xf0]  ;;  %v4112_v51 = vld [vmem:[#allocation2 + $0xa90] sm:$0xf] }
 0x4f9   : > { %v2836_v59 = vpack.i.b16 %v2828_v7, %v2828_v7  ;;  %v2838_v62 = vpack.i.b16 %v2830_v49, %v2830_v49  ;;  %v2840_v0 = vpack.i.b16 %v2832_v50, %v2832_v50  ;;  %v2842_v1 = vperm.slane %v2834_v52, 0  ;;  %v4360_v60 = vld [vmem:[#allocation2 + $0xaf4] sm:$0xf0] }
 0x4fa   : > { %v2843_v2 = vperm.slane %v4089_v55, 0  ;;  %v2845_v3 = vperm.slane %v4090_v56, 0  ;;  %v2847_v4 = vperm.slane %v4091_v27, 0  ;;  %v2850_v5 = vpack.i.b16 %v2841_v57, %v2841_v57 }
 0x4fb   : > { %v2844_v6 = vperm.slane %v2836_v59, 0  ;;  %v2846_v8 = vperm.slane %v2838_v62, 0  ;;  %v2848_v9 = vperm.slane %v2840_v0, 0  ;;  %v2854_v10 = vpack.i.b16 %v2842_v1, %v2842_v1 }
 0x4fc   : > { %v4742_v12 = vperm.slane %v2850_v5, 0  ;;  %v2858_v13 = vpack.i.b16 %v2843_v2, %v2843_v2  ;;  %v2866_v14 = vpack.i.b16 %v2845_v3, %v2845_v3  ;;  %v2874_v15 = vpack.i.b16 %v2847_v4, %v2847_v4 }
 0x4fd   : > { %v4744_v63 = vperm.slane %v2854_v10, 0  ;;  %v2862_v16 = vpack.i.b16 %v2844_v6, %v2844_v6  ;;  %v2870_v18 = vpack.i.b16 %v2846_v8, %v2846_v8  ;;  %v2878_v19 = vpack.i.b16 %v2848_v9, %v2848_v9 }
 0x4fe   : > { %v4746_v21 = vperm.slane %v2858_v13, 0  ;;  %v4748_v22 = vperm.slane %v2866_v14, 0  ;;  %2882 = vst [vmem:[#allocation1] ss:$9 sm:$0xff] %v4742_v12  ;;  %v2804_v23 = vadd.f32 %v2803_v53, %v2775_v11  ;;  %v4756_v32 = vperm.slane %v2874_v15, 0 }
 0x4ff   : > { %v4751_v26 = vperm.slane %v2862_v16, 0  ;;  %v4753_v28 = vperm.slane %v2870_v18, 0  ;;  %2885 = vst [vmem:[#allocation1 + $0x1] ss:$9 sm:$0xff] %v4744_v63  ;;  %v2805_v29 = vpop.f32.mrf.mxu2  ;;  %v2880_v35 = vperm.slane %v2878_v19, 0  ;;  %v4117_v31 = vor.u32 %v4355_v41, %v4116_v40 }
 0x500   : > { %2888 = vst [vmem:[#allocation1 + $0x2] ss:$9 sm:$0xff] %v4746_v21  ;;  %v2808_v33 = vpack.c.bf16 %v2804_v23, %v2804_v23  ;;  %v2806_v34 = vadd.f32 %v2805_v29, %v2775_v11  ;;  %v4131_v45 = vor.u32 %v4356_v30, %v4130_v43  ;;  %v4144_v46 = vor.u32 %v4361_v42, %v4143_v58  ;;  %v3173_v23 = vld [vmem:[#allocation4 + $0x7] ss:$0 sm:$0xff] }
 0x501   : > { %2891 = vst [vmem:[#allocation1 + $0x3] ss:$9 sm:$0xff] %v4751_v26  ;;  %3043 = vmatpush.bf16.msrb.mxu1 %v4117_v31  ;;  %v4113_v36 = vor.u32 %v4354_v54, %v4112_v51  ;;  %v4140_v48 = vor.u32 %v4360_v60, %v4139_v47 }
 0x502   : > { %2894 = vst [vmem:[#allocation1 + $0x4] ss:$9 sm:$0xff] %v4748_v22  ;;  %v2809_v37 = vpack.c.bf16 %v2806_v34, %v2806_v34  ;;  %v3055_v25 = vunpack.c.l.b16 %v2808_v33  ;;  %3161 = vmatpush.bf16.msrb.mxu0 %v4144_v46  ;;  %3125 = vmatpush.bf16.msrb.mxu3 %v4131_v45 }
 0x503   : > { %2897 = vst [vmem:[#allocation1 + $0x5] ss:$9 sm:$0xff] %v4753_v28 }
 0x504   : > { %2900 = vst [vmem:[#allocation1 + $0x6] ss:$9 sm:$0xff] %v4756_v32  ;;  %v3056_v38 = vunpack.c.l.b16 %v2809_v37 }
 0x505   : > { %2903 = vst [vmem:[#allocation1 + $0x7] ss:$9 sm:$0xff] %v2880_v35  ;;  %3044 = vmatpush.bf16.msrb.mxu1 %v4113_v36 }
 0x506   : > { %v3057_v44 = vpack.c.b16 %v3056_v38, %v3055_v25  ;;  %3162 = vmatpush.bf16.msrb.mxu0 %v4140_v48 }
 0x508   : > { %4127 = vmatmul.msk.bf16.vlgmr.msrb.gmra.mxu2 %vm486_vm3, %v3057_v44  ;;  %v3062_v56 = vshll.u32 %v3057_v44, 16  ;;  %v3059_v59 = vshrl.u32 %v3057_v44, 16 }
 0x50a   : > { %v3132_v57 = vrot.slane %v3062_v56, 1  ;;  %v3061_v1 = vrot.slane %v3059_v59, 7 }
 0x50c   : > { %v2904_v7 = vld [vmem:[#allocation1] sm:$0xff]  ;;  %v3133_v62 = vor.u32 %v3132_v57, %v3059_v59  ;;  %v3064_v2 = vor.u32 %v3062_v56, %v3061_v1 }
 0x50d   : > { %2921 = vst [vmem:[#allocation1] ss:$9 sm:$0xff] %v4742_v12  ;;  %v2905_v49 = vshrl.u32 %v2904_v7, 16  ;;  %v2908_v52 = vshll.u32 %v2904_v7, 16 }
 0x50e   : > { %2923 = vst [vmem:[#allocation1 + $0x1] ss:$9 sm:$0xff] %v4744_v63  ;;  %v3135_v0 = vsel %vm4541_vm6, %v3133_v62, 0  ;;  %v3066_v5 = vsel %vm4537_vm5, 0, %v3064_v2 }
 0x50f   : > { %2925 = vst [vmem:[#allocation1 + $0x2] ss:$9 sm:$0xff] %v4746_v21  ;;  %v2907_v50 = vrot.slane %v2905_v49, 7 }
 0x510   : > { %2927 = vst [vmem:[#allocation1 + $0x3] ss:$9 sm:$0xff] %v4751_v26 }
 0x511   : > { %2929 = vst [vmem:[#allocation1 + $0x4] ss:$9 sm:$0xff] %v4748_v22  ;;  %v2910_v53 = vor.u32 %v2908_v52, %v2907_v50 }
 0x512   : > { %2931 = vst [vmem:[#allocation1 + $0x5] ss:$9 sm:$0xff] %v4753_v28 }
 0x513   : > { %2933 = vst [vmem:[#allocation1 + $0x6] ss:$9 sm:$0xff] %v4756_v32  ;;  %v2912_v55 = vsel %vm4537_vm5, 0, %v2910_v53 }
 0x514   : > { %2935 = vst [vmem:[#allocation1 + $0x7] ss:$9 sm:$0xff] %v2880_v35  ;;  %4109 = vmatmul.msk.bf16.vlgmr.msra.gmra.mxu0 %vm486_vm3, %v2912_v55 }
 0x51b   : > { %v2936_v27 = vld [vmem:[#allocation1] sm:$0xff] }
 0x51c   : > { %4100 = vmatmul.msk.bf16.vlgmr.msra.gmra.mxu3 %vm486_vm3, %v2936_v27  ;;  %2994 = vst [vmem:[#allocation1] ss:$9 sm:$0xff] %v4742_v12 }
 0x51d   : > { %2996 = vst [vmem:[#allocation1 + $0x1] ss:$9 sm:$0xff] %v4744_v63 }
 0x51e   : > { %2998 = vst [vmem:[#allocation1 + $0x2] ss:$9 sm:$0xff] %v4746_v21 }
 0x51f   : > { %3000 = vst [vmem:[#allocation1 + $0x3] ss:$9 sm:$0xff] %v4751_v26 }
 0x520   : > { %3002 = vst [vmem:[#allocation1 + $0x4] ss:$9 sm:$0xff] %v4748_v22 }
 0x521   : > { %3004 = vst [vmem:[#allocation1 + $0x5] ss:$9 sm:$0xff] %v4753_v28 }
 0x522   : > { %3006 = vst [vmem:[#allocation1 + $0x6] ss:$9 sm:$0xff] %v4756_v32 }
 0x523   : > { %3008 = vst [vmem:[#allocation1 + $0x7] ss:$9 sm:$0xff] %v2880_v35 }
 0x524   : > { %4145 = vmatmul.msk.bf16.vlgmr.msrb.gmra.mxu0 %vm486_vm3, %v3135_v0 }
 0x52a   : > { %v3009_v3 = vld [vmem:[#allocation1] sm:$0xff] }
 0x52b   : > { %v3012_v4 = vshll.u32 %v3009_v3, 16  ;;  %v3010_v6 = vshrl.u32 %v3009_v3, 16 }
 0x52c   : > { %4136 = vmatmul.msk.bf16.vlgmr.msrb.gmra.mxu3 %vm486_vm3, %v3066_v5 }
 0x52d   : > { %v3014_v8 = vrot.slane %v3012_v4, 1 }
 0x52f   : > { %v3015_v9 = vor.u32 %v3014_v8, %v3010_v6 }
 0x531   : > { %v3017_v10 = vsel %vm4541_vm6, %v3015_v9, 0 }
 0x532   : > { %4118 = vmatmul.msk.bf16.vlgmr.msrb.gmra.mxu1 %vm486_vm3, %v3017_v10 }
 0x58b   : > { %v3098_v15 = vpop.f32.mrf.mxu2 }
 0x591   : > { %v2989_v11 = vpop.f32.mrf.mxu0 }
 0x593   : > { %v3100_v20 = vpop.f32.mrf.mxu2 }
 0x599   : > { %v2991_v13 = vpop.f32.mrf.mxu0 }
 0x59f   : > { %v2960_v12 = vpop.f32.mrf.mxu3 }
 0x5a0   : > { %v2990_v18 = vadd.f32 %v2989_v11, %v2960_v12 }
 0x5a1   : > { %v3164_v63 = vpop.f32.mrf.mxu0 }
 0x5a7   : > { %v2962_v14 = vpop.f32.mrf.mxu3 }
 0x5a8   : > { %v2992_v33 = vadd.f32 %v2991_v13, %v2962_v14 }
 0x5a9   : > { %v3166_v35 = vpop.f32.mrf.mxu0 }
 0x5af   : > { %v3046_v16 = vpop.f32.mrf.mxu1  ;;  %v3127_v17 = vpop.f32.mrf.mxu3 }
 0x5b0   : > { %v3128_v19 = vadd.f32 %v3127_v17, %v3098_v15  ;;  %v3051_v21 = vadd.f32 %v3046_v16, %v2990_v18 }
 0x5b2   : > { %v3169_v22 = vadd.f32 %v3164_v63, %v3128_v19 }
 0x5b4   : > { %v3171_v26 = vadd.f32 %v3169_v22, %v3051_v21 }
 0x5b6   : > { %v3174_v28 = vadd.f32 %v3173_v23, %v3171_v26 }
 0x5b7   : > { %v3048_v29 = vpop.f32.mrf.mxu1  ;;  %v3129_v32 = vpop.f32.mrf.mxu3 }
 0x5b8   : > { %3176 = vst.msk [vmem:[%s204_s8] sm:$0xff] %vm229_vm1, %v3174_v28  ;;  %v3130_v34 = vadd.f32 %v3129_v32, %v3100_v20  ;;  %v3052_v37 = vadd.f32 %v3048_v29, %v2992_v33 }
 0x5ba   : > { %v3170_v61 = vadd.f32 %v3166_v35, %v3130_v34 }
 0x5bc   : > { %v3172_v24 = vadd.f32 %v3170_v61, %v3052_v37 }
 0x5be   : > { %v3175_v25 = vadd.f32 %v3173_v23, %v3172_v24 }
 0x5c0   : > { %3177 = vst.msk [vmem:[%s204_s8 + $0x8] sm:$0xff] %vm229_vm1, %v3175_v25 }
 0x5c1 PF: > { %s15_s12 = sadd.s32 1, %s4470_s12  }
 0x5c2   : > { %p12_p7 = scmp.ge.s32.totalorder %s15_s12, 4  }
 0x5c4   :  { %14 = sbr.rel (!%p12_p7) target bundleno = 2 (0x2), region = 105 }
 0x5c9   :  { %3199 = vsyncpa [#allocation3], 1 }
 0x5ca   :  { %3201 = vsyncpa [#allocation3 + $0x1], 1 }
 0x5cb   :  { %3202 = vsyncpa [#allocation5], 1 }

</bundles_post_ra>
